<compile_context>
chip_gen: v7x
topology: tpu7x:2x2x1
jax: 0.10.0
libtpu: 0.0.40
codegen_flags: <defaults>
</compile_context>

<pallas_src>
import functools
import math

import jax
import jax.numpy as jnp
from jax import lax
from jax.experimental import pallas as pl
from jax.experimental.pallas import tpu as pltpu


# ----------------------------------------------------------------------------
# tile helpers
# ----------------------------------------------------------------------------
def _pick_tile(dim_size: int, preferred) -> int:
    """Largest preferred tile that divides dim_size, else the full dim."""
    for p in preferred:
        if dim_size % p == 0:
            return p
    return dim_size


def _matmul_tiles(M: int, N: int, K: int, bytes_per: int = 4,
                  budget: int = 8 * 1024 * 1024):
    """Pick (tm, tn, tk) under a conservative VMEM budget.

    Budget counts double-buffered input/output tiles plus the f32 accumulator,
    leaving headroom under v5e's 16 MiB default scoped VMEM and v7x's 64 MiB
    physical VMEM.
    """
    def fp(tm, tn, tk):
        return bytes_per * 2 * (tm * tk + tn * tk + tm * tn) + 4 * tm * tn

    tm_opts = [t for t in (512, 256, 128, 64, 32, 16, 8) if M % t == 0] or [M]
    tn_opts = [t for t in (512, 256, 128) if N % t == 0] or [N]
    tk_opts = [t for t in (1024, 512, 256, 128) if K % t == 0] or [K]
    tm, tn, tk = tm_opts[0], tn_opts[0], tk_opts[0]
    for tk in tk_opts:
        if fp(tm, tn, tk) <= budget:
            break
    for tn in tn_opts:
        if fp(tm, tn, tk) <= budget:
            break
    for tm in tm_opts:
        if fp(tm, tn, tk) <= budget:
            break
    return tm, tn, tk


# ----------------------------------------------------------------------------
# tiled "NT" matmul kernel: a (M, K) x w (N, K) -> (M, N), no weight transpose
# ----------------------------------------------------------------------------
def _matmul_nt_kernel(a_ref, b_ref, o_ref, acc_ref):
    @pl.when(pl.program_id(2) == 0)
    def _():
        acc_ref[...] = jnp.zeros_like(acc_ref)

    acc_ref[...] += lax.dot_general(
        a_ref[...], b_ref[...], (((1,), (1,)), ((), ())),
        preferred_element_type=jnp.float32)

    @pl.when(pl.program_id(2) == pl.num_programs(2) - 1)
    def _():
        o_ref[...] = acc_ref[...].astype(o_ref.dtype)


def linear_nt(a: jax.Array, w: jax.Array) -> jax.Array:
    """a: (M, K), w: (N, K) -> (M, N) == a @ w.T with f32 MXU accumulation."""
    M, K = a.shape
    N, K2 = w.shape
    assert K == K2
    tm, tn, tk = _matmul_tiles(M, N, K)
    out_dtype = jnp.promote_types(a.dtype, w.dtype)
    return pl.pallas_call(
        _matmul_nt_kernel,
        out_shape=jax.ShapeDtypeStruct((M, N), out_dtype),
        grid_spec=pltpu.PrefetchScalarGridSpec(
            num_scalar_prefetch=0,
            grid=(M // tm, N // tn, K // tk),
            in_specs=[
                pl.BlockSpec((tm, tk), lambda i, j, k: (i, k)),
                pl.BlockSpec((tn, tk), lambda i, j, k: (j, k)),
            ],
            out_specs=pl.BlockSpec((tm, tn), lambda i, j, k: (i, j)),
            scratch_shapes=[pltpu.VMEM((tm, tn), jnp.float32)],
        ),
        compiler_params=pltpu.CompilerParams(
            dimension_semantics=("parallel", "parallel", "arbitrary")),
    )(a, w)


# ----------------------------------------------------------------------------
# causal flash attention with fused RoPE and GQA (online softmax)
# ----------------------------------------------------------------------------
def _flash_kernel(q_ref, k_ref, v_ref, ccq_ref, ssq_ref, cck_ref, ssk_ref,
                  o_ref, m_sc, l_sc, acc_sc, *, tq: int, tk: int, half: int):
    qi = pl.program_id(2)
    kj = pl.program_id(3)
    nk = pl.num_programs(3)

    @pl.when(kj == 0)
    def _init():
        m_sc[...] = jnp.full_like(m_sc, -1e30)
        l_sc[...] = jnp.zeros_like(l_sc)
        acc_sc[...] = jnp.zeros_like(acc_sc)

    def _online_update(apply_mask: bool):
        q0 = q_ref[0].astype(jnp.float32)          # (tq, hd)  [real|imag] halves
        k0 = k_ref[0].astype(jnp.float32)          # (tk, hd)
        v0 = v_ref[0].astype(jnp.float32)          # (tk, hd)
        # Fused RoPE via XLU roll (halves swap); Q tables carry 1/sqrt(hd).
        q = q0 * ccq_ref[...] + pltpu.roll(q0, shift=half, axis=1) * ssq_ref[...]
        k = k0 * cck_ref[...] + pltpu.roll(k0, shift=half, axis=1) * ssk_ref[...]
        s = lax.dot_general(q, k, (((1,), (1,)), ((), ())),
                            preferred_element_type=jnp.float32)   # (tq, tk)
        if apply_mask:  # only diagonal-straddling blocks pay for the mask
            q_ids = qi * tq + lax.broadcasted_iota(jnp.int32, (tq, tk), 0)
            k_ids = kj * tk + lax.broadcasted_iota(jnp.int32, (tq, tk), 1)
            s = jnp.where(q_ids >= k_ids, s, -1e30)
        m_prev = m_sc[...]
        m_new = jnp.maximum(m_prev, jnp.max(s, axis=-1, keepdims=True))
        alpha = jnp.exp(m_prev - m_new)
        p = jnp.exp(s - m_new)
        l_sc[...] = alpha * l_sc[...] + jnp.sum(p, axis=-1, keepdims=True)
        acc_sc[...] = alpha * acc_sc[...] + jnp.dot(
            p, v0, preferred_element_type=jnp.float32)
        m_sc[...] = m_new

    # Block classification relative to the causal diagonal.
    fully_below = qi * tq >= kj * tk + tk - 1                       # no mask
    straddles = jnp.logical_and(kj * tk <= qi * tq + tq - 1,
                                jnp.logical_not(fully_below))       # masked
    # Fully-above-diagonal blocks are skipped entirely (and their K/V DMA is
    # suppressed by the clamped index_map).

    @pl.when(fully_below)
    def _():
        _online_update(False)

    @pl.when(straddles)
    def _():
        _online_update(True)

    @pl.when(kj == nk - 1)
    def _finalize():
        inv_l = pl.reciprocal(l_sc[...], approx=True)
        o_ref[0] = (acc_sc[...] * inv_l).astype(o_ref.dtype)


def flash_attention(qkv, rope_ccq, rope_ssq, rope_cck, rope_ssk,
                    n_heads: int, n_kv_heads: int, head_dim: int):
    """qkv: (B, S, (n_heads + 2*n_kv_heads)*head_dim), heads laid out
    [q heads | k heads | v heads] along the last dim.  Returns (B, S, H*hd)."""
    B, S, n_tot = qkv.shape
    hd = head_dim
    n_rep = n_heads // n_kv_heads
    assert n_tot == (n_heads + 2 * n_kv_heads) * hd
    assert hd % 2 == 0
    # Lane-block head addressing needs a 128-lane-dense head_dim.
    assert hd % 128 == 0, "this kernel requires head_dim % 128 == 0"
    half = hd // 2

    tq = _pick_tile(S, (256, 128, 64, 32, 16, 8))
    tk = _pick_tile(S, (512, 256, 128, 64, 32, 16, 8))

    def clamp(i, j):
        # Clamp fully-masked (above-diagonal) kv blocks to the last needed one
        # so the pipeline does not re-DMA K/V for skipped iterations.
        return jnp.minimum(j, (i * tq + tq - 1) // tk)

    def q_map(b, h, i, j):
        return (b, i, h)

    def k_map(b, h, i, j):
        return (b, clamp(i, j), n_heads + h // n_rep)

    def v_map(b, h, i, j):
        return (b, clamp(i, j), n_heads + n_kv_heads + h // n_rep)

    def fq_map(b, h, i, j):
        return (i, 0)

    def fk_map(b, h, i, j):
        return (clamp(i, j), 0)

    return pl.pallas_call(
        functools.partial(_flash_kernel, tq=tq, tk=tk, half=half),
        out_shape=jax.ShapeDtypeStruct((B, S, n_heads * hd), qkv.dtype),
        grid_spec=pltpu.PrefetchScalarGridSpec(
            num_scalar_prefetch=0,
            grid=(B, n_heads, S // tq, S // tk),
            in_specs=[
                pl.BlockSpec((1, tq, hd), q_map),     # Q    (from fused qkv)
                pl.BlockSpec((1, tk, hd), k_map),     # K    (GQA via index_map)
                pl.BlockSpec((1, tk, hd), v_map),     # V    (GQA via index_map)
                pl.BlockSpec((tq, hd), fq_map),       # RoPE cos for Q rows (*scale)
                pl.BlockSpec((tq, hd), fq_map),       # RoPE sin for Q rows (*scale)
                pl.BlockSpec((tk, hd), fk_map),       # RoPE cos for K rows
                pl.BlockSpec((tk, hd), fk_map),       # RoPE sin for K rows
            ],
            out_specs=pl.BlockSpec((1, tq, hd), q_map),
            scratch_shapes=[
                pltpu.VMEM((tq, 1), jnp.float32),     # running max
                pltpu.VMEM((tq, 1), jnp.float32),     # running denom
                pltpu.VMEM((tq, hd), jnp.float32),    # output accumulator
            ],
        ),
        compiler_params=pltpu.CompilerParams(
            dimension_semantics=("parallel", "parallel", "parallel",
                                 "arbitrary")),
    )(qkv, qkv, qkv, rope_ccq, rope_ssq, rope_cck, rope_ssk)


# ----------------------------------------------------------------------------
# full Attention forward (matches the PyTorch module, dropout = 0.0)
# ----------------------------------------------------------------------------
def _rope_split_perm(num_heads: int, head_dim: int):
    """Row permutation putting each head's even (real) rows first, odd (imag)
    rows second, so RoPE acts on contiguous halves."""
    within = jnp.concatenate([jnp.arange(0, head_dim, 2),
                              jnp.arange(1, head_dim, 2)])
    return (jnp.arange(num_heads)[:, None] * head_dim + within[None, :]).reshape(-1)


def attention_forward(x, wq, wk, wv, wo, freqs_cos, freqs_sin,
                      n_heads: int, n_kv_heads: int):
    B, S, D = x.shape
    head_dim = D // n_heads
    M = B * S
    scale = 1.0 / math.sqrt(head_dim)

    # --- one-time weight / table preprocessing (cached in a real model) ----
    # Permute Wq/Wk rows to a [real_half | imag_half] per-head layout; QK^T is
    # invariant to the (consistent) permutation so attention scores (and the
    # module output) are unchanged.  Fuse Q/K/V into a single weight.
    perm_q = _rope_split_perm(n_heads, head_dim)
    perm_k = _rope_split_perm(n_kv_heads, head_dim)
    w_qkv = jnp.concatenate([wq[perm_q], wk[perm_k], wv], axis=0)   # (Ntot, D)

    # Split-half RoPE tables; 1/sqrt(head_dim) folded into the Q tables.
    cc = jnp.concatenate([freqs_cos, freqs_cos], axis=-1).astype(jnp.float32)
    ss = jnp.concatenate([-freqs_sin, freqs_sin], axis=-1).astype(jnp.float32)
    rope_ccq = cc * scale
    rope_ssq = ss * scale
    rope_cck = cc
    rope_ssk = ss

    # --- fused QKV projection: x read once, weights kept (N, K) ------------
    qkv = linear_nt(x.reshape(M, D), w_qkv).reshape(B, S, -1)

    # --- fused RoPE + causal flash attention (GQA via index_map) -----------
    o = flash_attention(qkv, rope_ccq, rope_ssq, rope_cck, rope_ssk,
                        n_heads, n_kv_heads, head_dim)

    # --- output projection --------------------------------------------------
    out = linear_nt(o.reshape(M, n_heads * head_dim), wo)
    # TODO(synk): attn_dropout / resid_dropout have p=0.0 in this eval config; omitted.
    return out.reshape(B, S, D)


# ----------------------------------------------------------------------------
# pure-JAX reference (mirrors the PyTorch math)
# ----------------------------------------------------------------------------
def reference_attention(x, wq, wk, wv, wo, freqs_cos, freqs_sin,
                        n_heads: int, n_kv_heads: int):
    B, S, D = x.shape
    hd = D // n_heads
    n_rep = n_heads // n_kv_heads
    xq = (x @ wq.T).reshape(B, S, n_heads, hd)
    xk = (x @ wk.T).reshape(B, S, n_kv_heads, hd)
    xv = (x @ wv.T).reshape(B, S, n_kv_heads, hd)
    xq_r, xq_i = xq[..., 0::2], xq[..., 1::2]
    xk_r, xk_i = xk[..., 0::2], xk[..., 1::2]
    cos = freqs_cos[None, :, None, :]
    sin = freqs_sin[None, :, None, :]
    xq = jnp.stack([xq_r * cos - xq_i * sin,
                    xq_r * sin + xq_i * cos], axis=-1).reshape(B, S, n_heads, hd)
    xk = jnp.stack([xk_r * cos - xk_i * sin,
                    xk_r * sin + xk_i * cos], axis=-1).reshape(B, S, n_kv_heads, hd)
    xk = jnp.repeat(xk, n_rep, axis=2)
    xv = jnp.repeat(xv, n_rep, axis=2)
    q = xq.transpose(0, 2, 1, 3)
    k = xk.transpose(0, 2, 1, 3)
    v = xv.transpose(0, 2, 1, 3)
    scores = jnp.einsum("bhqd,bhkd->bhqk", q, k) / math.sqrt(hd)
    causal = jnp.tril(jnp.ones((S, S), dtype=bool))
    scores = jnp.where(causal[None, None], scores, -jnp.inf)
    probs = jax.nn.softmax(scores, axis=-1)
    out = jnp.einsum("bhqk,bhkd->bhqd", probs, v)
    out = out.transpose(0, 2, 1, 3).reshape(B, S, n_heads * hd)
    return out @ wo.T


if __name__ == "__main__":
    # Small LLaMA-style config with head_dim = 128 (lane-dense head blocks).
    B, S = 2, 1024
    dim = 512
    n_heads = 4
    n_kv_heads = 2
    head_dim = dim // n_heads        # 128

    key = jax.random.PRNGKey(0)
    kx, kq, kk, kv, ko = jax.random.split(key, 5)
    x = jax.random.normal(kx, (B, S, dim), dtype=jnp.float32)
    wq = jax.random.normal(kq, (n_heads * head_dim, dim), dtype=jnp.float32) * 0.02
    wk = jax.random.normal(kk, (n_kv_heads * head_dim, dim), dtype=jnp.float32) * 0.02
    wv = jax.random.normal(kv, (n_kv_heads * head_dim, dim), dtype=jnp.float32) * 0.02
    wo = jax.random.normal(ko, (dim, n_heads * head_dim), dtype=jnp.float32) * 0.02

    # Rotary tables, shape (seq, head_dim // 2), as in precompute_freqs_cis.
    inv_freq = 1.0 / (10000.0 ** (jnp.arange(0, head_dim, 2, dtype=jnp.float32) / head_dim))
    t = jnp.arange(S, dtype=jnp.float32)
    freqs = jnp.outer(t, inv_freq)
    freqs_cos = jnp.cos(freqs)
    freqs_sin = jnp.sin(freqs)

    out = attention_forward(x, wq, wk, wv, wo, freqs_cos, freqs_sin,
                            n_heads, n_kv_heads)
    out = jax.block_until_ready(out)

    ref = reference_attention(x, wq, wk, wv, wo, freqs_cos, freqs_sin,
                              n_heads, n_kv_heads)
    assert out.shape == ref.shape and out.dtype == ref.dtype
    assert jnp.allclose(out, ref, atol=1e-2, rtol=1e-2)

    print("KERNEL_OK")
</pallas_src>

<mosaic_0001>
module attributes {stable_mosaic.version = 11 : i64} {
  func.func @_matmul_nt_kernel(%arg0: i32, %arg1: i32, %arg2: i32, %arg3: memref<512x512xf32, #tpu.memory_space<vmem>>, %arg4: memref<512x512xf32, #tpu.memory_space<vmem>>, %arg5: memref<512x512xf32, #tpu.memory_space<vmem>>, %arg6: memref<512x512xf32, #tpu.memory_space<vmem>>) attributes {dimension_semantics = [#tpu.dimension_semantics<parallel>, #tpu.dimension_semantics<parallel>, #tpu.dimension_semantics<arbitrary>], iteration_bounds = array<i64: 4, 2, 1>, scalar_prefetch = 0 : i64, scratch_operands = 1 : i64, tpu.core_type = #tpu.core_type<tc>, window_params = [{transform_indices = @transform_0, window_bounds = array<i64: 512, 512>}, {transform_indices = @transform_1, window_bounds = array<i64: 512, 512>}, {transform_indices = @transform_2, window_bounds = array<i64: 512, 512>}]} {
    %c0_i32 = arith.constant 0 : i32
    %0 = arith.cmpi eq, %arg2, %c0_i32 : i32
    %1 = arith.extui %0 : i1 to i32
    %c0_i32_0 = arith.constant 0 : i32
    %2 = arith.cmpi ne, %1, %c0_i32_0 : i32
    scf.if %2 {
      %cst_10 = arith.constant 0.000000e+00 : f32
      %12 = vector.broadcast %cst_10 : f32 to vector<512x512xf32>
      %c0_11 = arith.constant 0 : index
      %c0_12 = arith.constant 0 : index
      %13 = vector.load %arg6[%c0_11, %c0_12] : memref<512x512xf32, #tpu.memory_space<vmem>>, vector<512x512xf32>
      tpu.vector_store %arg6[%c0_11, %c0_12], %12 {strides = array<i32>} : memref<512x512xf32, #tpu.memory_space<vmem>>, vector<512x512xf32>,
    } else {
    }
    %c0 = arith.constant 0 : index
    %c0_1 = arith.constant 0 : index
    %3 = vector.load %arg6[%c0, %c0_1] : memref<512x512xf32, #tpu.memory_space<vmem>>, vector<512x512xf32>
    %c0_2 = arith.constant 0 : index
    %c0_3 = arith.constant 0 : index
    %4 = vector.load %arg3[%c0_2, %c0_3] : memref<512x512xf32, #tpu.memory_space<vmem>>, vector<512x512xf32>
    %c0_4 = arith.constant 0 : index
    %c0_5 = arith.constant 0 : index
    %5 = vector.load %arg4[%c0_4, %c0_5] : memref<512x512xf32, #tpu.memory_space<vmem>>, vector<512x512xf32>
    %cst = arith.constant dense<0.000000e+00> : vector<512x512xf32>
    %6 = tpu.matmul %4, %5, %cst {dimension_numbers = #tpu.dot_dimension_numbers<[1], [1], [0], [0], [0, 0, 1, 0], [], []>} : vector<512x512xf32>, vector<512x512xf32>, vector<512x512xf32> -> vector<512x512xf32>
    %7 = arith.addf %3, %6 : vector<512x512xf32>
    %c0_6 = arith.constant 0 : index
    %c0_7 = arith.constant 0 : index
    %8 = vector.load %arg6[%c0_6, %c0_7] : memref<512x512xf32, #tpu.memory_space<vmem>>, vector<512x512xf32>
    tpu.vector_store %arg6[%c0_6, %c0_7], %7 {strides = array<i32>} : memref<512x512xf32, #tpu.memory_space<vmem>>, vector<512x512xf32>,
    %c0_i32_8 = arith.constant 0 : i32
    %9 = arith.cmpi eq, %arg2, %c0_i32_8 : i32
    %10 = arith.extui %9 : i1 to i32
    %c0_i32_9 = arith.constant 0 : i32
    %11 = arith.cmpi ne, %10, %c0_i32_9 : i32
    scf.if %11 {
      %c0_10 = arith.constant 0 : index
      %c0_11 = arith.constant 0 : index
      %12 = vector.load %arg6[%c0_10, %c0_11] : memref<512x512xf32, #tpu.memory_space<vmem>>, vector<512x512xf32>
      %c0_12 = arith.constant 0 : index
      %c0_13 = arith.constant 0 : index
      %13 = vector.load %arg5[%c0_12, %c0_13] : memref<512x512xf32, #tpu.memory_space<vmem>>, vector<512x512xf32>
      tpu.vector_store %arg5[%c0_12, %c0_13], %12 {strides = array<i32>} : memref<512x512xf32, #tpu.memory_space<vmem>>, vector<512x512xf32>,
    } else {
    }
    return
  }
  func.func @transform_0(%arg0: i32, %arg1: i32, %arg2: i32) -> (i32, i32) {
    %c0_i32 = arith.constant 0 : i32
    return %arg0, %arg2 : i32, i32
  }
  func.func @transform_1(%arg0: i32, %arg1: i32, %arg2: i32) -> (i32, i32) {
    %c0_i32 = arith.constant 0 : i32
    return %arg1, %arg2 : i32, i32
  }
  func.func @transform_2(%arg0: i32, %arg1: i32, %arg2: i32) -> (i32, i32) {
    %c0_i32 = arith.constant 0 : i32
    return %arg0, %arg1 : i32, i32
  }
}

</mosaic_0001>

<bundles_post_ra>
// kernel: tpu_custom_call.1
= control target key start
LH: loop header
LB: loop body
LE: loop exit
PB: predicated region body
PF: predicated region fallthrough
CT: control target
= control target key end

     0   :  { %s6263_s0 = inlined_call_operand.hbm [shape: f32[2048,512], index: 0, kind: input, shape index: {}]   ;;  %s6264_s1 = inlined_call_operand.hbm [shape: f32[1024,512], index: 1, kind: input, shape index: {}]   ;;  %s6265_s2 = inlined_call_operand.hbm [shape: f32[2048,1024], index: 2, kind: output, shape index: {}]  }
   0x1   :  { %6277 = sst [smem:[#allocation16_spill]] %s6263_s0 }
   0x2   :  { %7 = vsyncpa [#allocation4], 0 }
   0x3   :  { %9 = vsyncpa [#allocation4 + $0x1], 0 }
   0x4   :  { %10 = vsyncpa [#allocation7], 0 }
   0x5   :  { %12 = vsyncpa [#allocation7 + $0x1], 0 }
   0x6   :  { %13 = vsyncpa [#allocation5], 0 }
   0x7   :  { %15 = vsyncpa [#allocation5 + $0x1], 0  ;;  %s5137_s9 = smov 0   ;;  %s5139_s10 = smov 0  }
   0x8   :  { %s5141_s11 = smov 0   ;;  %s5143_s12 = smov 0  }
   0x9   :  { %s5145_s13 = smov 0   ;;  %s5147_s14 = smov 0  }
   0xa   :  { %s5149_s15 = smov 0   ;;  %s5151_s16 = smov 0  }
   0xb   :  { %s5153_s17 = smov 0   ;;  %s5155_s18 = smov 0  }
   0xc   :  { %s5157_s19 = smov 0   ;;  %s5159_s20 = smov 0  }
   0xd   :  { %s5161_s21 = smov 0   ;;  %s5163_s22 = smov 0  }
   0xe LB: > { %6278 = sst [smem:[#allocation12_spill]] %s5104_s20  ;;  %s4226_s23 = sadd.s32 4294967295, %s5112_s22   ;;  %s5112_s22 = sphi %s5163_s22, %s21_s22   ;;  %s5108_s21 = sphi %s5161_s21, %s6305_s21   ;;  %s5104_s20 = sphi %s5159_s20, %s6304_s20   ;;  %s5100_s19 = sphi %s5157_s19, %s6303_s19   ;;  %s5096_s18 = sphi %s5155_s18, %s6302_s18   ;;  %s5092_s17 = sphi %s5153_s17, %s6314_s17   ;;  %s5088_s16 = sphi %s5151_s16, %s6313_s16   ;;  %s5084_s15 = sphi %s5149_s15, %s6312_s15   ;;  %s5080_s14 = sphi %s5147_s14, %s6311_s14   ;;  %s5076_s13 = sphi %s5145_s13, %s6310_s13   ;;  %s5072_s12 = sphi %s5143_s12, %s6309_s12   ;;  %s5068_s11 = sphi %s5141_s11, %s6308_s11   ;;  %s5064_s10 = sphi %s5139_s10, %s6307_s10   ;;  %s5060_s9 = sphi %s5137_s9, %s6306_s9  }
   0xf   : > { %6279 = sst [smem:[#allocation13_spill]] %s5108_s21  ;;  %s40_s24 = sadd.s32 1, %s5108_s21 }
  0x10   : > { %p56_p0 = scmp.ne.s32.totalorder %s5092_s17, %s5088_s16  ;;  %p6267_p1 = scmp.eq.s32.totalorder %s5112_s22, 0 }
  0x11   : > { %p62_p2 = scmp.ne.s32.totalorder %s5088_s16, %s5084_s15  ;;  %p5214_p3 = scmp.eq.s32.totalorder %s4226_s23, 0 }
  0x12   : > { %p58_p4 = por %p6267_p1, %p56_p0  ;;  %p6266_p6 = scmp.lt.s32.totalorder %s5112_s22, 8 }
  0x13   : > { %p5222_p5 = por %p5214_p3, %p62_p2  ;;  %s142_s28 = sand.u32 1, %s5092_s17  }
  0x14   : > { %s4250_s29 = sshll.u32 %s5108_s21, 15  ;;  %s4230_s30 = sshll.u32 %s142_s28, 11 }
  0x15   : > { %s6281_s27 = scalar_select %p5222_p5, 1, 0 }
  0x16   : > { %s6282_s0 = sld [smem:[#allocation16_spill]]  ;;  %s146_s6 = scalar_lea.vmem [#allocation3], %s4230_s30 }
  0x17   : > { %s156_s7 = sshll.u32 %s146_s6, 4  ;;  %p5236_p7 = pnand %p6266_p6, %p58_p4  ;;  %s5240_s7 = int_to_ptr.vmem [resolvable:$true] %s156_s7 }
  0x18   : > { %s5242_s15 = scalar_lea.sflag [#allocation4], %s142_s28 }
  0x19   : > { %p4904_p9 = pneg %p5236_p7 }
  0x1c   : > { %s5232_s5 = scalar_lea.hbm %s6282_s0, %s4250_s29  ;;  %s4907_s4 = scalar_lea.hbm %s6282_s0, 131072 }
  0x1d   : > { %s4902_s3 = scalar_lea.hbm %s5232_s5, 32768  ;;  %p4908_p12 = scmp.lt.u32.totalorder %s5232_s5, %s6282_s0 }
  0x1e   : > { %p4903_p8 = scmp.ne.s32.totalorder %s5232_s5, %s4902_s3  ;;  %p4909_p13 = scmp.lt.u32.totalorder %s4907_s4, %s4902_s3 }
  0x1f   : > { %p4911_p2 = scmp.lt.u32.totalorder %s4902_s3, %s5232_s5 }
  0x20   : > { %p4905_p10 = pnand %p4904_p9, %p4903_p8  ;;  %p4910_p0 = por %p4909_p13, %p4908_p12 }
  0x22   : > { %p4906_p11 = pneg %p4905_p10  ;;  %p4912_p4 = por %p4911_p2, %p4910_p0 }
  0x24   : > { %p4913_p6 = pnand %p4912_p4, %p4906_p11 }
  0x26   : > { %4916 = shalt.err (!%p4913_p6)
}
  0x27   : > { %s4917_s28 = scalar_lea.vmem %s5240_s7, 32768  ;;  %s5114_s29 = smov [#allocation3]  }
  0x28   : > { %p4918_p8 = scmp.ne.s32.totalorder %s5240_s7, %s4917_s28  ;;  %s4922_s30 = sshll.u32 %s5114_s29, 4  ;;  %s4923_s30 = int_to_ptr.vmem [resolvable:$false] %s4922_s30 }
  0x29   : > { %s4924_s25 = scalar_lea.vmem %s4923_s30, 65536  ;;  %p4925_p5 = scmp.lt.s32.totalorder %s5240_s7, %s4923_s30 }
  0x2a   : > { %p4920_p10 = pnand %p4918_p8, %p4904_p9  ;;  %p4926_p12 = scmp.lt.s32.totalorder %s4924_s25, %s4917_s28 }
  0x2c   : > { %p4921_p1 = pneg %p4920_p10  ;;  %p4927_p13 = por %p4926_p12, %p4925_p5 }
  0x2e   : > { %p4928_p0 = pnand %p4927_p13, %p4921_p1 }
  0x30   : > { %4931 = shalt.err (!%p4928_p0)
}
  0x31   : > { %s6269_s3 = smov 512   ;;  %s6270_s4 = smov 32  }
  0x32   : > { %4775 = dma.hbm_to_vmem [thread:$0]  (!%p5236_p7), %s5232_s5, 32768, %s5240_s7, %s5242_s15, %s6269_s3, %s6269_s3, %s6270_s4  }
  0x33   : > { %p4238_p1 = scmp.ge.s32.totalorder %s5112_s22, 1  ;;  %p188_p5 = scmp.lt.s32.totalorder %s5112_s22, 9 }
  0x34   : > { %p5277_p6 = scmp.eq.s32.totalorder %s4226_s23, 7  ;;  %s4227_s8 = sadd.s32 4294967294, %s5112_s22  }
  0x35   : > { %p5281_p9 = pnand %p4238_p1, %p188_p5  ;;  %s36_s29 = sadd.s32 1, %s5104_s20 }
  0x36   : > { %p38_p7 = scmp.ge.s32.totalorder %s36_s29, 2  ;;  %s77_s5 = sadd.s32 1, %s5080_s14 }
  0x37   : > { %p84_p11 = scmp.ne.s32.totalorder %s5080_s14, %s5076_s13  ;;  %p90_p2 = scmp.ne.s32.totalorder %s5076_s13, %s5072_s12 }
  0x38   : > { %s6316_s29 = smov (%p38_p7, %s36_s29), 0  ;;  %s6318_s24 = smov (!%p38_p7, %s40_s24), %s5108_s21 }
  0x39   : > { %6286 = sst [smem:[#allocation14_spill]] %s6316_s29  ;;  %s72_s23 = ssub.s32 %s5104_s20, %s6316_s29 }
  0x3a   : > { %s105_s7 = sadd.s32 1, %s5068_s11  ;;  %p42_p4 = scmp.ge.s32.totalorder %s6318_s24, 4 }
  0x3b   : > { %p75_p8 = scmp.eq.s32.totalorder %s72_s23, 0  ;;  %p5302_p10 = por %p90_p2, %p5214_p3 }
  0x3c   : > { %p115_p12 = scmp.ne.s32.totalorder %s5068_s11, %s5064_s10  ;;  %s6320_s24 = smov (%p42_p4, %s6318_s24), 0 }
  0x3d   : > { %s6287_s12 = scalar_select %p5302_p10, 1, 0 }
  0x3e   : > { %6288 = sst [smem:[#allocation15_spill]] %s6320_s24  ;;  %s44_s30 = ssub.s32 %s5108_s21, %s6320_s24 }
  0x3f   : > { %s5311_s15 = scalar_select %p75_p8, %s5080_s14, %s77_s5  }
  0x40   : > { %p5317_p13 = por %p5277_p6, %p115_p12  ;;  %p47_p0 = scmp.eq.s32.totalorder %s44_s30, 0 }
  0x41   : > { %s102_s26 = sor.u32 %s72_s23, %s44_s30  ;;  %p121_p1 = scmp.ne.s32.totalorder %s5064_s10, %s5060_s9 }
  0x42   : > { %s6289_s25 = scalar_select %p5317_p13, 1, 0 }
  0x43   : > { %p103_p3 = scmp.eq.s32.totalorder %s102_s26, 0  ;;  %s6290_s3 = sadd.s32 1, %s5092_s17 }
  0x44   : > { %s5326_s4 = scalar_select %p47_p0, %s5092_s17, %s6290_s3  }
  0x45   : > { %s5329_s0 = scalar_select %p103_p3, %s5068_s11, %s105_s7  }
  0x46   : > { %p122_p5 = scmp.eq.s32.totalorder %s4227_s8, 7  ;;  %s166_s29 = sand.u32 1, %s5080_s14  }
  0x47   : > { %p6291_p7 = scmp.eq.s32.totalorder %s5112_s22, 0  ;;  %s4234_s6 = sshll.u32 %s166_s29, 11 }
  0x48   : > { %p5337_p6 = por %p122_p5, %p121_p1  ;;  %s4252_s24 = sshll.u32 %s5104_s20, 15 }
  0x49   : > { %p86_p2 = por %p84_p11, %p6291_p7  ;;  %s170_s21 = scalar_lea.vmem [#allocation6], %s4234_s6 }
  0x4a   : > { %s6292_s5 = scalar_select %p5337_p6, 1, 0 }
  0x4b   : > { %s180_s23 = sshll.u32 %s170_s21, 4  ;;  %s5345_s3 = scalar_lea.hbm %s6264_s1, %s4252_s24  ;;  %s5347_s23 = int_to_ptr.vmem [resolvable:$true] %s180_s23 }
  0x4c   : > { %p6293_p11 = scmp.lt.s32.totalorder %s5112_s22, 8  ;;  %s5355_s7 = scalar_lea.sflag [#allocation7], %s166_s29 }
  0x4d   : > { %s4932_s21 = scalar_lea.hbm %s5345_s3, 32768  ;;  %s4937_s30 = scalar_lea.hbm %s6264_s1, 65536 }
  0x4e   : > { %p5351_p4 = pnand %p6293_p11, %p86_p2  ;;  %p4933_p8 = scmp.ne.s32.totalorder %s5345_s3, %s4932_s21 }
  0x4f   : > { %p4938_p1 = scmp.lt.u32.totalorder %s5345_s3, %s6264_s1  ;;  %p4939_p5 = scmp.lt.u32.totalorder %s4937_s30, %s4932_s21 }
  0x50   : > { %p4934_p12 = pneg %p5351_p4  ;;  %p4941_p2 = scmp.lt.u32.totalorder %s4932_s21, %s5345_s3 }
  0x51   : > { %p4940_p7 = por %p4939_p5, %p4938_p1 }
  0x52   : > { %p4935_p0 = pnand %p4934_p12, %p4933_p8 }
  0x53   : > { %p4942_p11 = por %p4941_p2, %p4940_p7 }
  0x54   : > { %p4936_p3 = pneg %p4935_p0 }
  0x56   : > { %p4943_p6 = pnand %p4942_p11, %p4936_p3 }
  0x58   : > { %4946 = shalt.err (!%p4943_p6)
}
  0x59   : > { %s4947_s29 = scalar_lea.vmem %s5347_s23, 32768  ;;  %s5117_s24 = smov [#allocation6]  }
  0x5a   : > { %p4948_p8 = scmp.ne.s32.totalorder %s5347_s23, %s4947_s29  ;;  %s4952_s6 = sshll.u32 %s5117_s24, 4  ;;  %s4953_s6 = int_to_ptr.vmem [resolvable:$false] %s4952_s6 }
  0x5b   : > { %s4954_s20 = scalar_lea.vmem %s4953_s6, 65536  ;;  %p4955_p10 = scmp.lt.s32.totalorder %s5347_s23, %s4953_s6 }
  0x5c   : > { %p4950_p0 = pnand %p4948_p8, %p4934_p12  ;;  %p4956_p1 = scmp.lt.s32.totalorder %s4954_s20, %s4947_s29 }
  0x5e   : > { %p4951_p13 = pneg %p4950_p0  ;;  %p4957_p5 = por %p4956_p1, %p4955_p10 }
  0x60   : > { %p4958_p7 = pnand %p4957_p5, %p4951_p13 }
  0x62   : > { %4961 = shalt.err (!%p4958_p7)
}
  0x63   : > { %s6295_s21 = smov 32   ;;  %s6296_s30 = smov 512  }
  0x64   : > { %4778 = dma.hbm_to_vmem [thread:$0]  (!%p5351_p4), %s5345_s3, 32768, %s5347_s23, %s5355_s7, %s6296_s30, %s6296_s30, %s6295_s21  }
  0x65   : > { %192 = sbr.rel (%p5281_p9) target bundleno = 984 (0x3d8), region = 28  ;;  %s194_s26 = sand.u32 (!%p5281_p9), 1, %s5088_s16  }
  0x66   : > { %s4239_s24 = sshll.u32 (!%p5281_p9), %s194_s26, 11  ;;  %s195_s29 = scalar_lea.sflag (!%p5281_p9), [#allocation4], %s194_s26 }
  0x67   : > { %s5389_s6 = scalar_lea.vmem (!%p5281_p9), [#allocation3], %s4239_s24  ;;  %p6297_p10 = scmp.ne.s32.totalorder (!%p5281_p9), %s6281_s27, 0 }
  0x6c   : > { %5047 = dma.done.wait (%p6297_p10), %s195_s29, 32768  }
  0x6d   : > { %5049 = vsyncadd (%p6297_p10), %s195_s29, 4294934528  ;;  %s203_s8 = sand.u32 1, %s5076_s13   ;;  %p6298_p9 = scmp.ne.s32.totalorder %s6287_s12, 0 }
  0x6e   : > { %s4240_s20 = sshll.u32 %s203_s8, 11  ;;  %s204_s23 = scalar_lea.sflag [#allocation7], %s203_s8 }
  0x6f   : > { %s5396_s3 = scalar_lea.vmem [#allocation6], %s4240_s20 }
  0x70   : > { %5051 = dma.done.wait (%p6298_p9), %s204_s23, 32768  }
  0x71   : > { %5053 = vsyncadd (%p6298_p9), %s204_s23, 4294934528  ;;  %v1012_v0 = vld [vmem:[%s5396_s3 + $0x8] sm:$0xff]  ;;  %v1011_v5 = vld [vmem:[%s5396_s3] sm:$0xff]  ;;  %s230_s27 = sand.u32 1, %s5064_s10   ;;  %s4244_s7 = sshll.u32 %s5096_s18, 2 }
  0x72   : > { %v1016_v1 = vld [vmem:[%s5396_s3 + $0x28] sm:$0xff]  ;;  %v1015_v6 = vld [vmem:[%s5396_s3 + $0x20] sm:$0xff]  ;;  %s4241_s28 = sshll.u32 %s230_s27, 11  ;;  %s4253_s21 = sshll.u32 %s5100_s19, 9 }
  0x73   : > { %v1140_v2 = vld [vmem:[%s5396_s3 + $0x408] sm:$0xff]  ;;  %v4254_v3 = vpack.c.bf16 %v1016_v1, %v1012_v0  ;;  %v4256_v8 = vpack.c.bf16 %v1015_v6, %v1011_v5  ;;  %v1139_v9 = vld [vmem:[%s5396_s3 + $0x400] sm:$0xff]  ;;  %s5898_s12 = scalar_lea.vmem [#allocation8], %s4241_s28  ;;  %s4104_s30 = sadd.s32 %s4253_s21, %s4244_s7 }
  0x74   : > { %v1144_v4 = vld [vmem:[%s5396_s3 + $0x428] sm:$0xff]  ;;  %v1143_v10 = vld [vmem:[%s5396_s3 + $0x420] sm:$0xff]  ;;  %s4246_s26 = sshll.u32 %s4104_s30, 7  ;;  %s4107_s18 = sshll.u32 %s5898_s12, 4  ;;  %s6179_s18 = int_to_ptr.vmem [resolvable:$true] %s4107_s18 }
  0x75   : > { %v4382_v7 = vpack.c.bf16 %v1144_v4, %v1140_v2  ;;  %v1020_v11 = vld [vmem:[%s5396_s3 + $0x48] sm:$0xff]  ;;  %4255 = vmatprep.subr.bf16.mxu0 %v4254_v3  ;;  %v4384_v12 = vpack.c.bf16 %v1143_v10, %v1139_v9  ;;  %v1019_v18 = vld [vmem:[%s5396_s3 + $0x40] sm:$0xff]  ;;  %s6177_s29 = scalar_lea.hbm %s6265_s2, %s4246_s26  ;;  %s4962_s8 = scalar_lea.vmem %s6179_s18, 32768 }
  0x76   : > { %v1024_v13 = vld [vmem:[%s5396_s3 + $0x68] sm:$0xff]  ;;  %4257 = vmatpush1.bf16.xpose.msra.mxu0 %v4256_v8  ;;  %v1023_v19 = vld [vmem:[%s5396_s3 + $0x60] sm:$0xff]  ;;  %p4963_p13 = scmp.ne.s32.totalorder %s6179_s18, %s4962_s8  ;;  %p6299_p6 = scmp.ne.s32.totalorder %s6289_s25, 0 }
  0x77   : > { %v1148_v14 = vld [vmem:[%s5396_s3 + $0x448] sm:$0xff]  ;;  %4383 = vmatprep.subr.bf16.mxu1 %v4382_v7  ;;  %v4258_v16 = vpack.c.bf16 %v1024_v13, %v1020_v11  ;;  %v1147_v20 = vld [vmem:[%s5396_s3 + $0x440] sm:$0xff]  ;;  %v4260_v26 = vpack.c.bf16 %v1023_v19, %v1019_v18  ;;  %s5118_s20 = smov [#allocation8]  }
  0x78   : > { %v1152_v15 = vld [vmem:[%s5396_s3 + $0x468] sm:$0xff]  ;;  %4385 = vmatpush1.bf16.xpose.msra.mxu1 %v4384_v12  ;;  %v1151_v21 = vld [vmem:[%s5396_s3 + $0x460] sm:$0xff]  ;;  %p4964_p4 = pnand %p4963_p13, %p6299_p6  ;;  %s4966_s23 = sshll.u32 %s5118_s20, 4  ;;  %s4967_s23 = int_to_ptr.vmem [resolvable:$false] %s4966_s23 }
  0x79   : > { %v4386_v17 = vpack.c.bf16 %v1152_v15, %v1148_v14  ;;  %4259 = vmatprep.subr.bf16.mxu0 %v4258_v16  ;;  %v1028_v22 = vld [vmem:[%s5396_s3 + $0x88] sm:$0xff]  ;;  %v4388_v27 = vpack.c.bf16 %v1151_v21, %v1147_v20  ;;  %v1027_v30 = vld [vmem:[%s5396_s3 + $0x80] sm:$0xff]  ;;  %p4969_p3 = scmp.lt.s32.totalorder %s6179_s18, %s4967_s23 }
  0x7a   : > { %v1032_v23 = vld [vmem:[%s5396_s3 + $0xa8] sm:$0xff]  ;;  %v1031_v31 = vld [vmem:[%s5396_s3 + $0xa0] sm:$0xff]  ;;  %p4965_p12 = pneg %p4964_p4 }
  0x7b   : > { %4387 = vmatprep.subr.bf16.mxu1 %v4386_v17  ;;  %v1156_v24 = vld [vmem:[%s5396_s3 + $0x488] sm:$0xff]  ;;  %v4262_v28 = vpack.c.bf16 %v1032_v23, %v1028_v22  ;;  %v1155_v32 = vld [vmem:[%s5396_s3 + $0x480] sm:$0xff]  ;;  %v4264_v38 = vpack.c.bf16 %v1031_v31, %v1027_v30 }
  0x7c   : > { %v1160_v25 = vld [vmem:[%s5396_s3 + $0x4a8] sm:$0xff]  ;;  %v1159_v33 = vld [vmem:[%s5396_s3 + $0x4a0] sm:$0xff] }
  0x7d   : > { %v4390_v29 = vpack.c.bf16 %v1160_v25, %v1156_v24  ;;  %v1036_v34 = vld [vmem:[%s5396_s3 + $0xc8] sm:$0xff]  ;;  %v4392_v39 = vpack.c.bf16 %v1159_v33, %v1155_v32  ;;  %v1035_v42 = vld [vmem:[%s5396_s3 + $0xc0] sm:$0xff] }
  0x7e   : > { %4261 = vmatpush1.bf16.xpose.msra.mxu0 %v4260_v26  ;;  %v1040_v35 = vld [vmem:[%s5396_s3 + $0xe8] sm:$0xff]  ;;  %v1039_v43 = vld [vmem:[%s5396_s3 + $0xe0] sm:$0xff] }
  0x7f   : > { %4263 = vmatprep.subr.bf16.mxu0 %v4262_v28  ;;  %v1164_v36 = vld [vmem:[%s5396_s3 + $0x4c8] sm:$0xff]  ;;  %v4266_v40 = vpack.c.bf16 %v1040_v35, %v1036_v34  ;;  %v1163_v44 = vld [vmem:[%s5396_s3 + $0x4c0] sm:$0xff]  ;;  %v4268_v50 = vpack.c.bf16 %v1039_v43, %v1035_v42 }
  0x80   : > { %4389 = vmatpush1.bf16.xpose.msra.mxu1 %v4388_v27  ;;  %v1168_v37 = vld [vmem:[%s5396_s3 + $0x4e8] sm:$0xff]  ;;  %v1167_v45 = vld [vmem:[%s5396_s3 + $0x4e0] sm:$0xff] }
  0x81   : > { %4391 = vmatprep.subr.bf16.mxu1 %v4390_v29  ;;  %v4394_v41 = vpack.c.bf16 %v1168_v37, %v1164_v36  ;;  %v1044_v46 = vld [vmem:[%s5396_s3 + $0x108] sm:$0xff]  ;;  %v4396_v51 = vpack.c.bf16 %v1167_v45, %v1163_v44  ;;  %v1043_v54 = vld [vmem:[%s5396_s3 + $0x100] sm:$0xff] }
  0x82   : > { %v1048_v47 = vld [vmem:[%s5396_s3 + $0x128] sm:$0xff]  ;;  %v1047_v55 = vld [vmem:[%s5396_s3 + $0x120] sm:$0xff] }
  0x83   : > { %v1172_v48 = vld [vmem:[%s5396_s3 + $0x508] sm:$0xff]  ;;  %v4270_v52 = vpack.c.bf16 %v1048_v47, %v1044_v46  ;;  %v1171_v56 = vld [vmem:[%s5396_s3 + $0x500] sm:$0xff]  ;;  %v4272_v62 = vpack.c.bf16 %v1047_v55, %v1043_v54 }
  0x84   : > { %v1176_v49 = vld [vmem:[%s5396_s3 + $0x528] sm:$0xff]  ;;  %v1175_v57 = vld [vmem:[%s5396_s3 + $0x520] sm:$0xff] }
  0x85   : > { %v4398_v53 = vpack.c.bf16 %v1176_v49, %v1172_v48  ;;  %v1052_v58 = vld [vmem:[%s5396_s3 + $0x148] sm:$0xff]  ;;  %v4400_v63 = vpack.c.bf16 %v1175_v57, %v1171_v56  ;;  %v1051_v2 = vld [vmem:[%s5396_s3 + $0x140] sm:$0xff] }
  0x86   : > { %4265 = vmatpush1.bf16.xpose.msra.mxu0 %v4264_v38  ;;  %v1056_v59 = vld [vmem:[%s5396_s3 + $0x168] sm:$0xff]  ;;  %v1055_v3 = vld [vmem:[%s5396_s3 + $0x160] sm:$0xff] }
  0x87   : > { %4267 = vmatprep.subr.bf16.mxu0 %v4266_v40  ;;  %v1180_v60 = vld [vmem:[%s5396_s3 + $0x548] sm:$0xff]  ;;  %v4274_v0 = vpack.c.bf16 %v1056_v59, %v1052_v58  ;;  %v1179_v4 = vld [vmem:[%s5396_s3 + $0x540] sm:$0xff]  ;;  %v4276_v10 = vpack.c.bf16 %v1055_v3, %v1051_v2 }
  0x88   : > { %4393 = vmatpush1.bf16.xpose.msra.mxu1 %v4392_v39  ;;  %v1184_v61 = vld [vmem:[%s5396_s3 + $0x568] sm:$0xff]  ;;  %v1183_v5 = vld [vmem:[%s5396_s3 + $0x560] sm:$0xff] }
  0x89   : > { %4395 = vmatprep.subr.bf16.mxu1 %v4394_v41  ;;  %v4402_v1 = vpack.c.bf16 %v1184_v61, %v1180_v60  ;;  %v1060_v6 = vld [vmem:[%s5396_s3 + $0x188] sm:$0xff]  ;;  %v4404_v11 = vpack.c.bf16 %v1183_v5, %v1179_v4  ;;  %v1059_v15 = vld [vmem:[%s5396_s3 + $0x180] sm:$0xff] }
  0x8a   : > { %v1064_v7 = vld [vmem:[%s5396_s3 + $0x1a8] sm:$0xff]  ;;  %v1063_v16 = vld [vmem:[%s5396_s3 + $0x1a0] sm:$0xff] }
  0x8b   : > { %v1188_v8 = vld [vmem:[%s5396_s3 + $0x588] sm:$0xff]  ;;  %v4278_v12 = vpack.c.bf16 %v1064_v7, %v1060_v6  ;;  %v1187_v17 = vld [vmem:[%s5396_s3 + $0x580] sm:$0xff]  ;;  %v4280_v23 = vpack.c.bf16 %v1063_v16, %v1059_v15 }
  0x8c   : > { %v1192_v9 = vld [vmem:[%s5396_s3 + $0x5a8] sm:$0xff]  ;;  %v1191_v18 = vld [vmem:[%s5396_s3 + $0x5a0] sm:$0xff] }
  0x8d   : > { %v4406_v13 = vpack.c.bf16 %v1192_v9, %v1188_v8  ;;  %v756_v14 = vld [vmem:[%s5389_s6 + $0x8] sm:$0xff]  ;;  %v4408_v24 = vpack.c.bf16 %v1191_v18, %v1187_v17  ;;  %v1067_v27 = vld [vmem:[%s5396_s3 + $0x1c0] sm:$0xff] }
  0x8e   : > { %4269 = vmatpush1.bf16.xpose.msra.mxu0 %v4268_v50  ;;  %1331 = vmatprep.mubr.f32.mxu0 %v756_v14  ;;  %v1068_v19 = vld [vmem:[%s5396_s3 + $0x1c8] sm:$0xff]  ;;  %v1071_v28 = vld [vmem:[%s5396_s3 + $0x1e0] sm:$0xff] }
  0x8f   : > { %4271 = vmatprep.subr.bf16.mxu0 %v4270_v52  ;;  %2229 = vmatprep.mubr.f32.mxu1 %v756_v14  ;;  %v1072_v20 = vld [vmem:[%s5396_s3 + $0x1e8] sm:$0xff]  ;;  %v1195_v29 = vld [vmem:[%s5396_s3 + $0x5c0] sm:$0xff]  ;;  %v4284_v35 = vpack.c.bf16 %v1071_v28, %v1067_v27 }
  0x90   : > { %4397 = vmatpush1.bf16.xpose.msra.mxu1 %v4396_v51  ;;  %v1196_v21 = vld [vmem:[%s5396_s3 + $0x5c8] sm:$0xff]  ;;  %v4282_v25 = vpack.c.bf16 %v1072_v20, %v1068_v19  ;;  %v1199_v30 = vld [vmem:[%s5396_s3 + $0x5e0] sm:$0xff] }
  0x91   : > { %4399 = vmatprep.subr.bf16.mxu1 %v4398_v53  ;;  %v1200_v22 = vld [vmem:[%s5396_s3 + $0x5e8] sm:$0xff]  ;;  %v4412_v36 = vpack.c.bf16 %v1199_v30, %v1195_v29  ;;  %v1075_v39 = vld [vmem:[%s5396_s3 + $0x200] sm:$0xff] }
  0x92   : > { %v4410_v26 = vpack.c.bf16 %v1200_v22, %v1196_v21  ;;  %v1076_v31 = vld [vmem:[%s5396_s3 + $0x208] sm:$0xff]  ;;  %v1079_v40 = vld [vmem:[%s5396_s3 + $0x220] sm:$0xff] }
  0x93   : > { %v1080_v32 = vld [vmem:[%s5396_s3 + $0x228] sm:$0xff]  ;;  %v1203_v41 = vld [vmem:[%s5396_s3 + $0x600] sm:$0xff]  ;;  %v4288_v47 = vpack.c.bf16 %v1079_v40, %v1075_v39 }
  0x94   : > { %v1204_v33 = vld [vmem:[%s5396_s3 + $0x608] sm:$0xff]  ;;  %v4286_v37 = vpack.c.bf16 %v1080_v32, %v1076_v31  ;;  %v1207_v42 = vld [vmem:[%s5396_s3 + $0x620] sm:$0xff] }
  0x95   : > { %v1208_v34 = vld [vmem:[%s5396_s3 + $0x628] sm:$0xff]  ;;  %v4416_v48 = vpack.c.bf16 %v1207_v42, %v1203_v41  ;;  %v1083_v51 = vld [vmem:[%s5396_s3 + $0x240] sm:$0xff] }
  0x96   : > { %4273 = vmatpush1.bf16.xpose.msra.mxu0 %v4272_v62  ;;  %v4414_v38 = vpack.c.bf16 %v1208_v34, %v1204_v33  ;;  %v1084_v43 = vld [vmem:[%s5396_s3 + $0x248] sm:$0xff]  ;;  %v1087_v52 = vld [vmem:[%s5396_s3 + $0x260] sm:$0xff] }
  0x97   : > { %4275 = vmatprep.subr.bf16.mxu0 %v4274_v0  ;;  %v1088_v44 = vld [vmem:[%s5396_s3 + $0x268] sm:$0xff]  ;;  %v1211_v53 = vld [vmem:[%s5396_s3 + $0x640] sm:$0xff]  ;;  %v4292_v59 = vpack.c.bf16 %v1087_v52, %v1083_v51 }
  0x98   : > { %4401 = vmatpush1.bf16.xpose.msra.mxu1 %v4400_v63  ;;  %v1212_v45 = vld [vmem:[%s5396_s3 + $0x648] sm:$0xff]  ;;  %v4290_v49 = vpack.c.bf16 %v1088_v44, %v1084_v43  ;;  %v1215_v54 = vld [vmem:[%s5396_s3 + $0x660] sm:$0xff] }
  0x99   : > { %4403 = vmatprep.subr.bf16.mxu1 %v4402_v1  ;;  %v1216_v46 = vld [vmem:[%s5396_s3 + $0x668] sm:$0xff]  ;;  %v4420_v60 = vpack.c.bf16 %v1215_v54, %v1211_v53  ;;  %v1091_v63 = vld [vmem:[%s5396_s3 + $0x280] sm:$0xff] }
  0x9a   : > { %v4418_v50 = vpack.c.bf16 %v1216_v46, %v1212_v45  ;;  %v1092_v55 = vld [vmem:[%s5396_s3 + $0x288] sm:$0xff]  ;;  %v1095_v0 = vld [vmem:[%s5396_s3 + $0x2a0] sm:$0xff] }
  0x9b   : > { %v1096_v56 = vld [vmem:[%s5396_s3 + $0x2a8] sm:$0xff]  ;;  %v1219_v1 = vld [vmem:[%s5396_s3 + $0x680] sm:$0xff]  ;;  %v4296_v7 = vpack.c.bf16 %v1095_v0, %v1091_v63  ;;  %v1014_v63 = vld [vmem:[%s5396_s3 + $0x18] sm:$0xff] }
  0x9c   : > { %v1220_v57 = vld [vmem:[%s5396_s3 + $0x688] sm:$0xff]  ;;  %v4294_v61 = vpack.c.bf16 %v1096_v56, %v1092_v55  ;;  %v1223_v2 = vld [vmem:[%s5396_s3 + $0x6a0] sm:$0xff]  ;;  %v1018_v0 = vld [vmem:[%s5396_s3 + $0x38] sm:$0xff] }
  0x9d   : > { %v1224_v58 = vld [vmem:[%s5396_s3 + $0x6a8] sm:$0xff]  ;;  %v4424_v8 = vpack.c.bf16 %v1223_v2, %v1219_v1  ;;  %v1231_v14 = vld [vmem:[%s5396_s3 + $0x6e0] sm:$0xff]  ;;  %v1142_v1 = vld [vmem:[%s5396_s3 + $0x418] sm:$0xff] }
  0x9e   : > { %4277 = vmatpush1.bf16.xpose.msra.mxu0 %v4276_v10  ;;  %v4422_v62 = vpack.c.bf16 %v1224_v58, %v1220_v57  ;;  %v1100_v3 = vld [vmem:[%s5396_s3 + $0x2c8] sm:$0xff]  ;;  %v1146_v2 = vld [vmem:[%s5396_s3 + $0x438] sm:$0xff] }
  0x9f   : > { %4279 = vmatprep.subr.bf16.mxu0 %v4278_v12  ;;  %v1104_v4 = vld [vmem:[%s5396_s3 + $0x2e8] sm:$0xff]  ;;  %v1103_v12 = vld [vmem:[%s5396_s3 + $0x2e0] sm:$0xff] }
  0xa0   : > { %4405 = vmatpush1.bf16.xpose.msra.mxu1 %v4404_v11  ;;  %v1228_v5 = vld [vmem:[%s5396_s3 + $0x6c8] sm:$0xff]  ;;  %v4298_v9 = vpack.c.bf16 %v1104_v4, %v1100_v3  ;;  %v1099_v11 = vld [vmem:[%s5396_s3 + $0x2c0] sm:$0xff] }
  0xa1   : > { %4407 = vmatprep.subr.bf16.mxu1 %v4406_v13  ;;  %v1232_v6 = vld [vmem:[%s5396_s3 + $0x6e8] sm:$0xff]  ;;  %v1227_v13 = vld [vmem:[%s5396_s3 + $0x6c0] sm:$0xff]  ;;  %v4300_v19 = vpack.c.bf16 %v1103_v12, %v1099_v11  ;;  %v1022_v11 = vld [vmem:[%s5396_s3 + $0x58] sm:$0xff] }
  0xa2   : > { %v4426_v10 = vpack.c.bf16 %v1232_v6, %v1228_v5  ;;  %v1108_v15 = vld [vmem:[%s5396_s3 + $0x308] sm:$0xff]  ;;  %v4428_v20 = vpack.c.bf16 %v1231_v14, %v1227_v13  ;;  %v4318_v5 = vpack.c.bf16 %v1018_v0, %v1014_v63  ;;  %v4446_v6 = vpack.c.bf16 %v1146_v2, %v1142_v1  ;;  %v1026_v12 = vld [vmem:[%s5396_s3 + $0x78] sm:$0xff]  ;;  %v755_v13 = vld [vmem:[%s5389_s6] sm:$0xff] }
  0xa3   : > { %v1112_v16 = vld [vmem:[%s5396_s3 + $0x328] sm:$0xff]  ;;  %v1178_v63 = vld [vmem:[%s5396_s3 + $0x538] sm:$0xff] }
  0xa4   : > { %v1236_v17 = vld [vmem:[%s5396_s3 + $0x708] sm:$0xff]  ;;  %v4302_v21 = vpack.c.bf16 %v1112_v16, %v1108_v15  ;;  %v1150_v15 = vld [vmem:[%s5396_s3 + $0x458] sm:$0xff] }
  0xa5   : > { %v1240_v18 = vld [vmem:[%s5396_s3 + $0x728] sm:$0xff]  ;;  %v1154_v16 = vld [vmem:[%s5396_s3 + $0x478] sm:$0xff] }
  0xa6   : > { %4281 = vmatpush1.bf16.xpose.msra.mxu0 %v4280_v23  ;;  %v4430_v22 = vpack.c.bf16 %v1240_v18, %v1236_v17  ;;  %v1107_v23 = vld [vmem:[%s5396_s3 + $0x300] sm:$0xff]  ;;  %v1116_v27 = vld [vmem:[%s5396_s3 + $0x348] sm:$0xff] }
  0xa7   : > { %4283 = vmatprep.subr.bf16.mxu0 %v4282_v25  ;;  %v1235_v25 = vld [vmem:[%s5396_s3 + $0x700] sm:$0xff]  ;;  %v1120_v28 = vld [vmem:[%s5396_s3 + $0x368] sm:$0xff] }
  0xa8   : > { %4409 = vmatpush1.bf16.xpose.msra.mxu1 %v4408_v24  ;;  %v1111_v24 = vld [vmem:[%s5396_s3 + $0x320] sm:$0xff]  ;;  %v1244_v29 = vld [vmem:[%s5396_s3 + $0x748] sm:$0xff]  ;;  %v4306_v33 = vpack.c.bf16 %v1120_v28, %v1116_v27  ;;  %v1030_v27 = vld [vmem:[%s5396_s3 + $0x98] sm:$0xff] }
  0xa9   : > { %4411 = vmatprep.subr.bf16.mxu1 %v4410_v26  ;;  %v1239_v26 = vld [vmem:[%s5396_s3 + $0x720] sm:$0xff]  ;;  %v1248_v30 = vld [vmem:[%s5396_s3 + $0x768] sm:$0xff]  ;;  %v4304_v31 = vpack.c.bf16 %v1111_v24, %v1107_v23  ;;  %v1021_v23 = vld [vmem:[%s5396_s3 + $0x50] sm:$0xff] }
  0xaa   : > { %v4432_v32 = vpack.c.bf16 %v1239_v26, %v1235_v25  ;;  %v4434_v34 = vpack.c.bf16 %v1248_v30, %v1244_v29  ;;  %v1124_v39 = vld [vmem:[%s5396_s3 + $0x388] sm:$0xff]  ;;  %v1025_v24 = vld [vmem:[%s5396_s3 + $0x70] sm:$0xff]  ;;  %v1034_v28 = vld [vmem:[%s5396_s3 + $0xb8] sm:$0xff] }
  0xab   : > { %v1128_v40 = vld [vmem:[%s5396_s3 + $0x3a8] sm:$0xff]  ;;  %v1149_v25 = vld [vmem:[%s5396_s3 + $0x450] sm:$0xff]  ;;  %v763_v29 = vld [vmem:[%s5389_s6 + $0x40] sm:$0xff] }
  0xac   : > { %v1252_v41 = vld [vmem:[%s5396_s3 + $0x788] sm:$0xff]  ;;  %v4310_v45 = vpack.c.bf16 %v1128_v40, %v1124_v39  ;;  %v1153_v26 = vld [vmem:[%s5396_s3 + $0x470] sm:$0xff]  ;;  %v1158_v30 = vld [vmem:[%s5396_s3 + $0x498] sm:$0xff] }
  0xad   : > { %v1256_v42 = vld [vmem:[%s5396_s3 + $0x7a8] sm:$0xff]  ;;  %v1029_v39 = vld [vmem:[%s5396_s3 + $0x90] sm:$0xff] }
  0xae   : > { %4285 = vmatpush1.bf16.xpose.msra.mxu0 %v4284_v35  ;;  %v1115_v35 = vld [vmem:[%s5396_s3 + $0x340] sm:$0xff]  ;;  %v4438_v46 = vpack.c.bf16 %v1256_v42, %v1252_v41  ;;  %v1132_v51 = vld [vmem:[%s5396_s3 + $0x3c8] sm:$0xff]  ;;  %v1033_v40 = vld [vmem:[%s5396_s3 + $0xb0] sm:$0xff] }
  0xaf   : > { %4287 = vmatprep.subr.bf16.mxu0 %v4286_v37  ;;  %v1243_v37 = vld [vmem:[%s5396_s3 + $0x740] sm:$0xff]  ;;  %v1136_v52 = vld [vmem:[%s5396_s3 + $0x3e8] sm:$0xff]  ;;  %v1157_v41 = vld [vmem:[%s5396_s3 + $0x490] sm:$0xff] }
  0xb0   : > { %4413 = vmatpush1.bf16.xpose.msra.mxu1 %v4412_v36  ;;  %v1119_v36 = vld [vmem:[%s5396_s3 + $0x360] sm:$0xff]  ;;  %v1260_v53 = vld [vmem:[%s5396_s3 + $0x7c8] sm:$0xff]  ;;  %v4314_v57 = vpack.c.bf16 %v1136_v52, %v1132_v51  ;;  %v1161_v42 = vld [vmem:[%s5396_s3 + $0x4b0] sm:$0xff] }
  0xb1   : > { %4415 = vmatprep.subr.bf16.mxu1 %v4414_v38  ;;  %v1247_v38 = vld [vmem:[%s5396_s3 + $0x760] sm:$0xff]  ;;  %v4308_v43 = vpack.c.bf16 %v1119_v36, %v1115_v35  ;;  %v1264_v54 = vld [vmem:[%s5396_s3 + $0x7e8] sm:$0xff]  ;;  %v4326_v35 = vpack.c.bf16 %v1034_v28, %v1030_v27  ;;  %v1062_v27 = vld [vmem:[%s5396_s3 + $0x198] sm:$0xff] }
  0xb2   : > { %v4436_v44 = vpack.c.bf16 %v1247_v38, %v1243_v37  ;;  %v4442_v58 = vpack.c.bf16 %v1264_v54, %v1260_v53  ;;  %v760_v18 = vld [vmem:[%s5389_s6 + $0x28] sm:$0xff]  ;;  %v767_v37 = vld [vmem:[%s5389_s6 + $0x60] sm:$0xff]  ;;  %v1066_v28 = vld [vmem:[%s5396_s3 + $0x1b8] sm:$0xff] }
  0xb3   : > { %v772_v38 = vld [vmem:[%s5389_s6 + $0x88] sm:$0xff]  ;;  %v775_v53 = vld [vmem:[%s5389_s6 + $0xa0] sm:$0xff] }
  0xb4   : > { %v780_v54 = vld [vmem:[%s5389_s6 + $0xc8] sm:$0xff] }
  0xb5   : > { %v784_v0 = vld [vmem:[%s5389_s6 + $0xe8] sm:$0xff] }
  0xb6   : > { %4289 = vmatpush1.bf16.xpose.msra.mxu0 %v4288_v47  ;;  %v1123_v47 = vld [vmem:[%s5396_s3 + $0x380] sm:$0xff] }
  0xb7   : > { %4291 = vmatprep.subr.bf16.mxu0 %v4290_v49  ;;  %v1251_v49 = vld [vmem:[%s5396_s3 + $0x780] sm:$0xff] }
  0xb8   : > { %4417 = vmatpush1.bf16.xpose.msra.mxu1 %v4416_v48  ;;  %v1127_v48 = vld [vmem:[%s5396_s3 + $0x3a0] sm:$0xff] }
  0xb9   : > { %4419 = vmatprep.subr.bf16.mxu1 %v4418_v50  ;;  %v1255_v50 = vld [vmem:[%s5396_s3 + $0x7a0] sm:$0xff]  ;;  %v4312_v55 = vpack.c.bf16 %v1127_v48, %v1123_v47  ;;  %v1170_v47 = vld [vmem:[%s5396_s3 + $0x4f8] sm:$0xff]  ;;  %v776_v48 = vld [vmem:[%s5389_s6 + $0xa8] sm:$0xff] }
  0xba   : > { %v4440_v56 = vpack.c.bf16 %v1255_v50, %v1251_v49  ;;  %v4328_v49 = vpack.c.bf16 %v1033_v40, %v1029_v39  ;;  %v4456_v50 = vpack.c.bf16 %v1161_v42, %v1157_v41  ;;  %v1061_v39 = vld [vmem:[%s5396_s3 + $0x190] sm:$0xff] }
  0xbb   : > { %v1065_v40 = vld [vmem:[%s5396_s3 + $0x1b0] sm:$0xff] }
  0xbc   : > { %v1189_v41 = vld [vmem:[%s5396_s3 + $0x590] sm:$0xff] }
  0xbd   : > { %v1193_v42 = vld [vmem:[%s5396_s3 + $0x5b0] sm:$0xff] }
  0xbe   : > { %4293 = vmatpush1.bf16.xpose.msra.mxu0 %v4292_v59  ;;  %v1131_v59 = vld [vmem:[%s5396_s3 + $0x3c0] sm:$0xff] }
  0xbf   : > { %4295 = vmatprep.subr.bf16.mxu0 %v4294_v61  ;;  %v1259_v61 = vld [vmem:[%s5396_s3 + $0x7c0] sm:$0xff] }
  0xc0   : > { %4421 = vmatpush1.bf16.xpose.msra.mxu1 %v4420_v60  ;;  %v1135_v60 = vld [vmem:[%s5396_s3 + $0x3e0] sm:$0xff] }
  0xc1   : > { %4423 = vmatprep.subr.bf16.mxu1 %v4422_v62  ;;  %v1263_v62 = vld [vmem:[%s5396_s3 + $0x7e0] sm:$0xff]  ;;  %v4316_v3 = vpack.c.bf16 %v1135_v60, %v1131_v59  ;;  %v1046_v59 = vld [vmem:[%s5396_s3 + $0x118] sm:$0xff] }
  0xc2   : > { %v4444_v4 = vpack.c.bf16 %v1263_v62, %v1259_v61  ;;  %v1050_v60 = vld [vmem:[%s5396_s3 + $0x138] sm:$0xff]  ;;  %v779_v61 = vld [vmem:[%s5389_s6 + $0xc0] sm:$0xff] }
  0xc3   : > { %v1174_v62 = vld [vmem:[%s5396_s3 + $0x518] sm:$0xff] }
  0xc6   : > { %4297 = vmatpush1.bf16.xpose.msra.mxu0 %v4296_v7  ;;  %v1013_v7 = vld [vmem:[%s5396_s3 + $0x10] sm:$0xff] }
  0xc7   : > { %4299 = vmatprep.subr.bf16.mxu0 %v4298_v9  ;;  %v1141_v9 = vld [vmem:[%s5396_s3 + $0x410] sm:$0xff] }
  0xc8   : > { %4425 = vmatpush1.bf16.xpose.msra.mxu1 %v4424_v8  ;;  %v1017_v8 = vld [vmem:[%s5396_s3 + $0x30] sm:$0xff] }
  0xc9   : > { %4427 = vmatprep.subr.bf16.mxu1 %v4426_v10  ;;  %v1145_v10 = vld [vmem:[%s5396_s3 + $0x430] sm:$0xff]  ;;  %v4320_v14 = vpack.c.bf16 %v1017_v8, %v1013_v7 }
  0xca   : > { %v4448_v17 = vpack.c.bf16 %v1145_v10, %v1141_v9  ;;  %v1045_v7 = vld [vmem:[%s5396_s3 + $0x110] sm:$0xff] }
  0xcb   : > { %v1049_v8 = vld [vmem:[%s5396_s3 + $0x130] sm:$0xff] }
  0xcc   : > { %v1173_v9 = vld [vmem:[%s5396_s3 + $0x510] sm:$0xff] }
  0xcd   : > { %v1177_v10 = vld [vmem:[%s5396_s3 + $0x530] sm:$0xff] }
  0xce   : > { %4301 = vmatpush1.bf16.xpose.msra.mxu0 %v4300_v19  ;;  %v4322_v19 = vpack.c.bf16 %v1026_v12, %v1022_v11  ;;  %v1054_v11 = vld [vmem:[%s5396_s3 + $0x158] sm:$0xff] }
  0xcf   : > { %4303 = vmatprep.subr.bf16.mxu0 %v4302_v21  ;;  %v759_v21 = vld [vmem:[%s5389_s6 + $0x20] sm:$0xff]  ;;  %v1058_v12 = vld [vmem:[%s5396_s3 + $0x178] sm:$0xff] }
  0xd0   : > { %4429 = vmatpush1.bf16.xpose.msra.mxu1 %v4428_v20  ;;  %v4450_v20 = vpack.c.bf16 %v1154_v16, %v1150_v15  ;;  %v1186_v15 = vld [vmem:[%s5396_s3 + $0x578] sm:$0xff]  ;;  %v792_v16 = vld [vmem:[%s5389_s6 + $0x128] sm:$0xff] }
  0xd1   : > { %4431 = vmatprep.subr.bf16.mxu1 %v4430_v22  ;;  %v764_v22 = vld [vmem:[%s5389_s6 + $0x48] sm:$0xff] }
  0xd6   : > { %4305 = vmatpush1.bf16.xpose.msra.mxu0 %v4304_v31  ;;  %v1162_v31 = vld [vmem:[%s5396_s3 + $0x4b8] sm:$0xff] }
  0xd7   : > { %4307 = vmatprep.subr.bf16.mxu0 %v4306_v33  ;;  %v4324_v33 = vpack.c.bf16 %v1025_v24, %v1021_v23  ;;  %v4454_v36 = vpack.c.bf16 %v1162_v31, %v1158_v30  ;;  %v1053_v23 = vld [vmem:[%s5396_s3 + $0x150] sm:$0xff]  ;;  %v1190_v30 = vld [vmem:[%s5396_s3 + $0x598] sm:$0xff] }
  0xd8   : > { %4433 = vmatpush1.bf16.xpose.msra.mxu1 %v4432_v32  ;;  %v768_v32 = vld [vmem:[%s5389_s6 + $0x68] sm:$0xff]  ;;  %v1057_v24 = vld [vmem:[%s5396_s3 + $0x170] sm:$0xff]  ;;  %v1194_v31 = vld [vmem:[%s5396_s3 + $0x5b8] sm:$0xff] }
  0xd9   : > { %4435 = vmatprep.subr.bf16.mxu1 %v4434_v34  ;;  %v4452_v34 = vpack.c.bf16 %v1153_v26, %v1149_v25  ;;  %v1181_v25 = vld [vmem:[%s5396_s3 + $0x550] sm:$0xff] }
  0xda   : > { %v1185_v26 = vld [vmem:[%s5396_s3 + $0x570] sm:$0xff] }
  0xde   : > { %4309 = vmatpush1.bf16.xpose.msra.mxu0 %v4308_v43  ;;  %v1038_v43 = vld [vmem:[%s5396_s3 + $0xd8] sm:$0xff] }
  0xdf   : > { %4311 = vmatprep.subr.bf16.mxu0 %v4310_v45  ;;  %v771_v45 = vld [vmem:[%s5389_s6 + $0x80] sm:$0xff] }
  0xe0   : > { %4437 = vmatpush1.bf16.xpose.msra.mxu1 %v4436_v44  ;;  %v1042_v44 = vld [vmem:[%s5396_s3 + $0xf8] sm:$0xff] }
  0xe1   : > { %4439 = vmatprep.subr.bf16.mxu1 %v4438_v46  ;;  %v1166_v46 = vld [vmem:[%s5396_s3 + $0x4d8] sm:$0xff]  ;;  %v4330_v51 = vpack.c.bf16 %v1042_v44, %v1038_v43 }
  0xe2   : > { %v4458_v52 = vpack.c.bf16 %v1170_v47, %v1166_v46  ;;  %v1070_v43 = vld [vmem:[%s5396_s3 + $0x1d8] sm:$0xff] }
  0xe3   : > { %v1074_v44 = vld [vmem:[%s5396_s3 + $0x1f8] sm:$0xff] }
  0xe4   : > { %v1198_v46 = vld [vmem:[%s5396_s3 + $0x5d8] sm:$0xff] }
  0xe5   : > { %v1202_v47 = vld [vmem:[%s5396_s3 + $0x5f8] sm:$0xff] }
  0xe6   : > { %4313 = vmatpush1.bf16.xpose.msra.mxu0 %v4312_v55  ;;  %v1037_v55 = vld [vmem:[%s5396_s3 + $0xd0] sm:$0xff] }
  0xe7   : > { %4315 = vmatprep.subr.bf16.mxu0 %v4314_v57  ;;  %v1165_v57 = vld [vmem:[%s5396_s3 + $0x4d0] sm:$0xff] }
  0xe8   : > { %4441 = vmatpush1.bf16.xpose.msra.mxu1 %v4440_v56  ;;  %v1041_v56 = vld [vmem:[%s5396_s3 + $0xf0] sm:$0xff] }
  0xe9   : > { %4443 = vmatprep.subr.bf16.mxu1 %v4442_v58  ;;  %v1169_v58 = vld [vmem:[%s5396_s3 + $0x4f0] sm:$0xff]  ;;  %v4332_v1 = vpack.c.bf16 %v1041_v56, %v1037_v55 }
  0xea   : > { %v4460_v2 = vpack.c.bf16 %v1169_v58, %v1165_v57  ;;  %v1069_v55 = vld [vmem:[%s5396_s3 + $0x1d0] sm:$0xff] }
  0xeb   : > { %v1073_v56 = vld [vmem:[%s5396_s3 + $0x1f0] sm:$0xff] }
  0xec   : > { %v1197_v57 = vld [vmem:[%s5396_s3 + $0x5d0] sm:$0xff] }
  0xed   : > { %v1201_v58 = vld [vmem:[%s5396_s3 + $0x5f0] sm:$0xff] }
  0xee   : > { %4317 = vmatpush1.bf16.xpose.msra.mxu0 %v4316_v3  ;;  %v4334_v3 = vpack.c.bf16 %v1050_v60, %v1046_v59  ;;  %v1078_v59 = vld [vmem:[%s5396_s3 + $0x218] sm:$0xff] }
  0xef   : > { %4319 = vmatprep.subr.bf16.mxu0 %v4318_v5  ;;  %v783_v5 = vld [vmem:[%s5389_s6 + $0xe0] sm:$0xff]  ;;  %v1082_v60 = vld [vmem:[%s5396_s3 + $0x238] sm:$0xff] }
  0xf0   : > { %4445 = vmatpush1.bf16.xpose.msra.mxu1 %v4444_v4  ;;  %v4462_v4 = vpack.c.bf16 %v1178_v63, %v1174_v62  ;;  %v1206_v62 = vld [vmem:[%s5396_s3 + $0x618] sm:$0xff] }
  0xf1   : > { %4447 = vmatprep.subr.bf16.mxu1 %v4446_v6  ;;  %v788_v6 = vld [vmem:[%s5389_s6 + $0x108] sm:$0xff]  ;;  %v1210_v63 = vld [vmem:[%s5396_s3 + $0x638] sm:$0xff] }
  0xf5   : > { %1332 = vmatmul.mubr.f32.vlgmr.msra.gmra.mrb[0].mxu0 %v755_v13 }
  0xf6   : > { %4321 = vmatpush1.bf16.xpose.msra.mxu0 %v4320_v14  ;;  %1337 = vmatprep.mubr.f32.mxu0 %v760_v18  ;;  %v1182_v14 = vld [vmem:[%s5396_s3 + $0x558] sm:$0xff] }
  0xf7   : > { %2230 = vmatmul.mubr.f32.vlgmr.msra.gmra.mrb[0].mxu1 %v755_v13  ;;  %4323 = vmatprep.subr.bf16.mxu0 %v4322_v19  ;;  %v787_v13 = vld [vmem:[%s5389_s6 + $0x100] sm:$0xff]  ;;  %v4338_v19 = vpack.c.bf16 %v1058_v12, %v1054_v11  ;;  %v1086_v11 = vld [vmem:[%s5396_s3 + $0x258] sm:$0xff] }
  0xf8   : > { %4449 = vmatpush1.bf16.xpose.msra.mxu1 %v4448_v17  ;;  %2235 = vmatprep.mubr.f32.mxu1 %v760_v18  ;;  %v4336_v17 = vpack.c.bf16 %v1049_v8, %v1045_v7  ;;  %v4464_v18 = vpack.c.bf16 %v1177_v10, %v1173_v9  ;;  %v1077_v7 = vld [vmem:[%s5396_s3 + $0x210] sm:$0xff]  ;;  %v1090_v12 = vld [vmem:[%s5396_s3 + $0x278] sm:$0xff] }
  0xf9   : > { %1338 = vmatmul.mubr.f32.gmra.mrb[2].mxu0 %v759_v21  ;;  %4451 = vmatprep.subr.bf16.mxu1 %v4450_v20  ;;  %v4466_v20 = vpack.c.bf16 %v1186_v15, %v1182_v14  ;;  %v1081_v8 = vld [vmem:[%s5396_s3 + $0x230] sm:$0xff]  ;;  %v1214_v14 = vld [vmem:[%s5396_s3 + $0x658] sm:$0xff] }
  0xfa   : > { %1343 = vmatprep.mubr.f32.mxu0 %v764_v22  ;;  %v1205_v9 = vld [vmem:[%s5396_s3 + $0x610] sm:$0xff]  ;;  %v1218_v15 = vld [vmem:[%s5396_s3 + $0x678] sm:$0xff] }
  0xfb   : > { %2236 = vmatmul.mubr.f32.gmra.mrb[2].mxu1 %v759_v21  ;;  %v791_v21 = vld [vmem:[%s5389_s6 + $0x120] sm:$0xff]  ;;  %v1209_v10 = vld [vmem:[%s5396_s3 + $0x630] sm:$0xff] }
  0xfc   : > { %2241 = vmatprep.mubr.f32.mxu1 %v764_v22  ;;  %v796_v22 = vld [vmem:[%s5389_s6 + $0x148] sm:$0xff] }
  0xfd   : > { %1344 = vmatmul.mubr.f32.gmra.mrb[4].mxu0 %v763_v29 }
  0xfe   : > { %1349 = vmatprep.mubr.f32.mxu0 %v768_v32  ;;  %4325 = vmatpush1.bf16.xpose.msra.mxu0 %v4324_v33  ;;  %v4340_v33 = vpack.c.bf16 %v1057_v24, %v1053_v23  ;;  %v1085_v23 = vld [vmem:[%s5396_s3 + $0x250] sm:$0xff] }
  0xff   : > { %2242 = vmatmul.mubr.f32.gmra.mrb[4].mxu1 %v763_v29  ;;  %4327 = vmatprep.subr.bf16.mxu0 %v4326_v35  ;;  %v795_v29 = vld [vmem:[%s5389_s6 + $0x140] sm:$0xff]  ;;  %v4342_v35 = vpack.c.bf16 %v1066_v28, %v1062_v27  ;;  %v1089_v24 = vld [vmem:[%s5396_s3 + $0x270] sm:$0xff]  ;;  %v1094_v27 = vld [vmem:[%s5396_s3 + $0x298] sm:$0xff] }
 0x100   : > { %2247 = vmatprep.mubr.f32.mxu1 %v768_v32  ;;  %4453 = vmatpush1.bf16.xpose.msra.mxu1 %v4452_v34  ;;  %v800_v32 = vld [vmem:[%s5389_s6 + $0x168] sm:$0xff]  ;;  %v4468_v34 = vpack.c.bf16 %v1185_v26, %v1181_v25  ;;  %v1213_v25 = vld [vmem:[%s5396_s3 + $0x650] sm:$0xff]  ;;  %v1098_v28 = vld [vmem:[%s5396_s3 + $0x2b8] sm:$0xff] }
 0x101   : > { %1350 = vmatmul.mubr.f32.gmra.mrb[6].mxu0 %v767_v37  ;;  %4455 = vmatprep.subr.bf16.mxu1 %v4454_v36  ;;  %v4470_v36 = vpack.c.bf16 %v1194_v31, %v1190_v30  ;;  %v1217_v26 = vld [vmem:[%s5396_s3 + $0x670] sm:$0xff]  ;;  %v1222_v30 = vld [vmem:[%s5396_s3 + $0x698] sm:$0xff] }
 0x102   : > { %1355 = vmatprep.mubr.f32.mxu0 %v772_v38  ;;  %v1226_v31 = vld [vmem:[%s5396_s3 + $0x6b8] sm:$0xff] }
 0x103   : > { %2248 = vmatmul.mubr.f32.gmra.mrb[6].mxu1 %v767_v37  ;;  %v799_v37 = vld [vmem:[%s5389_s6 + $0x160] sm:$0xff] }
 0x104   : > { %2253 = vmatprep.mubr.f32.mxu1 %v772_v38  ;;  %v804_v38 = vld [vmem:[%s5389_s6 + $0x188] sm:$0xff] }
 0x105   : > { %1356 = vmatmul.mubr.f32.gmra.mrb[8].mxu0 %v771_v45 }
 0x106   : > { %1361 = vmatprep.mubr.f32.mxu0 %v776_v48  ;;  %4329 = vmatpush1.bf16.xpose.msra.mxu0 %v4328_v49  ;;  %v4344_v49 = vpack.c.bf16 %v1065_v40, %v1061_v39  ;;  %v1093_v39 = vld [vmem:[%s5396_s3 + $0x290] sm:$0xff] }
 0x107   : > { %2254 = vmatmul.mubr.f32.gmra.mrb[8].mxu1 %v771_v45  ;;  %4331 = vmatprep.subr.bf16.mxu0 %v4330_v51  ;;  %v803_v45 = vld [vmem:[%s5389_s6 + $0x180] sm:$0xff]  ;;  %v4346_v51 = vpack.c.bf16 %v1074_v44, %v1070_v43  ;;  %v1097_v40 = vld [vmem:[%s5396_s3 + $0x2b0] sm:$0xff]  ;;  %v1102_v43 = vld [vmem:[%s5396_s3 + $0x2d8] sm:$0xff] }
 0x108   : > { %2259 = vmatprep.mubr.f32.mxu1 %v776_v48  ;;  %4457 = vmatpush1.bf16.xpose.msra.mxu1 %v4456_v50  ;;  %v808_v48 = vld [vmem:[%s5389_s6 + $0x1a8] sm:$0xff]  ;;  %v4472_v50 = vpack.c.bf16 %v1193_v42, %v1189_v41  ;;  %v1221_v41 = vld [vmem:[%s5396_s3 + $0x690] sm:$0xff]  ;;  %v1106_v44 = vld [vmem:[%s5396_s3 + $0x2f8] sm:$0xff] }
 0x109   : > { %1362 = vmatmul.mubr.f32.gmra.mrb[10].mxu0 %v775_v53  ;;  %4459 = vmatprep.subr.bf16.mxu1 %v4458_v52  ;;  %v4474_v52 = vpack.c.bf16 %v1202_v47, %v1198_v46  ;;  %v1225_v42 = vld [vmem:[%s5396_s3 + $0x6b0] sm:$0xff]  ;;  %v1230_v46 = vld [vmem:[%s5396_s3 + $0x6d8] sm:$0xff] }
 0x10a   : > { %1367 = vmatprep.mubr.f32.mxu0 %v780_v54  ;;  %v1234_v47 = vld [vmem:[%s5396_s3 + $0x6f8] sm:$0xff] }
 0x10b   : > { %2260 = vmatmul.mubr.f32.gmra.mrb[10].mxu1 %v775_v53  ;;  %v807_v53 = vld [vmem:[%s5389_s6 + $0x1a0] sm:$0xff] }
 0x10c   : > { %2265 = vmatprep.mubr.f32.mxu1 %v780_v54  ;;  %v812_v54 = vld [vmem:[%s5389_s6 + $0x1c8] sm:$0xff] }
 0x10d   : > { %1368 = vmatmul.mubr.f32.gmra.mrb[12].mxu0 %v779_v61 }
 0x10e   : > { %1373 = vmatprep.mubr.f32.mxu0 %v784_v0  ;;  %4333 = vmatpush1.bf16.xpose.msra.mxu0 %v4332_v1  ;;  %v4348_v1 = vpack.c.bf16 %v1073_v56, %v1069_v55  ;;  %v1101_v55 = vld [vmem:[%s5396_s3 + $0x2d0] sm:$0xff] }
 0x10f   : > { %2266 = vmatmul.mubr.f32.gmra.mrb[12].mxu1 %v779_v61  ;;  %4335 = vmatprep.subr.bf16.mxu0 %v4334_v3  ;;  %v811_v61 = vld [vmem:[%s5389_s6 + $0x1c0] sm:$0xff]  ;;  %v4350_v3 = vpack.c.bf16 %v1082_v60, %v1078_v59  ;;  %v1105_v56 = vld [vmem:[%s5396_s3 + $0x2f0] sm:$0xff]  ;;  %v1110_v59 = vld [vmem:[%s5396_s3 + $0x318] sm:$0xff] }
 0x110   : > { %2271 = vmatprep.mubr.f32.mxu1 %v784_v0  ;;  %4461 = vmatpush1.bf16.xpose.msra.mxu1 %v4460_v2  ;;  %v816_v0 = vld [vmem:[%s5389_s6 + $0x1e8] sm:$0xff]  ;;  %v4476_v2 = vpack.c.bf16 %v1201_v58, %v1197_v57  ;;  %v1229_v57 = vld [vmem:[%s5396_s3 + $0x6d0] sm:$0xff]  ;;  %v1114_v60 = vld [vmem:[%s5396_s3 + $0x338] sm:$0xff] }
 0x111   : > { %1374 = vmatmul.mubr.f32.gmra.mrb[14].mxu0 %v783_v5  ;;  %4463 = vmatprep.subr.bf16.mxu1 %v4462_v4  ;;  %v4478_v4 = vpack.c.bf16 %v1210_v63, %v1206_v62  ;;  %v1233_v58 = vld [vmem:[%s5396_s3 + $0x6f0] sm:$0xff]  ;;  %v1238_v62 = vld [vmem:[%s5396_s3 + $0x718] sm:$0xff] }
 0x112   : > { %1379 = vmatprep.mubr.f32.mxu0 %v788_v6  ;;  %v1242_v63 = vld [vmem:[%s5396_s3 + $0x738] sm:$0xff] }
 0x113   : > { %2272 = vmatmul.mubr.f32.gmra.mrb[14].mxu1 %v783_v5  ;;  %v815_v5 = vld [vmem:[%s5389_s6 + $0x1e0] sm:$0xff] }
 0x114   : > { %2277 = vmatprep.mubr.f32.mxu1 %v788_v6  ;;  %v820_v6 = vld [vmem:[%s5389_s6 + $0x208] sm:$0xff] }
 0x115   : > { %1380 = vmatmul.mubr.f32.gmra.mrb[16].mxu0 %v787_v13 }
 0x116   : > { %1385 = vmatprep.mubr.f32.mxu0 %v792_v16  ;;  %4337 = vmatpush1.bf16.xpose.msra.mxu0 %v4336_v17  ;;  %v4352_v17 = vpack.c.bf16 %v1081_v8, %v1077_v7  ;;  %v1109_v7 = vld [vmem:[%s5396_s3 + $0x310] sm:$0xff] }
 0x117   : > { %2278 = vmatmul.mubr.f32.gmra.mrb[16].mxu1 %v787_v13  ;;  %4339 = vmatprep.subr.bf16.mxu0 %v4338_v19  ;;  %v819_v13 = vld [vmem:[%s5389_s6 + $0x200] sm:$0xff]  ;;  %v4354_v19 = vpack.c.bf16 %v1090_v12, %v1086_v11  ;;  %v1113_v8 = vld [vmem:[%s5396_s3 + $0x330] sm:$0xff]  ;;  %v1118_v11 = vld [vmem:[%s5396_s3 + $0x358] sm:$0xff] }
 0x118   : > { %2283 = vmatprep.mubr.f32.mxu1 %v792_v16  ;;  %4465 = vmatpush1.bf16.xpose.msra.mxu1 %v4464_v18  ;;  %v824_v16 = vld [vmem:[%s5389_s6 + $0x228] sm:$0xff]  ;;  %v4480_v18 = vpack.c.bf16 %v1209_v10, %v1205_v9  ;;  %v1237_v9 = vld [vmem:[%s5396_s3 + $0x710] sm:$0xff]  ;;  %v1122_v12 = vld [vmem:[%s5396_s3 + $0x378] sm:$0xff] }
 0x119   : > { %1386 = vmatmul.mubr.f32.gmra.mrb[18].mxu0 %v791_v21  ;;  %4467 = vmatprep.subr.bf16.mxu1 %v4466_v20  ;;  %v4482_v20 = vpack.c.bf16 %v1218_v15, %v1214_v14  ;;  %v1241_v10 = vld [vmem:[%s5396_s3 + $0x730] sm:$0xff]  ;;  %v1246_v14 = vld [vmem:[%s5396_s3 + $0x758] sm:$0xff] }
 0x11a   : > { %1391 = vmatprep.mubr.f32.mxu0 %v796_v22  ;;  %v1250_v15 = vld [vmem:[%s5396_s3 + $0x778] sm:$0xff] }
 0x11b   : > { %2284 = vmatmul.mubr.f32.gmra.mrb[18].mxu1 %v791_v21  ;;  %v823_v21 = vld [vmem:[%s5389_s6 + $0x220] sm:$0xff] }
 0x11c   : > { %2289 = vmatprep.mubr.f32.mxu1 %v796_v22  ;;  %v828_v22 = vld [vmem:[%s5389_s6 + $0x248] sm:$0xff] }
 0x11d   : > { %1392 = vmatmul.mubr.f32.gmra.mrb[20].mxu0 %v795_v29 }
 0x11e   : > { %1397 = vmatprep.mubr.f32.mxu0 %v800_v32  ;;  %4341 = vmatpush1.bf16.xpose.msra.mxu0 %v4340_v33  ;;  %v4356_v33 = vpack.c.bf16 %v1089_v24, %v1085_v23  ;;  %v1117_v23 = vld [vmem:[%s5396_s3 + $0x350] sm:$0xff] }
 0x11f   : > { %2290 = vmatmul.mubr.f32.gmra.mrb[20].mxu1 %v795_v29  ;;  %4343 = vmatprep.subr.bf16.mxu0 %v4342_v35  ;;  %v827_v29 = vld [vmem:[%s5389_s6 + $0x240] sm:$0xff]  ;;  %v4358_v35 = vpack.c.bf16 %v1098_v28, %v1094_v27  ;;  %v1121_v24 = vld [vmem:[%s5396_s3 + $0x370] sm:$0xff]  ;;  %v1126_v27 = vld [vmem:[%s5396_s3 + $0x398] sm:$0xff] }
 0x120   : > { %2295 = vmatprep.mubr.f32.mxu1 %v800_v32  ;;  %4469 = vmatpush1.bf16.xpose.msra.mxu1 %v4468_v34  ;;  %v832_v32 = vld [vmem:[%s5389_s6 + $0x268] sm:$0xff]  ;;  %v4484_v34 = vpack.c.bf16 %v1217_v26, %v1213_v25  ;;  %v1245_v25 = vld [vmem:[%s5396_s3 + $0x750] sm:$0xff]  ;;  %v1130_v28 = vld [vmem:[%s5396_s3 + $0x3b8] sm:$0xff] }
 0x121   : > { %1398 = vmatmul.mubr.f32.gmra.mrb[22].mxu0 %v799_v37  ;;  %4471 = vmatprep.subr.bf16.mxu1 %v4470_v36  ;;  %v4486_v36 = vpack.c.bf16 %v1226_v31, %v1222_v30  ;;  %v1249_v26 = vld [vmem:[%s5396_s3 + $0x770] sm:$0xff]  ;;  %v1254_v30 = vld [vmem:[%s5396_s3 + $0x798] sm:$0xff] }
 0x122   : > { %1403 = vmatprep.mubr.f32.mxu0 %v804_v38  ;;  %v1258_v31 = vld [vmem:[%s5396_s3 + $0x7b8] sm:$0xff] }
 0x123   : > { %2296 = vmatmul.mubr.f32.gmra.mrb[22].mxu1 %v799_v37  ;;  %v831_v37 = vld [vmem:[%s5389_s6 + $0x260] sm:$0xff] }
 0x124   : > { %2301 = vmatprep.mubr.f32.mxu1 %v804_v38  ;;  %v836_v38 = vld [vmem:[%s5389_s6 + $0x288] sm:$0xff] }
 0x125   : > { %1404 = vmatmul.mubr.f32.gmra.mrb[24].mxu0 %v803_v45 }
 0x126   : > { %1409 = vmatprep.mubr.f32.mxu0 %v808_v48  ;;  %4345 = vmatpush1.bf16.xpose.msra.mxu0 %v4344_v49  ;;  %v4360_v49 = vpack.c.bf16 %v1097_v40, %v1093_v39  ;;  %v1125_v39 = vld [vmem:[%s5396_s3 + $0x390] sm:$0xff] }
 0x127   : > { %2302 = vmatmul.mubr.f32.gmra.mrb[24].mxu1 %v803_v45  ;;  %4347 = vmatprep.subr.bf16.mxu0 %v4346_v51  ;;  %v835_v45 = vld [vmem:[%s5389_s6 + $0x280] sm:$0xff]  ;;  %v4362_v51 = vpack.c.bf16 %v1106_v44, %v1102_v43  ;;  %v1129_v40 = vld [vmem:[%s5396_s3 + $0x3b0] sm:$0xff]  ;;  %v872_v44 = vld [vmem:[%s5389_s6 + $0x3a8] sm:$0xff] }
 0x128   : > { %2307 = vmatprep.mubr.f32.mxu1 %v808_v48  ;;  %4473 = vmatpush1.bf16.xpose.msra.mxu1 %v4472_v50  ;;  %v840_v48 = vld [vmem:[%s5389_s6 + $0x2a8] sm:$0xff]  ;;  %v4488_v50 = vpack.c.bf16 %v1225_v42, %v1221_v41  ;;  %v1253_v41 = vld [vmem:[%s5396_s3 + $0x790] sm:$0xff]  ;;  %v867_v43 = vld [vmem:[%s5389_s6 + $0x380] sm:$0xff] }
 0x129   : > { %1410 = vmatmul.mubr.f32.gmra.mrb[26].mxu0 %v807_v53  ;;  %4475 = vmatprep.subr.bf16.mxu1 %v4474_v52  ;;  %v4490_v52 = vpack.c.bf16 %v1234_v47, %v1230_v46  ;;  %v1257_v42 = vld [vmem:[%s5396_s3 + $0x7b0] sm:$0xff]  ;;  %v1134_v47 = vld [vmem:[%s5396_s3 + $0x3d8] sm:$0xff] }
 0x12a   : > { %1415 = vmatprep.mubr.f32.mxu0 %v812_v54  ;;  %v4504_v46 = vpack.c.bf16 %v1257_v42, %v1253_v41  ;;  %v963_v41 = vld [vmem:[%s5389_s6 + $0x680] sm:$0xff]  ;;  %v968_v42 = vld [vmem:[%s5389_s6 + $0x6a8] sm:$0xff] }
 0x12b   : > { %2308 = vmatmul.mubr.f32.gmra.mrb[26].mxu1 %v807_v53  ;;  %v839_v53 = vld [vmem:[%s5389_s6 + $0x2a0] sm:$0xff] }
 0x12c   : > { %2313 = vmatprep.mubr.f32.mxu1 %v812_v54  ;;  %v844_v54 = vld [vmem:[%s5389_s6 + $0x2c8] sm:$0xff] }
 0x12d   : > { %1416 = vmatmul.mubr.f32.gmra.mrb[28].mxu0 %v811_v61 }
 0x12e   : > { %1421 = vmatprep.mubr.f32.mxu0 %v816_v0  ;;  %4349 = vmatpush1.bf16.xpose.msra.mxu0 %v4348_v1  ;;  %v4364_v1 = vpack.c.bf16 %v1105_v56, %v1101_v55  ;;  %v1133_v55 = vld [vmem:[%s5396_s3 + $0x3d0] sm:$0xff] }
 0x12f   : > { %2314 = vmatmul.mubr.f32.gmra.mrb[28].mxu1 %v811_v61  ;;  %4351 = vmatprep.subr.bf16.mxu0 %v4350_v3  ;;  %v843_v61 = vld [vmem:[%s5389_s6 + $0x2c0] sm:$0xff]  ;;  %v4366_v3 = vpack.c.bf16 %v1114_v60, %v1110_v59  ;;  %v1137_v56 = vld [vmem:[%s5396_s3 + $0x3f0] sm:$0xff]  ;;  %v880_v60 = vld [vmem:[%s5389_s6 + $0x3e8] sm:$0xff] }
 0x130   : > { %2319 = vmatprep.mubr.f32.mxu1 %v816_v0  ;;  %4477 = vmatpush1.bf16.xpose.msra.mxu1 %v4476_v2  ;;  %v848_v0 = vld [vmem:[%s5389_s6 + $0x2e8] sm:$0xff]  ;;  %v4492_v2 = vpack.c.bf16 %v1233_v58, %v1229_v57  ;;  %v1261_v57 = vld [vmem:[%s5396_s3 + $0x7d0] sm:$0xff]  ;;  %v875_v59 = vld [vmem:[%s5389_s6 + $0x3c0] sm:$0xff] }
 0x131   : > { %1422 = vmatmul.mubr.f32.gmra.mrb[30].mxu0 %v815_v5  ;;  %4479 = vmatprep.subr.bf16.mxu1 %v4478_v4  ;;  %v4494_v4 = vpack.c.bf16 %v1242_v63, %v1238_v62  ;;  %v1265_v58 = vld [vmem:[%s5396_s3 + $0x7f0] sm:$0xff]  ;;  %v879_v63 = vld [vmem:[%s5389_s6 + $0x3e0] sm:$0xff] }
 0x132   : > { %1427 = vmatprep.mubr.f32.mxu0 %v820_v6  ;;  %v4508_v62 = vpack.c.bf16 %v1265_v58, %v1261_v57  ;;  %v995_v57 = vld [vmem:[%s5389_s6 + $0x780] sm:$0xff]  ;;  %v1000_v58 = vld [vmem:[%s5389_s6 + $0x7a8] sm:$0xff] }
 0x133   : > { %2320 = vmatmul.mubr.f32.gmra.mrb[30].mxu1 %v815_v5  ;;  %v847_v5 = vld [vmem:[%s5389_s6 + $0x2e0] sm:$0xff] }
 0x134   : > { %2325 = vmatprep.mubr.f32.mxu1 %v820_v6  ;;  %v852_v6 = vld [vmem:[%s5389_s6 + $0x308] sm:$0xff] }
 0x135   : > { %1428 = vmatmul.mubr.f32.gmra.mrb[32].mxu0 %v819_v13 }
 0x136   : > { %1433 = vmatprep.mubr.f32.mxu0 %v824_v16  ;;  %4353 = vmatpush1.bf16.xpose.msra.mxu0 %v4352_v17  ;;  %v4368_v17 = vpack.c.bf16 %v1113_v8, %v1109_v7  ;;  %v895_v7 = vld [vmem:[%s5389_s6 + $0x460] sm:$0xff]  ;;  %v900_v8 = vld [vmem:[%s5389_s6 + $0x488] sm:$0xff] }
 0x137   : > { %2326 = vmatmul.mubr.f32.gmra.mrb[32].mxu1 %v819_v13  ;;  %4355 = vmatprep.subr.bf16.mxu0 %v4354_v19  ;;  %v851_v13 = vld [vmem:[%s5389_s6 + $0x300] sm:$0xff]  ;;  %v4370_v19 = vpack.c.bf16 %v1122_v12, %v1118_v11  ;;  %v908_v12 = vld [vmem:[%s5389_s6 + $0x4c8] sm:$0xff] }
 0x138   : > { %2331 = vmatprep.mubr.f32.mxu1 %v824_v16  ;;  %4481 = vmatpush1.bf16.xpose.msra.mxu1 %v4480_v18  ;;  %v856_v16 = vld [vmem:[%s5389_s6 + $0x328] sm:$0xff]  ;;  %v4496_v18 = vpack.c.bf16 %v1241_v10, %v1237_v9  ;;  %v899_v9 = vld [vmem:[%s5389_s6 + $0x480] sm:$0xff] }
 0x139   : > { %1434 = vmatmul.mubr.f32.gmra.mrb[34].mxu0 %v823_v21  ;;  %4483 = vmatprep.subr.bf16.mxu1 %v4482_v20  ;;  %v4498_v20 = vpack.c.bf16 %v1250_v15, %v1246_v14  ;;  %v904_v10 = vld [vmem:[%s5389_s6 + $0x4a8] sm:$0xff]  ;;  %v903_v11 = vld [vmem:[%s5389_s6 + $0x4a0] sm:$0xff] }
 0x13a   : > { %1439 = vmatprep.mubr.f32.mxu0 %v828_v22  ;;  %v912_v14 = vld [vmem:[%s5389_s6 + $0x4e8] sm:$0xff]  ;;  %v911_v15 = vld [vmem:[%s5389_s6 + $0x4e0] sm:$0xff] }
 0x13b   : > { %2332 = vmatmul.mubr.f32.gmra.mrb[34].mxu1 %v823_v21  ;;  %v855_v21 = vld [vmem:[%s5389_s6 + $0x320] sm:$0xff] }
 0x13c   : > { %2337 = vmatprep.mubr.f32.mxu1 %v828_v22  ;;  %v860_v22 = vld [vmem:[%s5389_s6 + $0x348] sm:$0xff] }
 0x13d   : > { %1440 = vmatmul.mubr.f32.gmra.mrb[36].mxu0 %v827_v29 }
 0x13e   : > { %1445 = vmatprep.mubr.f32.mxu0 %v832_v32  ;;  %4357 = vmatpush1.bf16.xpose.msra.mxu0 %v4356_v33  ;;  %v4372_v33 = vpack.c.bf16 %v1121_v24, %v1117_v23  ;;  %v927_v23 = vld [vmem:[%s5389_s6 + $0x560] sm:$0xff]  ;;  %v932_v24 = vld [vmem:[%s5389_s6 + $0x588] sm:$0xff] }
 0x13f   : > { %2338 = vmatmul.mubr.f32.gmra.mrb[36].mxu1 %v827_v29  ;;  %4359 = vmatprep.subr.bf16.mxu0 %v4358_v35  ;;  %v859_v29 = vld [vmem:[%s5389_s6 + $0x340] sm:$0xff]  ;;  %v4374_v35 = vpack.c.bf16 %v1130_v28, %v1126_v27  ;;  %v940_v28 = vld [vmem:[%s5389_s6 + $0x5c8] sm:$0xff] }
 0x140   : > { %2343 = vmatprep.mubr.f32.mxu1 %v832_v32  ;;  %4485 = vmatpush1.bf16.xpose.msra.mxu1 %v4484_v34  ;;  %v864_v32 = vld [vmem:[%s5389_s6 + $0x368] sm:$0xff]  ;;  %v4500_v34 = vpack.c.bf16 %v1249_v26, %v1245_v25  ;;  %v931_v25 = vld [vmem:[%s5389_s6 + $0x580] sm:$0xff] }
 0x141   : > { %1446 = vmatmul.mubr.f32.gmra.mrb[38].mxu0 %v831_v37  ;;  %4487 = vmatprep.subr.bf16.mxu1 %v4486_v36  ;;  %v4502_v36 = vpack.c.bf16 %v1258_v31, %v1254_v30  ;;  %v936_v26 = vld [vmem:[%s5389_s6 + $0x5a8] sm:$0xff]  ;;  %v935_v27 = vld [vmem:[%s5389_s6 + $0x5a0] sm:$0xff] }
 0x142   : > { %1451 = vmatprep.mubr.f32.mxu0 %v836_v38  ;;  %v944_v30 = vld [vmem:[%s5389_s6 + $0x5e8] sm:$0xff]  ;;  %v943_v31 = vld [vmem:[%s5389_s6 + $0x5e0] sm:$0xff] }
 0x143   : > { %2344 = vmatmul.mubr.f32.gmra.mrb[38].mxu1 %v831_v37  ;;  %v863_v37 = vld [vmem:[%s5389_s6 + $0x360] sm:$0xff] }
 0x144   : > { %2349 = vmatprep.mubr.f32.mxu1 %v836_v38  ;;  %v868_v38 = vld [vmem:[%s5389_s6 + $0x388] sm:$0xff] }
 0x145   : > { %1452 = vmatmul.mubr.f32.gmra.mrb[40].mxu0 %v835_v45 }
 0x146   : > { %1457 = vmatprep.mubr.f32.mxu0 %v840_v48  ;;  %4361 = vmatpush1.bf16.xpose.msra.mxu0 %v4360_v49  ;;  %v871_v49 = vld [vmem:[%s5389_s6 + $0x3a0] sm:$0xff] }
 0x147   : > { %2350 = vmatmul.mubr.f32.gmra.mrb[40].mxu1 %v835_v45  ;;  %4363 = vmatprep.subr.bf16.mxu0 %v4362_v51  ;;  %v4376_v45 = vpack.c.bf16 %v1129_v40, %v1125_v39  ;;  %v1262_v51 = vld [vmem:[%s5396_s3 + $0x7d8] sm:$0xff]  ;;  %v959_v39 = vld [vmem:[%s5389_s6 + $0x660] sm:$0xff]  ;;  %v964_v40 = vld [vmem:[%s5389_s6 + $0x688] sm:$0xff] }
 0x148   : > { %2355 = vmatprep.mubr.f32.mxu1 %v840_v48  ;;  %4489 = vmatpush1.bf16.xpose.msra.mxu1 %v4488_v50  ;;  %v1138_v48 = vld [vmem:[%s5396_s3 + $0x3f8] sm:$0xff] }
 0x149   : > { %1458 = vmatmul.mubr.f32.gmra.mrb[42].mxu0 %v839_v53  ;;  %4491 = vmatprep.subr.bf16.mxu1 %v4490_v52  ;;  %v4378_v50 = vpack.c.bf16 %v1138_v48, %v1134_v47  ;;  %v1266_v52 = vld [vmem:[%s5396_s3 + $0x7f8] sm:$0xff]  ;;  %v975_v47 = vld [vmem:[%s5389_s6 + $0x6e0] sm:$0xff]  ;;  %v980_v48 = vld [vmem:[%s5389_s6 + $0x708] sm:$0xff]  ;;  %s4968_s3 = scalar_lea.vmem %s4967_s23, 65536 }
 0x14a   : > { %1463 = vmatprep.mubr.f32.mxu0 %v844_v54  ;;  %p4970_p2 = scmp.lt.s32.totalorder %s4968_s3, %s4962_s8 }
 0x14b   : > { %2356 = vmatmul.mubr.f32.gmra.mrb[42].mxu1 %v839_v53  ;;  %v876_v53 = vld [vmem:[%s5389_s6 + $0x3c8] sm:$0xff] }
 0x14c   : > { %2361 = vmatprep.mubr.f32.mxu1 %v844_v54  ;;  %v4506_v54 = vpack.c.bf16 %v1266_v52, %v1262_v51  ;;  %v983_v51 = vld [vmem:[%s5389_s6 + $0x720] sm:$0xff]  ;;  %v988_v52 = vld [vmem:[%s5389_s6 + $0x748] sm:$0xff]  ;;  %p4971_p11 = por %p4970_p2, %p4969_p3 }
 0x14d   : > { %1464 = vmatmul.mubr.f32.gmra.mrb[44].mxu0 %v843_v61 }
 0x14e   : > { %1469 = vmatprep.mubr.f32.mxu0 %v848_v0  ;;  %4365 = vmatpush1.bf16.xpose.msra.mxu0 %v4364_v1  ;;  %v883_v1 = vld [vmem:[%s5389_s6 + $0x400] sm:$0xff]  ;;  %p4972_p8 = pnand %p4971_p11, %p4965_p12 }
 0x14f   : > { %2362 = vmatmul.mubr.f32.gmra.mrb[44].mxu1 %v843_v61  ;;  %4367 = vmatprep.subr.bf16.mxu0 %v4366_v3  ;;  %v4380_v61 = vpack.c.bf16 %v1137_v56, %v1133_v55  ;;  %v887_v3 = vld [vmem:[%s5389_s6 + $0x420] sm:$0xff]  ;;  %v996_v56 = vld [vmem:[%s5389_s6 + $0x788] sm:$0xff] }
 0x150   : > { %2367 = vmatprep.mubr.f32.mxu1 %v848_v0  ;;  %4493 = vmatpush1.bf16.xpose.msra.mxu1 %v4492_v2  ;;  %v884_v0 = vld [vmem:[%s5389_s6 + $0x408] sm:$0xff]  ;;  %v991_v55 = vld [vmem:[%s5389_s6 + $0x760] sm:$0xff] }
 0x151   : > { %1470 = vmatmul.mubr.f32.gmra.mrb[46].mxu0 %v847_v5  ;;  %4495 = vmatprep.subr.bf16.mxu1 %v4494_v4  ;;  %v888_v2 = vld [vmem:[%s5389_s6 + $0x428] sm:$0xff] }
 0x152   : > { %1475 = vmatprep.mubr.f32.mxu0 %v852_v6  ;;  %v892_v4 = vld [vmem:[%s5389_s6 + $0x448] sm:$0xff] }
 0x153   : > { %2368 = vmatmul.mubr.f32.gmra.mrb[46].mxu1 %v847_v5  ;;  %v891_v5 = vld [vmem:[%s5389_s6 + $0x440] sm:$0xff] }
 0x154   : > { %2373 = vmatprep.mubr.f32.mxu1 %v852_v6  ;;  %v896_v6 = vld [vmem:[%s5389_s6 + $0x468] sm:$0xff] }
 0x155   : > { %1476 = vmatmul.mubr.f32.gmra.mrb[48].mxu0 %v851_v13 }
 0x156   : > { %1481 = vmatprep.mubr.f32.mxu0 %v856_v16  ;;  %4369 = vmatpush1.bf16.xpose.msra.mxu0 %v4368_v17  ;;  %v915_v17 = vld [vmem:[%s5389_s6 + $0x500] sm:$0xff] }
 0x157   : > { %2374 = vmatmul.mubr.f32.gmra.mrb[48].mxu1 %v851_v13  ;;  %4371 = vmatprep.subr.bf16.mxu0 %v4370_v19  ;;  %v907_v13 = vld [vmem:[%s5389_s6 + $0x4c0] sm:$0xff] }
 0x158   : > { %2379 = vmatprep.mubr.f32.mxu1 %v856_v16  ;;  %4497 = vmatpush1.bf16.xpose.msra.mxu1 %v4496_v18  ;;  %v916_v16 = vld [vmem:[%s5389_s6 + $0x508] sm:$0xff]  ;;  %v919_v19 = vld [vmem:[%s5389_s6 + $0x520] sm:$0xff] }
 0x159   : > { %1482 = vmatmul.mubr.f32.gmra.mrb[50].mxu0 %v855_v21  ;;  %4499 = vmatprep.subr.bf16.mxu1 %v4498_v20  ;;  %v920_v18 = vld [vmem:[%s5389_s6 + $0x528] sm:$0xff] }
 0x15a   : > { %1487 = vmatprep.mubr.f32.mxu0 %v860_v22  ;;  %v924_v20 = vld [vmem:[%s5389_s6 + $0x548] sm:$0xff] }
 0x15b   : > { %2380 = vmatmul.mubr.f32.gmra.mrb[50].mxu1 %v855_v21  ;;  %v923_v21 = vld [vmem:[%s5389_s6 + $0x540] sm:$0xff] }
 0x15c   : > { %2385 = vmatprep.mubr.f32.mxu1 %v860_v22  ;;  %v928_v22 = vld [vmem:[%s5389_s6 + $0x568] sm:$0xff] }
 0x15d   : > { %1488 = vmatmul.mubr.f32.gmra.mrb[52].mxu0 %v859_v29 }
 0x15e   : > { %1493 = vmatprep.mubr.f32.mxu0 %v864_v32  ;;  %4373 = vmatpush1.bf16.xpose.msra.mxu0 %v4372_v33  ;;  %v947_v33 = vld [vmem:[%s5389_s6 + $0x600] sm:$0xff] }
 0x15f   : > { %2386 = vmatmul.mubr.f32.gmra.mrb[52].mxu1 %v859_v29  ;;  %4375 = vmatprep.subr.bf16.mxu0 %v4374_v35  ;;  %v939_v29 = vld [vmem:[%s5389_s6 + $0x5c0] sm:$0xff] }
 0x160   : > { %2391 = vmatprep.mubr.f32.mxu1 %v864_v32  ;;  %4501 = vmatpush1.bf16.xpose.msra.mxu1 %v4500_v34  ;;  %v948_v32 = vld [vmem:[%s5389_s6 + $0x608] sm:$0xff]  ;;  %v951_v35 = vld [vmem:[%s5389_s6 + $0x620] sm:$0xff] }
 0x161   : > { %1494 = vmatmul.mubr.f32.gmra.mrb[54].mxu0 %v863_v37  ;;  %4503 = vmatprep.subr.bf16.mxu1 %v4502_v36  ;;  %v952_v34 = vld [vmem:[%s5389_s6 + $0x628] sm:$0xff] }
 0x162   : > { %1499 = vmatprep.mubr.f32.mxu0 %v868_v38  ;;  %v956_v36 = vld [vmem:[%s5389_s6 + $0x648] sm:$0xff] }
 0x163   : > { %2392 = vmatmul.mubr.f32.gmra.mrb[54].mxu1 %v863_v37  ;;  %v955_v37 = vld [vmem:[%s5389_s6 + $0x640] sm:$0xff] }
 0x164   : > { %2397 = vmatprep.mubr.f32.mxu1 %v868_v38  ;;  %v960_v38 = vld [vmem:[%s5389_s6 + $0x668] sm:$0xff] }
 0x165   : > { %1500 = vmatmul.mubr.f32.gmra.mrb[56].mxu0 %v867_v43 }
 0x166   : > { %1505 = vmatprep.mubr.f32.mxu0 %v872_v44  ;;  %4377 = vmatpush1.bf16.xpose.msra.mxu0 %v4376_v45  ;;  %v971_v45 = vld [vmem:[%s5389_s6 + $0x6c0] sm:$0xff] }
 0x167   : > { %2398 = vmatmul.mubr.f32.gmra.mrb[56].mxu1 %v867_v43  ;;  %4379 = vmatprep.subr.bf16.mxu0 %v4378_v50  ;;  %v967_v43 = vld [vmem:[%s5389_s6 + $0x6a0] sm:$0xff]  ;;  %v984_v50 = vld [vmem:[%s5389_s6 + $0x728] sm:$0xff] }
 0x168   : > { %2403 = vmatprep.mubr.f32.mxu1 %v872_v44  ;;  %4505 = vmatpush1.bf16.xpose.msra.mxu1 %v4504_v46  ;;  %v972_v44 = vld [vmem:[%s5389_s6 + $0x6c8] sm:$0xff] }
 0x169   : > { %1506 = vmatmul.mubr.f32.gmra.mrb[58].mxu0 %v871_v49  ;;  %4507 = vmatprep.subr.bf16.mxu1 %v4506_v54  ;;  %v976_v46 = vld [vmem:[%s5389_s6 + $0x6e8] sm:$0xff] }
 0x16a   : > { %1511 = vmatprep.mubr.f32.mxu0 %v876_v53  ;;  %v992_v54 = vld [vmem:[%s5389_s6 + $0x768] sm:$0xff] }
 0x16b   : > { %2404 = vmatmul.mubr.f32.gmra.mrb[58].mxu1 %v871_v49  ;;  %v979_v49 = vld [vmem:[%s5389_s6 + $0x700] sm:$0xff] }
 0x16c   : > { %2409 = vmatprep.mubr.f32.mxu1 %v876_v53  ;;  %v987_v53 = vld [vmem:[%s5389_s6 + $0x740] sm:$0xff] }
 0x16d   : > { %1512 = vmatmul.mubr.f32.gmra.mrb[60].mxu0 %v875_v59 }
 0x16e   : > { %1517 = vmatprep.mubr.f32.mxu0 %v880_v60  ;;  %4381 = vmatpush1.bf16.xpose.msra.mxu0 %v4380_v61  ;;  %v1003_v61 = vld [vmem:[%s5389_s6 + $0x7c0] sm:$0xff] }
 0x16f   : > { %2410 = vmatmul.mubr.f32.gmra.mrb[60].mxu1 %v875_v59  ;;  %v999_v59 = vld [vmem:[%s5389_s6 + $0x7a0] sm:$0xff] }
 0x170   : > { %2415 = vmatprep.mubr.f32.mxu1 %v880_v60  ;;  %4509 = vmatpush1.bf16.xpose.msra.mxu1 %v4508_v62  ;;  %v1004_v60 = vld [vmem:[%s5389_s6 + $0x7c8] sm:$0xff] }
 0x171   : > { %1518 = vmatmul.mubr.f32.gmra.mrb[62].mxu0 %v879_v63  ;;  %v1008_v62 = vld [vmem:[%s5389_s6 + $0x7e8] sm:$0xff] }
 0x172   : > { %1523 = vmatprep.mubr.f32.mxu0 %v884_v0 }
 0x173   : > { %2416 = vmatmul.mubr.f32.gmra.mrb[62].mxu1 %v879_v63  ;;  %v1007_v63 = vld [vmem:[%s5389_s6 + $0x7e0] sm:$0xff] }
 0x174   : > { %2421 = vmatprep.mubr.f32.mxu1 %v884_v0  ;;  %v758_v0 = vld [vmem:[%s5389_s6 + $0x18] sm:$0xff] }
 0x175   : > { %1524 = vmatmul.mubr.f32.gmra.mrb[64].mxu0 %v883_v1 }
 0x176   : > { %1529 = vmatprep.mubr.f32.mxu0 %v888_v2 }
 0x177   : > { %2422 = vmatmul.mubr.f32.gmra.mrb[64].mxu1 %v883_v1  ;;  %v757_v1 = vld [vmem:[%s5389_s6 + $0x10] sm:$0xff] }
 0x178   : > { %2427 = vmatprep.mubr.f32.mxu1 %v888_v2  ;;  %v762_v2 = vld [vmem:[%s5389_s6 + $0x38] sm:$0xff] }
 0x179   : > { %1530 = vmatmul.mubr.f32.gmra.mrb[66].mxu0 %v887_v3 }
 0x17a   : > { %1535 = vmatprep.mubr.f32.mxu0 %v892_v4 }
 0x17b   : > { %2428 = vmatmul.mubr.f32.gmra.mrb[66].mxu1 %v887_v3  ;;  %v761_v3 = vld [vmem:[%s5389_s6 + $0x30] sm:$0xff] }
 0x17c   : > { %2433 = vmatprep.mubr.f32.mxu1 %v892_v4  ;;  %v766_v4 = vld [vmem:[%s5389_s6 + $0x58] sm:$0xff] }
 0x17d   : > { %1536 = vmatmul.mubr.f32.gmra.mrb[68].mxu0 %v891_v5 }
 0x17e   : > { %1541 = vmatprep.mubr.f32.mxu0 %v896_v6 }
 0x17f   : > { %2434 = vmatmul.mubr.f32.gmra.mrb[68].mxu1 %v891_v5  ;;  %v765_v5 = vld [vmem:[%s5389_s6 + $0x50] sm:$0xff] }
 0x180   : > { %2439 = vmatprep.mubr.f32.mxu1 %v896_v6  ;;  %v770_v6 = vld [vmem:[%s5389_s6 + $0x78] sm:$0xff] }
 0x181   : > { %1542 = vmatmul.mubr.f32.gmra.mrb[70].mxu0 %v895_v7 }
 0x182   : > { %1547 = vmatprep.mubr.f32.mxu0 %v900_v8 }
 0x183   : > { %2440 = vmatmul.mubr.f32.gmra.mrb[70].mxu1 %v895_v7  ;;  %v769_v7 = vld [vmem:[%s5389_s6 + $0x70] sm:$0xff] }
 0x184   : > { %2445 = vmatprep.mubr.f32.mxu1 %v900_v8  ;;  %v774_v8 = vld [vmem:[%s5389_s6 + $0x98] sm:$0xff] }
 0x185   : > { %1548 = vmatmul.mubr.f32.gmra.mrb[72].mxu0 %v899_v9 }
 0x186   : > { %1553 = vmatprep.mubr.f32.mxu0 %v904_v10 }
 0x187   : > { %2446 = vmatmul.mubr.f32.gmra.mrb[72].mxu1 %v899_v9  ;;  %v773_v9 = vld [vmem:[%s5389_s6 + $0x90] sm:$0xff] }
 0x188   : > { %2451 = vmatprep.mubr.f32.mxu1 %v904_v10  ;;  %v778_v10 = vld [vmem:[%s5389_s6 + $0xb8] sm:$0xff] }
 0x189   : > { %1554 = vmatmul.mubr.f32.gmra.mrb[74].mxu0 %v903_v11 }
 0x18a   : > { %1559 = vmatprep.mubr.f32.mxu0 %v908_v12 }
 0x18b   : > { %2452 = vmatmul.mubr.f32.gmra.mrb[74].mxu1 %v903_v11  ;;  %v777_v11 = vld [vmem:[%s5389_s6 + $0xb0] sm:$0xff] }
 0x18c   : > { %2457 = vmatprep.mubr.f32.mxu1 %v908_v12  ;;  %v782_v12 = vld [vmem:[%s5389_s6 + $0xd8] sm:$0xff] }
 0x18d   : > { %1560 = vmatmul.mubr.f32.gmra.mrb[76].mxu0 %v907_v13 }
 0x18e   : > { %1565 = vmatprep.mubr.f32.mxu0 %v912_v14 }
 0x18f   : > { %2458 = vmatmul.mubr.f32.gmra.mrb[76].mxu1 %v907_v13  ;;  %v781_v13 = vld [vmem:[%s5389_s6 + $0xd0] sm:$0xff] }
 0x190   : > { %2463 = vmatprep.mubr.f32.mxu1 %v912_v14  ;;  %v786_v14 = vld [vmem:[%s5389_s6 + $0xf8] sm:$0xff] }
 0x191   : > { %1566 = vmatmul.mubr.f32.gmra.mrb[78].mxu0 %v911_v15 }
 0x192   : > { %1571 = vmatprep.mubr.f32.mxu0 %v916_v16 }
 0x193   : > { %2464 = vmatmul.mubr.f32.gmra.mrb[78].mxu1 %v911_v15  ;;  %v785_v15 = vld [vmem:[%s5389_s6 + $0xf0] sm:$0xff] }
 0x194   : > { %2469 = vmatprep.mubr.f32.mxu1 %v916_v16  ;;  %v790_v16 = vld [vmem:[%s5389_s6 + $0x118] sm:$0xff] }
 0x195   : > { %1572 = vmatmul.mubr.f32.gmra.mrb[80].mxu0 %v915_v17 }
 0x196   : > { %1577 = vmatprep.mubr.f32.mxu0 %v920_v18 }
 0x197   : > { %2470 = vmatmul.mubr.f32.gmra.mrb[80].mxu1 %v915_v17  ;;  %v789_v17 = vld [vmem:[%s5389_s6 + $0x110] sm:$0xff] }
 0x198   : > { %2475 = vmatprep.mubr.f32.mxu1 %v920_v18  ;;  %v794_v18 = vld [vmem:[%s5389_s6 + $0x138] sm:$0xff] }
 0x199   : > { %1578 = vmatmul.mubr.f32.gmra.mrb[82].mxu0 %v919_v19 }
 0x19a   : > { %1583 = vmatprep.mubr.f32.mxu0 %v924_v20 }
 0x19b   : > { %2476 = vmatmul.mubr.f32.gmra.mrb[82].mxu1 %v919_v19  ;;  %v793_v19 = vld [vmem:[%s5389_s6 + $0x130] sm:$0xff] }
 0x19c   : > { %2481 = vmatprep.mubr.f32.mxu1 %v924_v20  ;;  %v798_v20 = vld [vmem:[%s5389_s6 + $0x158] sm:$0xff] }
 0x19d   : > { %1584 = vmatmul.mubr.f32.gmra.mrb[84].mxu0 %v923_v21 }
 0x19e   : > { %1589 = vmatprep.mubr.f32.mxu0 %v928_v22 }
 0x19f   : > { %2482 = vmatmul.mubr.f32.gmra.mrb[84].mxu1 %v923_v21  ;;  %v797_v21 = vld [vmem:[%s5389_s6 + $0x150] sm:$0xff] }
 0x1a0   : > { %2487 = vmatprep.mubr.f32.mxu1 %v928_v22  ;;  %v802_v22 = vld [vmem:[%s5389_s6 + $0x178] sm:$0xff] }
 0x1a1   : > { %1590 = vmatmul.mubr.f32.gmra.mrb[86].mxu0 %v927_v23 }
 0x1a2   : > { %1595 = vmatprep.mubr.f32.mxu0 %v932_v24 }
 0x1a3   : > { %2488 = vmatmul.mubr.f32.gmra.mrb[86].mxu1 %v927_v23  ;;  %v801_v23 = vld [vmem:[%s5389_s6 + $0x170] sm:$0xff] }
 0x1a4   : > { %2493 = vmatprep.mubr.f32.mxu1 %v932_v24  ;;  %v806_v24 = vld [vmem:[%s5389_s6 + $0x198] sm:$0xff] }
 0x1a5   : > { %1596 = vmatmul.mubr.f32.gmra.mrb[88].mxu0 %v931_v25 }
 0x1a6   : > { %1601 = vmatprep.mubr.f32.mxu0 %v936_v26 }
 0x1a7   : > { %2494 = vmatmul.mubr.f32.gmra.mrb[88].mxu1 %v931_v25  ;;  %v805_v25 = vld [vmem:[%s5389_s6 + $0x190] sm:$0xff] }
 0x1a8   : > { %2499 = vmatprep.mubr.f32.mxu1 %v936_v26  ;;  %v810_v26 = vld [vmem:[%s5389_s6 + $0x1b8] sm:$0xff] }
 0x1a9   : > { %1602 = vmatmul.mubr.f32.gmra.mrb[90].mxu0 %v935_v27 }
 0x1aa   : > { %1607 = vmatprep.mubr.f32.mxu0 %v940_v28 }
 0x1ab   : > { %2500 = vmatmul.mubr.f32.gmra.mrb[90].mxu1 %v935_v27  ;;  %v809_v27 = vld [vmem:[%s5389_s6 + $0x1b0] sm:$0xff] }
 0x1ac   : > { %2505 = vmatprep.mubr.f32.mxu1 %v940_v28  ;;  %v814_v28 = vld [vmem:[%s5389_s6 + $0x1d8] sm:$0xff] }
 0x1ad   : > { %1608 = vmatmul.mubr.f32.gmra.mrb[92].mxu0 %v939_v29 }
 0x1ae   : > { %1613 = vmatprep.mubr.f32.mxu0 %v944_v30 }
 0x1af   : > { %2506 = vmatmul.mubr.f32.gmra.mrb[92].mxu1 %v939_v29  ;;  %v813_v29 = vld [vmem:[%s5389_s6 + $0x1d0] sm:$0xff] }
 0x1b0   : > { %2511 = vmatprep.mubr.f32.mxu1 %v944_v30  ;;  %v818_v30 = vld [vmem:[%s5389_s6 + $0x1f8] sm:$0xff] }
 0x1b1   : > { %1614 = vmatmul.mubr.f32.gmra.mrb[94].mxu0 %v943_v31 }
 0x1b2   : > { %1619 = vmatprep.mubr.f32.mxu0 %v948_v32 }
 0x1b3   : > { %2512 = vmatmul.mubr.f32.gmra.mrb[94].mxu1 %v943_v31  ;;  %v817_v31 = vld [vmem:[%s5389_s6 + $0x1f0] sm:$0xff] }
 0x1b4   : > { %2517 = vmatprep.mubr.f32.mxu1 %v948_v32  ;;  %v822_v32 = vld [vmem:[%s5389_s6 + $0x218] sm:$0xff] }
 0x1b5   : > { %1620 = vmatmul.mubr.f32.gmra.mrb[96].mxu0 %v947_v33 }
 0x1b6   : > { %1625 = vmatprep.mubr.f32.mxu0 %v952_v34 }
 0x1b7   : > { %2518 = vmatmul.mubr.f32.gmra.mrb[96].mxu1 %v947_v33  ;;  %v821_v33 = vld [vmem:[%s5389_s6 + $0x210] sm:$0xff] }
 0x1b8   : > { %2523 = vmatprep.mubr.f32.mxu1 %v952_v34  ;;  %v826_v34 = vld [vmem:[%s5389_s6 + $0x238] sm:$0xff] }
 0x1b9   : > { %1626 = vmatmul.mubr.f32.gmra.mrb[98].mxu0 %v951_v35 }
 0x1ba   : > { %1631 = vmatprep.mubr.f32.mxu0 %v956_v36 }
 0x1bb   : > { %2524 = vmatmul.mubr.f32.gmra.mrb[98].mxu1 %v951_v35  ;;  %v825_v35 = vld [vmem:[%s5389_s6 + $0x230] sm:$0xff] }
 0x1bc   : > { %2529 = vmatprep.mubr.f32.mxu1 %v956_v36  ;;  %v830_v36 = vld [vmem:[%s5389_s6 + $0x258] sm:$0xff] }
 0x1bd   : > { %1632 = vmatmul.mubr.f32.gmra.mrb[100].mxu0 %v955_v37 }
 0x1be   : > { %1637 = vmatprep.mubr.f32.mxu0 %v960_v38 }
 0x1bf   : > { %2530 = vmatmul.mubr.f32.gmra.mrb[100].mxu1 %v955_v37  ;;  %v829_v37 = vld [vmem:[%s5389_s6 + $0x250] sm:$0xff] }
 0x1c0   : > { %2535 = vmatprep.mubr.f32.mxu1 %v960_v38  ;;  %v834_v38 = vld [vmem:[%s5389_s6 + $0x278] sm:$0xff] }
 0x1c1   : > { %1638 = vmatmul.mubr.f32.gmra.mrb[102].mxu0 %v959_v39 }
 0x1c2   : > { %1643 = vmatprep.mubr.f32.mxu0 %v964_v40 }
 0x1c3   : > { %2536 = vmatmul.mubr.f32.gmra.mrb[102].mxu1 %v959_v39  ;;  %v833_v39 = vld [vmem:[%s5389_s6 + $0x270] sm:$0xff] }
 0x1c4   : > { %2541 = vmatprep.mubr.f32.mxu1 %v964_v40  ;;  %v838_v40 = vld [vmem:[%s5389_s6 + $0x298] sm:$0xff] }
 0x1c5   : > { %1644 = vmatmul.mubr.f32.gmra.mrb[104].mxu0 %v963_v41 }
 0x1c6   : > { %1649 = vmatprep.mubr.f32.mxu0 %v968_v42 }
 0x1c7   : > { %2542 = vmatmul.mubr.f32.gmra.mrb[104].mxu1 %v963_v41  ;;  %v837_v41 = vld [vmem:[%s5389_s6 + $0x290] sm:$0xff] }
 0x1c8   : > { %2547 = vmatprep.mubr.f32.mxu1 %v968_v42  ;;  %v842_v42 = vld [vmem:[%s5389_s6 + $0x2b8] sm:$0xff] }
 0x1c9   : > { %1650 = vmatmul.mubr.f32.gmra.mrb[106].mxu0 %v967_v43 }
 0x1ca   : > { %1655 = vmatprep.mubr.f32.mxu0 %v972_v44 }
 0x1cb   : > { %2548 = vmatmul.mubr.f32.gmra.mrb[106].mxu1 %v967_v43  ;;  %v841_v43 = vld [vmem:[%s5389_s6 + $0x2b0] sm:$0xff] }
 0x1cc   : > { %2553 = vmatprep.mubr.f32.mxu1 %v972_v44  ;;  %v846_v44 = vld [vmem:[%s5389_s6 + $0x2d8] sm:$0xff] }
 0x1cd   : > { %1656 = vmatmul.mubr.f32.gmra.mrb[108].mxu0 %v971_v45 }
 0x1ce   : > { %1661 = vmatprep.mubr.f32.mxu0 %v976_v46 }
 0x1cf   : > { %2554 = vmatmul.mubr.f32.gmra.mrb[108].mxu1 %v971_v45  ;;  %v845_v45 = vld [vmem:[%s5389_s6 + $0x2d0] sm:$0xff] }
 0x1d0   : > { %2559 = vmatprep.mubr.f32.mxu1 %v976_v46  ;;  %v850_v46 = vld [vmem:[%s5389_s6 + $0x2f8] sm:$0xff] }
 0x1d1   : > { %1662 = vmatmul.mubr.f32.gmra.mrb[110].mxu0 %v975_v47 }
 0x1d2   : > { %1667 = vmatprep.mubr.f32.mxu0 %v980_v48 }
 0x1d3   : > { %2560 = vmatmul.mubr.f32.gmra.mrb[110].mxu1 %v975_v47  ;;  %v849_v47 = vld [vmem:[%s5389_s6 + $0x2f0] sm:$0xff] }
 0x1d4   : > { %2565 = vmatprep.mubr.f32.mxu1 %v980_v48  ;;  %v854_v48 = vld [vmem:[%s5389_s6 + $0x318] sm:$0xff] }
 0x1d5   : > { %1668 = vmatmul.mubr.f32.gmra.mrb[112].mxu0 %v979_v49 }
 0x1d6   : > { %1673 = vmatprep.mubr.f32.mxu0 %v984_v50 }
 0x1d7   : > { %2566 = vmatmul.mubr.f32.gmra.mrb[112].mxu1 %v979_v49  ;;  %v853_v49 = vld [vmem:[%s5389_s6 + $0x310] sm:$0xff] }
 0x1d8   : > { %2571 = vmatprep.mubr.f32.mxu1 %v984_v50  ;;  %v858_v50 = vld [vmem:[%s5389_s6 + $0x338] sm:$0xff] }
 0x1d9   : > { %1674 = vmatmul.mubr.f32.gmra.mrb[114].mxu0 %v983_v51 }
 0x1da   : > { %1679 = vmatprep.mubr.f32.mxu0 %v988_v52 }
 0x1db   : > { %2572 = vmatmul.mubr.f32.gmra.mrb[114].mxu1 %v983_v51  ;;  %v857_v51 = vld [vmem:[%s5389_s6 + $0x330] sm:$0xff] }
 0x1dc   : > { %2577 = vmatprep.mubr.f32.mxu1 %v988_v52  ;;  %v862_v52 = vld [vmem:[%s5389_s6 + $0x358] sm:$0xff] }
 0x1dd   : > { %1680 = vmatmul.mubr.f32.gmra.mrb[116].mxu0 %v987_v53 }
 0x1de   : > { %1685 = vmatprep.mubr.f32.mxu0 %v992_v54 }
 0x1df   : > { %2578 = vmatmul.mubr.f32.gmra.mrb[116].mxu1 %v987_v53  ;;  %v861_v53 = vld [vmem:[%s5389_s6 + $0x350] sm:$0xff] }
 0x1e0   : > { %2583 = vmatprep.mubr.f32.mxu1 %v992_v54  ;;  %v866_v54 = vld [vmem:[%s5389_s6 + $0x378] sm:$0xff] }
 0x1e1   : > { %1686 = vmatmul.mubr.f32.gmra.mrb[118].mxu0 %v991_v55 }
 0x1e2   : > { %1691 = vmatprep.mubr.f32.mxu0 %v996_v56 }
 0x1e3   : > { %2584 = vmatmul.mubr.f32.gmra.mrb[118].mxu1 %v991_v55  ;;  %v865_v55 = vld [vmem:[%s5389_s6 + $0x370] sm:$0xff] }
 0x1e4   : > { %2589 = vmatprep.mubr.f32.mxu1 %v996_v56  ;;  %v870_v56 = vld [vmem:[%s5389_s6 + $0x398] sm:$0xff] }
 0x1e5   : > { %1692 = vmatmul.mubr.f32.gmra.mrb[120].mxu0 %v995_v57 }
 0x1e6   : > { %1697 = vmatprep.mubr.f32.mxu0 %v1000_v58 }
 0x1e7   : > { %2590 = vmatmul.mubr.f32.gmra.mrb[120].mxu1 %v995_v57  ;;  %v869_v57 = vld [vmem:[%s5389_s6 + $0x390] sm:$0xff] }
 0x1e8   : > { %2595 = vmatprep.mubr.f32.mxu1 %v1000_v58  ;;  %v874_v58 = vld [vmem:[%s5389_s6 + $0x3b8] sm:$0xff] }
 0x1e9   : > { %1698 = vmatmul.mubr.f32.gmra.mrb[122].mxu0 %v999_v59 }
 0x1ea   : > { %1703 = vmatprep.mubr.f32.mxu0 %v1004_v60 }
 0x1eb   : > { %2596 = vmatmul.mubr.f32.gmra.mrb[122].mxu1 %v999_v59  ;;  %v873_v59 = vld [vmem:[%s5389_s6 + $0x3b0] sm:$0xff] }
 0x1ec   : > { %2601 = vmatprep.mubr.f32.mxu1 %v1004_v60  ;;  %v878_v60 = vld [vmem:[%s5389_s6 + $0x3d8] sm:$0xff] }
 0x1ed   : > { %1704 = vmatmul.mubr.f32.gmra.mrb[124].mxu0 %v1003_v61 }
 0x1ee   : > { %1709 = vmatprep.mubr.f32.mxu0 %v1008_v62 }
 0x1ef   : > { %2602 = vmatmul.mubr.f32.gmra.mrb[124].mxu1 %v1003_v61  ;;  %v877_v61 = vld [vmem:[%s5389_s6 + $0x3d0] sm:$0xff] }
 0x1f0   : > { %2607 = vmatprep.mubr.f32.mxu1 %v1008_v62  ;;  %v882_v62 = vld [vmem:[%s5389_s6 + $0x3f8] sm:$0xff] }
 0x1f1   : > { %1710 = vmatmul.mubr.f32.gmra.mrb[126].mxu0 %v1007_v63 }
 0x1f2   : > { %1780 = vmatprep.mubr.f32.mxu0 %v758_v0 }
 0x1f3   : > { %2608 = vmatmul.mubr.f32.gmra.mrb[126].mxu1 %v1007_v63  ;;  %v881_v63 = vld [vmem:[%s5389_s6 + $0x3f0] sm:$0xff] }
 0x1f4   : > { %2678 = vmatprep.mubr.f32.mxu1 %v758_v0  ;;  %v886_v0 = vld [vmem:[%s5389_s6 + $0x418] sm:$0xff] }
 0x1f5   : > { %1781 = vmatmul.mubr.f32.vlgmr.msra.gmra.mrb[0].mxu0 %v757_v1 }
 0x1f6   : > { %1786 = vmatprep.mubr.f32.mxu0 %v762_v2 }
 0x1f7   : > { %2679 = vmatmul.mubr.f32.vlgmr.msra.gmra.mrb[0].mxu1 %v757_v1  ;;  %v885_v1 = vld [vmem:[%s5389_s6 + $0x410] sm:$0xff] }
 0x1f8   : > { %2684 = vmatprep.mubr.f32.mxu1 %v762_v2  ;;  %v890_v2 = vld [vmem:[%s5389_s6 + $0x438] sm:$0xff] }
 0x1f9   : > { %1787 = vmatmul.mubr.f32.gmra.mrb[2].mxu0 %v761_v3 }
 0x1fa   : > { %1792 = vmatprep.mubr.f32.mxu0 %v766_v4 }
 0x1fb   : > { %2685 = vmatmul.mubr.f32.gmra.mrb[2].mxu1 %v761_v3  ;;  %v889_v3 = vld [vmem:[%s5389_s6 + $0x430] sm:$0xff] }
 0x1fc   : > { %2690 = vmatprep.mubr.f32.mxu1 %v766_v4  ;;  %v894_v4 = vld [vmem:[%s5389_s6 + $0x458] sm:$0xff] }
 0x1fd   : > { %1793 = vmatmul.mubr.f32.gmra.mrb[4].mxu0 %v765_v5 }
 0x1fe   : > { %1798 = vmatprep.mubr.f32.mxu0 %v770_v6 }
 0x1ff   : > { %2691 = vmatmul.mubr.f32.gmra.mrb[4].mxu1 %v765_v5  ;;  %v893_v5 = vld [vmem:[%s5389_s6 + $0x450] sm:$0xff] }
 0x200   : > { %2696 = vmatprep.mubr.f32.mxu1 %v770_v6  ;;  %v898_v6 = vld [vmem:[%s5389_s6 + $0x478] sm:$0xff] }
 0x201   : > { %1799 = vmatmul.mubr.f32.gmra.mrb[6].mxu0 %v769_v7 }
 0x202   : > { %1804 = vmatprep.mubr.f32.mxu0 %v774_v8 }
 0x203   : > { %2697 = vmatmul.mubr.f32.gmra.mrb[6].mxu1 %v769_v7  ;;  %v897_v7 = vld [vmem:[%s5389_s6 + $0x470] sm:$0xff] }
 0x204   : > { %2702 = vmatprep.mubr.f32.mxu1 %v774_v8  ;;  %v902_v8 = vld [vmem:[%s5389_s6 + $0x498] sm:$0xff] }
 0x205   : > { %1805 = vmatmul.mubr.f32.gmra.mrb[8].mxu0 %v773_v9 }
 0x206   : > { %1810 = vmatprep.mubr.f32.mxu0 %v778_v10 }
 0x207   : > { %2703 = vmatmul.mubr.f32.gmra.mrb[8].mxu1 %v773_v9  ;;  %v901_v9 = vld [vmem:[%s5389_s6 + $0x490] sm:$0xff] }
 0x208   : > { %2708 = vmatprep.mubr.f32.mxu1 %v778_v10  ;;  %v906_v10 = vld [vmem:[%s5389_s6 + $0x4b8] sm:$0xff] }
 0x209   : > { %1811 = vmatmul.mubr.f32.gmra.mrb[10].mxu0 %v777_v11 }
 0x20a   : > { %1816 = vmatprep.mubr.f32.mxu0 %v782_v12 }
 0x20b   : > { %2709 = vmatmul.mubr.f32.gmra.mrb[10].mxu1 %v777_v11  ;;  %v905_v11 = vld [vmem:[%s5389_s6 + $0x4b0] sm:$0xff] }
 0x20c   : > { %2714 = vmatprep.mubr.f32.mxu1 %v782_v12  ;;  %v910_v12 = vld [vmem:[%s5389_s6 + $0x4d8] sm:$0xff] }
 0x20d   : > { %1817 = vmatmul.mubr.f32.gmra.mrb[12].mxu0 %v781_v13 }
 0x20e   : > { %1822 = vmatprep.mubr.f32.mxu0 %v786_v14 }
 0x20f   : > { %2715 = vmatmul.mubr.f32.gmra.mrb[12].mxu1 %v781_v13  ;;  %v909_v13 = vld [vmem:[%s5389_s6 + $0x4d0] sm:$0xff] }
 0x210   : > { %2720 = vmatprep.mubr.f32.mxu1 %v786_v14  ;;  %v914_v14 = vld [vmem:[%s5389_s6 + $0x4f8] sm:$0xff] }
 0x211   : > { %1823 = vmatmul.mubr.f32.gmra.mrb[14].mxu0 %v785_v15 }
 0x212   : > { %1828 = vmatprep.mubr.f32.mxu0 %v790_v16 }
 0x213   : > { %2721 = vmatmul.mubr.f32.gmra.mrb[14].mxu1 %v785_v15  ;;  %v913_v15 = vld [vmem:[%s5389_s6 + $0x4f0] sm:$0xff] }
 0x214   : > { %2726 = vmatprep.mubr.f32.mxu1 %v790_v16  ;;  %v918_v16 = vld [vmem:[%s5389_s6 + $0x518] sm:$0xff] }
 0x215   : > { %1829 = vmatmul.mubr.f32.gmra.mrb[16].mxu0 %v789_v17 }
 0x216   : > { %1834 = vmatprep.mubr.f32.mxu0 %v794_v18 }
 0x217   : > { %2727 = vmatmul.mubr.f32.gmra.mrb[16].mxu1 %v789_v17  ;;  %v917_v17 = vld [vmem:[%s5389_s6 + $0x510] sm:$0xff] }
 0x218   : > { %2732 = vmatprep.mubr.f32.mxu1 %v794_v18  ;;  %v922_v18 = vld [vmem:[%s5389_s6 + $0x538] sm:$0xff] }
 0x219   : > { %1835 = vmatmul.mubr.f32.gmra.mrb[18].mxu0 %v793_v19 }
 0x21a   : > { %1840 = vmatprep.mubr.f32.mxu0 %v798_v20 }
 0x21b   : > { %2733 = vmatmul.mubr.f32.gmra.mrb[18].mxu1 %v793_v19  ;;  %v921_v19 = vld [vmem:[%s5389_s6 + $0x530] sm:$0xff] }
 0x21c   : > { %2738 = vmatprep.mubr.f32.mxu1 %v798_v20  ;;  %v926_v20 = vld [vmem:[%s5389_s6 + $0x558] sm:$0xff] }
 0x21d   : > { %1841 = vmatmul.mubr.f32.gmra.mrb[20].mxu0 %v797_v21 }
 0x21e   : > { %1846 = vmatprep.mubr.f32.mxu0 %v802_v22 }
 0x21f   : > { %2739 = vmatmul.mubr.f32.gmra.mrb[20].mxu1 %v797_v21  ;;  %v925_v21 = vld [vmem:[%s5389_s6 + $0x550] sm:$0xff] }
 0x220   : > { %2744 = vmatprep.mubr.f32.mxu1 %v802_v22  ;;  %v930_v22 = vld [vmem:[%s5389_s6 + $0x578] sm:$0xff] }
 0x221   : > { %1847 = vmatmul.mubr.f32.gmra.mrb[22].mxu0 %v801_v23 }
 0x222   : > { %1852 = vmatprep.mubr.f32.mxu0 %v806_v24 }
 0x223   : > { %2745 = vmatmul.mubr.f32.gmra.mrb[22].mxu1 %v801_v23  ;;  %v929_v23 = vld [vmem:[%s5389_s6 + $0x570] sm:$0xff] }
 0x224   : > { %2750 = vmatprep.mubr.f32.mxu1 %v806_v24  ;;  %v934_v24 = vld [vmem:[%s5389_s6 + $0x598] sm:$0xff] }
 0x225   : > { %1853 = vmatmul.mubr.f32.gmra.mrb[24].mxu0 %v805_v25 }
 0x226   : > { %1858 = vmatprep.mubr.f32.mxu0 %v810_v26 }
 0x227   : > { %2751 = vmatmul.mubr.f32.gmra.mrb[24].mxu1 %v805_v25  ;;  %v933_v25 = vld [vmem:[%s5389_s6 + $0x590] sm:$0xff] }
 0x228   : > { %2756 = vmatprep.mubr.f32.mxu1 %v810_v26  ;;  %v938_v26 = vld [vmem:[%s5389_s6 + $0x5b8] sm:$0xff] }
 0x229   : > { %1859 = vmatmul.mubr.f32.gmra.mrb[26].mxu0 %v809_v27 }
 0x22a   : > { %1864 = vmatprep.mubr.f32.mxu0 %v814_v28 }
 0x22b   : > { %2757 = vmatmul.mubr.f32.gmra.mrb[26].mxu1 %v809_v27  ;;  %v937_v27 = vld [vmem:[%s5389_s6 + $0x5b0] sm:$0xff] }
 0x22c   : > { %2762 = vmatprep.mubr.f32.mxu1 %v814_v28  ;;  %v942_v28 = vld [vmem:[%s5389_s6 + $0x5d8] sm:$0xff] }
 0x22d   : > { %1865 = vmatmul.mubr.f32.gmra.mrb[28].mxu0 %v813_v29 }
 0x22e   : > { %1870 = vmatprep.mubr.f32.mxu0 %v818_v30 }
 0x22f   : > { %2763 = vmatmul.mubr.f32.gmra.mrb[28].mxu1 %v813_v29  ;;  %v941_v29 = vld [vmem:[%s5389_s6 + $0x5d0] sm:$0xff] }
 0x230   : > { %2768 = vmatprep.mubr.f32.mxu1 %v818_v30  ;;  %v946_v30 = vld [vmem:[%s5389_s6 + $0x5f8] sm:$0xff] }
 0x231   : > { %1871 = vmatmul.mubr.f32.gmra.mrb[30].mxu0 %v817_v31 }
 0x232   : > { %1876 = vmatprep.mubr.f32.mxu0 %v822_v32 }
 0x233   : > { %2769 = vmatmul.mubr.f32.gmra.mrb[30].mxu1 %v817_v31  ;;  %v945_v31 = vld [vmem:[%s5389_s6 + $0x5f0] sm:$0xff] }
 0x234   : > { %2774 = vmatprep.mubr.f32.mxu1 %v822_v32  ;;  %v950_v32 = vld [vmem:[%s5389_s6 + $0x618] sm:$0xff] }
 0x235   : > { %1877 = vmatmul.mubr.f32.gmra.mrb[32].mxu0 %v821_v33 }
 0x236   : > { %1882 = vmatprep.mubr.f32.mxu0 %v826_v34 }
 0x237   : > { %2775 = vmatmul.mubr.f32.gmra.mrb[32].mxu1 %v821_v33  ;;  %v949_v33 = vld [vmem:[%s5389_s6 + $0x610] sm:$0xff] }
 0x238   : > { %2780 = vmatprep.mubr.f32.mxu1 %v826_v34  ;;  %v954_v34 = vld [vmem:[%s5389_s6 + $0x638] sm:$0xff] }
 0x239   : > { %1883 = vmatmul.mubr.f32.gmra.mrb[34].mxu0 %v825_v35 }
 0x23a   : > { %1888 = vmatprep.mubr.f32.mxu0 %v830_v36 }
 0x23b   : > { %2781 = vmatmul.mubr.f32.gmra.mrb[34].mxu1 %v825_v35  ;;  %v953_v35 = vld [vmem:[%s5389_s6 + $0x630] sm:$0xff] }
 0x23c   : > { %2786 = vmatprep.mubr.f32.mxu1 %v830_v36  ;;  %v958_v36 = vld [vmem:[%s5389_s6 + $0x658] sm:$0xff] }
 0x23d   : > { %1889 = vmatmul.mubr.f32.gmra.mrb[36].mxu0 %v829_v37 }
 0x23e   : > { %1894 = vmatprep.mubr.f32.mxu0 %v834_v38 }
 0x23f   : > { %2787 = vmatmul.mubr.f32.gmra.mrb[36].mxu1 %v829_v37  ;;  %v957_v37 = vld [vmem:[%s5389_s6 + $0x650] sm:$0xff] }
 0x240   : > { %2792 = vmatprep.mubr.f32.mxu1 %v834_v38  ;;  %v962_v38 = vld [vmem:[%s5389_s6 + $0x678] sm:$0xff] }
 0x241   : > { %1895 = vmatmul.mubr.f32.gmra.mrb[38].mxu0 %v833_v39 }
 0x242   : > { %1900 = vmatprep.mubr.f32.mxu0 %v838_v40 }
 0x243   : > { %2793 = vmatmul.mubr.f32.gmra.mrb[38].mxu1 %v833_v39  ;;  %v961_v39 = vld [vmem:[%s5389_s6 + $0x670] sm:$0xff] }
 0x244   : > { %2798 = vmatprep.mubr.f32.mxu1 %v838_v40  ;;  %v966_v40 = vld [vmem:[%s5389_s6 + $0x698] sm:$0xff] }
 0x245   : > { %1901 = vmatmul.mubr.f32.gmra.mrb[40].mxu0 %v837_v41 }
 0x246   : > { %1906 = vmatprep.mubr.f32.mxu0 %v842_v42 }
 0x247   : > { %2799 = vmatmul.mubr.f32.gmra.mrb[40].mxu1 %v837_v41  ;;  %v965_v41 = vld [vmem:[%s5389_s6 + $0x690] sm:$0xff] }
 0x248   : > { %2804 = vmatprep.mubr.f32.mxu1 %v842_v42  ;;  %v970_v42 = vld [vmem:[%s5389_s6 + $0x6b8] sm:$0xff] }
 0x249   : > { %1907 = vmatmul.mubr.f32.gmra.mrb[42].mxu0 %v841_v43 }
 0x24a   : > { %1912 = vmatprep.mubr.f32.mxu0 %v846_v44 }
 0x24b   : > { %2805 = vmatmul.mubr.f32.gmra.mrb[42].mxu1 %v841_v43  ;;  %v969_v43 = vld [vmem:[%s5389_s6 + $0x6b0] sm:$0xff] }
 0x24c   : > { %2810 = vmatprep.mubr.f32.mxu1 %v846_v44  ;;  %v974_v44 = vld [vmem:[%s5389_s6 + $0x6d8] sm:$0xff] }
 0x24d   : > { %1913 = vmatmul.mubr.f32.gmra.mrb[44].mxu0 %v845_v45 }
 0x24e   : > { %1918 = vmatprep.mubr.f32.mxu0 %v850_v46 }
 0x24f   : > { %2811 = vmatmul.mubr.f32.gmra.mrb[44].mxu1 %v845_v45 }
 0x250   : > { %2816 = vmatprep.mubr.f32.mxu1 %v850_v46 }
 0x251   : > { %1919 = vmatmul.mubr.f32.gmra.mrb[46].mxu0 %v849_v47 }
 0x252   : > { %1924 = vmatprep.mubr.f32.mxu0 %v854_v48 }
 0x253   : > { %2817 = vmatmul.mubr.f32.gmra.mrb[46].mxu1 %v849_v47 }
 0x254   : > { %2822 = vmatprep.mubr.f32.mxu1 %v854_v48 }
 0x255   : > { %1925 = vmatmul.mubr.f32.gmra.mrb[48].mxu0 %v853_v49 }
 0x256   : > { %1930 = vmatprep.mubr.f32.mxu0 %v858_v50 }
 0x257   : > { %2823 = vmatmul.mubr.f32.gmra.mrb[48].mxu1 %v853_v49  ;;  %v973_v49 = vld [vmem:[%s5389_s6 + $0x6d0] sm:$0xff] }
 0x258   : > { %2828 = vmatprep.mubr.f32.mxu1 %v858_v50  ;;  %v978_v50 = vld [vmem:[%s5389_s6 + $0x6f8] sm:$0xff] }
 0x259   : > { %1931 = vmatmul.mubr.f32.gmra.mrb[50].mxu0 %v857_v51 }
 0x25a   : > { %1936 = vmatprep.mubr.f32.mxu0 %v862_v52 }
 0x25b   : > { %2829 = vmatmul.mubr.f32.gmra.mrb[50].mxu1 %v857_v51 }
 0x25c   : > { %2834 = vmatprep.mubr.f32.mxu1 %v862_v52 }
 0x25d   : > { %1937 = vmatmul.mubr.f32.gmra.mrb[52].mxu0 %v861_v53 }
 0x25e   : > { %1942 = vmatprep.mubr.f32.mxu0 %v866_v54 }
 0x25f   : > { %2835 = vmatmul.mubr.f32.gmra.mrb[52].mxu1 %v861_v53 }
 0x260   : > { %2840 = vmatprep.mubr.f32.mxu1 %v866_v54 }
 0x261   : > { %1943 = vmatmul.mubr.f32.gmra.mrb[54].mxu0 %v865_v55 }
 0x262   : > { %1948 = vmatprep.mubr.f32.mxu0 %v870_v56 }
 0x263   : > { %2841 = vmatmul.mubr.f32.gmra.mrb[54].mxu1 %v865_v55  ;;  %v977_v55 = vld [vmem:[%s5389_s6 + $0x6f0] sm:$0xff] }
 0x264   : > { %2846 = vmatprep.mubr.f32.mxu1 %v870_v56  ;;  %v982_v56 = vld [vmem:[%s5389_s6 + $0x718] sm:$0xff] }
 0x265   : > { %1949 = vmatmul.mubr.f32.gmra.mrb[56].mxu0 %v869_v57 }
 0x266   : > { %1954 = vmatprep.mubr.f32.mxu0 %v874_v58 }
 0x267   : > { %2847 = vmatmul.mubr.f32.gmra.mrb[56].mxu1 %v869_v57 }
 0x268   : > { %2852 = vmatprep.mubr.f32.mxu1 %v874_v58 }
 0x269   : > { %1955 = vmatmul.mubr.f32.gmra.mrb[58].mxu0 %v873_v59 }
 0x26a   : > { %1960 = vmatprep.mubr.f32.mxu0 %v878_v60 }
 0x26b   : > { %2853 = vmatmul.mubr.f32.gmra.mrb[58].mxu1 %v873_v59 }
 0x26c   : > { %2858 = vmatprep.mubr.f32.mxu1 %v878_v60 }
 0x26d   : > { %1961 = vmatmul.mubr.f32.gmra.mrb[60].mxu0 %v877_v61 }
 0x26e   : > { %1966 = vmatprep.mubr.f32.mxu0 %v882_v62 }
 0x26f   : > { %2859 = vmatmul.mubr.f32.gmra.mrb[60].mxu1 %v877_v61  ;;  %v981_v61 = vld [vmem:[%s5389_s6 + $0x710] sm:$0xff] }
 0x270   : > { %2864 = vmatprep.mubr.f32.mxu1 %v882_v62  ;;  %v986_v62 = vld [vmem:[%s5389_s6 + $0x738] sm:$0xff] }
 0x271   : > { %1967 = vmatmul.mubr.f32.gmra.mrb[62].mxu0 %v881_v63 }
 0x272   : > { %1972 = vmatprep.mubr.f32.mxu0 %v886_v0 }
 0x273   : > { %2865 = vmatmul.mubr.f32.gmra.mrb[62].mxu1 %v881_v63 }
 0x274   : > { %2870 = vmatprep.mubr.f32.mxu1 %v886_v0 }
 0x275   : > { %1973 = vmatmul.mubr.f32.gmra.mrb[64].mxu0 %v885_v1 }
 0x276   : > { %1978 = vmatprep.mubr.f32.mxu0 %v890_v2 }
 0x277   : > { %2871 = vmatmul.mubr.f32.gmra.mrb[64].mxu1 %v885_v1 }
 0x278   : > { %2876 = vmatprep.mubr.f32.mxu1 %v890_v2 }
 0x279   : > { %1979 = vmatmul.mubr.f32.gmra.mrb[66].mxu0 %v889_v3 }
 0x27a   : > { %1984 = vmatprep.mubr.f32.mxu0 %v894_v4 }
 0x27b   : > { %2877 = vmatmul.mubr.f32.gmra.mrb[66].mxu1 %v889_v3  ;;  %v985_v3 = vld [vmem:[%s5389_s6 + $0x730] sm:$0xff] }
 0x27c   : > { %2882 = vmatprep.mubr.f32.mxu1 %v894_v4  ;;  %v990_v4 = vld [vmem:[%s5389_s6 + $0x758] sm:$0xff] }
 0x27d   : > { %1985 = vmatmul.mubr.f32.gmra.mrb[68].mxu0 %v893_v5 }
 0x27e   : > { %1990 = vmatprep.mubr.f32.mxu0 %v898_v6 }
 0x27f   : > { %2883 = vmatmul.mubr.f32.gmra.mrb[68].mxu1 %v893_v5 }
 0x280   : > { %2888 = vmatprep.mubr.f32.mxu1 %v898_v6 }
 0x281   : > { %1991 = vmatmul.mubr.f32.gmra.mrb[70].mxu0 %v897_v7 }
 0x282   : > { %1996 = vmatprep.mubr.f32.mxu0 %v902_v8 }
 0x283   : > { %2889 = vmatmul.mubr.f32.gmra.mrb[70].mxu1 %v897_v7 }
 0x284   : > { %2894 = vmatprep.mubr.f32.mxu1 %v902_v8 }
 0x285   : > { %1997 = vmatmul.mubr.f32.gmra.mrb[72].mxu0 %v901_v9 }
 0x286   : > { %2002 = vmatprep.mubr.f32.mxu0 %v906_v10 }
 0x287   : > { %2895 = vmatmul.mubr.f32.gmra.mrb[72].mxu1 %v901_v9  ;;  %v989_v9 = vld [vmem:[%s5389_s6 + $0x750] sm:$0xff] }
 0x288   : > { %2900 = vmatprep.mubr.f32.mxu1 %v906_v10  ;;  %v994_v10 = vld [vmem:[%s5389_s6 + $0x778] sm:$0xff] }
 0x289   : > { %2003 = vmatmul.mubr.f32.gmra.mrb[74].mxu0 %v905_v11 }
 0x28a   : > { %2008 = vmatprep.mubr.f32.mxu0 %v910_v12 }
 0x28b   : > { %2901 = vmatmul.mubr.f32.gmra.mrb[74].mxu1 %v905_v11 }
 0x28c   : > { %2906 = vmatprep.mubr.f32.mxu1 %v910_v12 }
 0x28d   : > { %2009 = vmatmul.mubr.f32.gmra.mrb[76].mxu0 %v909_v13 }
 0x28e   : > { %2014 = vmatprep.mubr.f32.mxu0 %v914_v14 }
 0x28f   : > { %2907 = vmatmul.mubr.f32.gmra.mrb[76].mxu1 %v909_v13 }
 0x290   : > { %2912 = vmatprep.mubr.f32.mxu1 %v914_v14 }
 0x291   : > { %2015 = vmatmul.mubr.f32.gmra.mrb[78].mxu0 %v913_v15 }
 0x292   : > { %2020 = vmatprep.mubr.f32.mxu0 %v918_v16 }
 0x293   : > { %2913 = vmatmul.mubr.f32.gmra.mrb[78].mxu1 %v913_v15  ;;  %v993_v15 = vld [vmem:[%s5389_s6 + $0x770] sm:$0xff] }
 0x294   : > { %2918 = vmatprep.mubr.f32.mxu1 %v918_v16  ;;  %v998_v16 = vld [vmem:[%s5389_s6 + $0x798] sm:$0xff] }
 0x295   : > { %2021 = vmatmul.mubr.f32.gmra.mrb[80].mxu0 %v917_v17 }
 0x296   : > { %2026 = vmatprep.mubr.f32.mxu0 %v922_v18 }
 0x297   : > { %2919 = vmatmul.mubr.f32.gmra.mrb[80].mxu1 %v917_v17 }
 0x298   : > { %2924 = vmatprep.mubr.f32.mxu1 %v922_v18 }
 0x299   : > { %2027 = vmatmul.mubr.f32.gmra.mrb[82].mxu0 %v921_v19 }
 0x29a   : > { %2032 = vmatprep.mubr.f32.mxu0 %v926_v20 }
 0x29b   : > { %2925 = vmatmul.mubr.f32.gmra.mrb[82].mxu1 %v921_v19 }
 0x29c   : > { %2930 = vmatprep.mubr.f32.mxu1 %v926_v20 }
 0x29d   : > { %2033 = vmatmul.mubr.f32.gmra.mrb[84].mxu0 %v925_v21 }
 0x29e   : > { %2038 = vmatprep.mubr.f32.mxu0 %v930_v22 }
 0x29f   : > { %2931 = vmatmul.mubr.f32.gmra.mrb[84].mxu1 %v925_v21  ;;  %v997_v21 = vld [vmem:[%s5389_s6 + $0x790] sm:$0xff] }
 0x2a0   : > { %2936 = vmatprep.mubr.f32.mxu1 %v930_v22  ;;  %v1002_v22 = vld [vmem:[%s5389_s6 + $0x7b8] sm:$0xff] }
 0x2a1   : > { %2039 = vmatmul.mubr.f32.gmra.mrb[86].mxu0 %v929_v23 }
 0x2a2   : > { %2044 = vmatprep.mubr.f32.mxu0 %v934_v24 }
 0x2a3   : > { %2937 = vmatmul.mubr.f32.gmra.mrb[86].mxu1 %v929_v23 }
 0x2a4   : > { %2942 = vmatprep.mubr.f32.mxu1 %v934_v24 }
 0x2a5   : > { %2045 = vmatmul.mubr.f32.gmra.mrb[88].mxu0 %v933_v25 }
 0x2a6   : > { %2050 = vmatprep.mubr.f32.mxu0 %v938_v26 }
 0x2a7   : > { %2943 = vmatmul.mubr.f32.gmra.mrb[88].mxu1 %v933_v25 }
 0x2a8   : > { %2948 = vmatprep.mubr.f32.mxu1 %v938_v26 }
 0x2a9   : > { %2051 = vmatmul.mubr.f32.gmra.mrb[90].mxu0 %v937_v27 }
 0x2aa   : > { %2056 = vmatprep.mubr.f32.mxu0 %v942_v28 }
 0x2ab   : > { %2949 = vmatmul.mubr.f32.gmra.mrb[90].mxu1 %v937_v27  ;;  %v1001_v27 = vld [vmem:[%s5389_s6 + $0x7b0] sm:$0xff] }
 0x2ac   : > { %2954 = vmatprep.mubr.f32.mxu1 %v942_v28  ;;  %v1006_v28 = vld [vmem:[%s5389_s6 + $0x7d8] sm:$0xff] }
 0x2ad   : > { %2057 = vmatmul.mubr.f32.gmra.mrb[92].mxu0 %v941_v29 }
 0x2ae   : > { %2062 = vmatprep.mubr.f32.mxu0 %v946_v30 }
 0x2af   : > { %2955 = vmatmul.mubr.f32.gmra.mrb[92].mxu1 %v941_v29 }
 0x2b0   : > { %2960 = vmatprep.mubr.f32.mxu1 %v946_v30 }
 0x2b1   : > { %2063 = vmatmul.mubr.f32.gmra.mrb[94].mxu0 %v945_v31 }
 0x2b2   : > { %2068 = vmatprep.mubr.f32.mxu0 %v950_v32 }
 0x2b3   : > { %2961 = vmatmul.mubr.f32.gmra.mrb[94].mxu1 %v945_v31 }
 0x2b4   : > { %2966 = vmatprep.mubr.f32.mxu1 %v950_v32 }
 0x2b5   : > { %2069 = vmatmul.mubr.f32.gmra.mrb[96].mxu0 %v949_v33 }
 0x2b6   : > { %2074 = vmatprep.mubr.f32.mxu0 %v954_v34 }
 0x2b7   : > { %2967 = vmatmul.mubr.f32.gmra.mrb[96].mxu1 %v949_v33  ;;  %v1005_v33 = vld [vmem:[%s5389_s6 + $0x7d0] sm:$0xff] }
 0x2b8   : > { %2972 = vmatprep.mubr.f32.mxu1 %v954_v34  ;;  %v1010_v34 = vld [vmem:[%s5389_s6 + $0x7f8] sm:$0xff] }
 0x2b9   : > { %2075 = vmatmul.mubr.f32.gmra.mrb[98].mxu0 %v953_v35 }
 0x2ba   : > { %2080 = vmatprep.mubr.f32.mxu0 %v958_v36 }
 0x2bb   : > { %2973 = vmatmul.mubr.f32.gmra.mrb[98].mxu1 %v953_v35 }
 0x2bc   : > { %2978 = vmatprep.mubr.f32.mxu1 %v958_v36 }
 0x2bd   : > { %2081 = vmatmul.mubr.f32.gmra.mrb[100].mxu0 %v957_v37 }
 0x2be   : > { %2086 = vmatprep.mubr.f32.mxu0 %v962_v38 }
 0x2bf   : > { %2979 = vmatmul.mubr.f32.gmra.mrb[100].mxu1 %v957_v37 }
 0x2c0   : > { %2984 = vmatprep.mubr.f32.mxu1 %v962_v38 }
 0x2c1   : > { %2087 = vmatmul.mubr.f32.gmra.mrb[102].mxu0 %v961_v39 }
 0x2c2   : > { %2092 = vmatprep.mubr.f32.mxu0 %v966_v40 }
 0x2c3   : > { %2985 = vmatmul.mubr.f32.gmra.mrb[102].mxu1 %v961_v39  ;;  %v1009_v39 = vld [vmem:[%s5389_s6 + $0x7f0] sm:$0xff]  ;;  %s6187_s6 = scalar_lea.sflag [#allocation5], %s230_s27 }
 0x2c4   : > { %2990 = vmatprep.mubr.f32.mxu1 %v966_v40 }
 0x2c5   : > { %2093 = vmatmul.mubr.f32.gmra.mrb[104].mxu0 %v965_v41 }
 0x2c6   : > { %2098 = vmatprep.mubr.f32.mxu0 %v970_v42 }
 0x2c7   : > { %2991 = vmatmul.mubr.f32.gmra.mrb[104].mxu1 %v965_v41 }
 0x2c8   : > { %2996 = vmatprep.mubr.f32.mxu1 %v970_v42  ;;  %v1782_v45 = vpop.f32.mrb[0].mxu0 }
 0x2c9   : > { %3834 = vst [vmem:[%s5898_s12] sm:$0xff] %v1782_v45  ;;  %v1784_v47 = vpop.f32.mrb[1].mxu0  ;;  %2099 = vmatmul.mubr.f32.gmra.mrb[106].mxu0 %v969_v43 }
 0x2ca   : > { %v2680_v46 = vpop.f32.mrb[0].mxu1  ;;  %3835 = vst [vmem:[%s5898_s12 + $0x8] sm:$0xff] %v1784_v47  ;;  %2104 = vmatprep.mubr.f32.mxu0 %v974_v44 }
 0x2cb   : > { %3836 = vst [vmem:[%s5898_s12 + $0x10] sm:$0xff] %v2680_v46  ;;  %v2682_v48 = vpop.f32.mrb[1].mxu1  ;;  %2997 = vmatmul.mubr.f32.gmra.mrb[106].mxu1 %v969_v43 }
 0x2cc   : > { %3837 = vst [vmem:[%s5898_s12 + $0x18] sm:$0xff] %v2682_v48  ;;  %3002 = vmatprep.mubr.f32.mxu1 %v974_v44  ;;  %v1788_v51 = vpop.f32.mrb[2].mxu0 }
 0x2cd   : > { %3838 = vst [vmem:[%s5898_s12 + $0x20] sm:$0xff] %v1788_v51  ;;  %v1790_v53 = vpop.f32.mrb[3].mxu0  ;;  %2105 = vmatmul.mubr.f32.gmra.mrb[108].mxu0 %v973_v49 }
 0x2ce   : > { %v2686_v52 = vpop.f32.mrb[2].mxu1  ;;  %3839 = vst [vmem:[%s5898_s12 + $0x28] sm:$0xff] %v1790_v53  ;;  %2110 = vmatprep.mubr.f32.mxu0 %v978_v50 }
 0x2cf   : > { %3840 = vst [vmem:[%s5898_s12 + $0x30] sm:$0xff] %v2686_v52  ;;  %v2688_v54 = vpop.f32.mrb[3].mxu1  ;;  %3003 = vmatmul.mubr.f32.gmra.mrb[108].mxu1 %v973_v49 }
 0x2d0   : > { %3841 = vst [vmem:[%s5898_s12 + $0x38] sm:$0xff] %v2688_v54  ;;  %3008 = vmatprep.mubr.f32.mxu1 %v978_v50  ;;  %v1794_v57 = vpop.f32.mrb[4].mxu0 }
 0x2d1   : > { %3842 = vst [vmem:[%s5898_s12 + $0x40] sm:$0xff] %v1794_v57  ;;  %v1796_v59 = vpop.f32.mrb[5].mxu0  ;;  %2111 = vmatmul.mubr.f32.gmra.mrb[110].mxu0 %v977_v55 }
 0x2d2   : > { %v2692_v58 = vpop.f32.mrb[4].mxu1  ;;  %3843 = vst [vmem:[%s5898_s12 + $0x48] sm:$0xff] %v1796_v59  ;;  %2116 = vmatprep.mubr.f32.mxu0 %v982_v56 }
 0x2d3   : > { %3844 = vst [vmem:[%s5898_s12 + $0x50] sm:$0xff] %v2692_v58  ;;  %v2694_v60 = vpop.f32.mrb[5].mxu1  ;;  %3009 = vmatmul.mubr.f32.gmra.mrb[110].mxu1 %v977_v55 }
 0x2d4   : > { %3845 = vst [vmem:[%s5898_s12 + $0x58] sm:$0xff] %v2694_v60  ;;  %3014 = vmatprep.mubr.f32.mxu1 %v982_v56  ;;  %v1800_v63 = vpop.f32.mrb[6].mxu0 }
 0x2d5   : > { %3846 = vst [vmem:[%s5898_s12 + $0x60] sm:$0xff] %v1800_v63  ;;  %v1802_v1 = vpop.f32.mrb[7].mxu0  ;;  %2117 = vmatmul.mubr.f32.gmra.mrb[112].mxu0 %v981_v61 }
 0x2d6   : > { %v2698_v0 = vpop.f32.mrb[6].mxu1  ;;  %3847 = vst [vmem:[%s5898_s12 + $0x68] sm:$0xff] %v1802_v1  ;;  %2122 = vmatprep.mubr.f32.mxu0 %v986_v62 }
 0x2d7   : > { %3848 = vst [vmem:[%s5898_s12 + $0x70] sm:$0xff] %v2698_v0  ;;  %v2700_v2 = vpop.f32.mrb[7].mxu1  ;;  %3015 = vmatmul.mubr.f32.gmra.mrb[112].mxu1 %v981_v61 }
 0x2d8   : > { %3849 = vst [vmem:[%s5898_s12 + $0x78] sm:$0xff] %v2700_v2  ;;  %3020 = vmatprep.mubr.f32.mxu1 %v986_v62  ;;  %v1806_v5 = vpop.f32.mrb[8].mxu0 }
 0x2d9   : > { %3850 = vst [vmem:[%s5898_s12 + $0x80] sm:$0xff] %v1806_v5  ;;  %v1808_v7 = vpop.f32.mrb[9].mxu0  ;;  %2123 = vmatmul.mubr.f32.gmra.mrb[114].mxu0 %v985_v3 }
 0x2da   : > { %v2704_v6 = vpop.f32.mrb[8].mxu1  ;;  %3851 = vst [vmem:[%s5898_s12 + $0x88] sm:$0xff] %v1808_v7  ;;  %2128 = vmatprep.mubr.f32.mxu0 %v990_v4 }
 0x2db   : > { %3852 = vst [vmem:[%s5898_s12 + $0x90] sm:$0xff] %v2704_v6  ;;  %v2706_v8 = vpop.f32.mrb[9].mxu1  ;;  %3021 = vmatmul.mubr.f32.gmra.mrb[114].mxu1 %v985_v3 }
 0x2dc   : > { %3853 = vst [vmem:[%s5898_s12 + $0x98] sm:$0xff] %v2706_v8  ;;  %3026 = vmatprep.mubr.f32.mxu1 %v990_v4  ;;  %v1812_v11 = vpop.f32.mrb[10].mxu0 }
 0x2dd   : > { %3854 = vst [vmem:[%s5898_s12 + $0xa0] sm:$0xff] %v1812_v11  ;;  %v1814_v13 = vpop.f32.mrb[11].mxu0  ;;  %2129 = vmatmul.mubr.f32.gmra.mrb[116].mxu0 %v989_v9 }
 0x2de   : > { %v2710_v12 = vpop.f32.mrb[10].mxu1  ;;  %3855 = vst [vmem:[%s5898_s12 + $0xa8] sm:$0xff] %v1814_v13  ;;  %2134 = vmatprep.mubr.f32.mxu0 %v994_v10 }
 0x2df   : > { %3856 = vst [vmem:[%s5898_s12 + $0xb0] sm:$0xff] %v2710_v12  ;;  %v2712_v14 = vpop.f32.mrb[11].mxu1  ;;  %3027 = vmatmul.mubr.f32.gmra.mrb[116].mxu1 %v989_v9 }
 0x2e0   : > { %3857 = vst [vmem:[%s5898_s12 + $0xb8] sm:$0xff] %v2712_v14  ;;  %3032 = vmatprep.mubr.f32.mxu1 %v994_v10  ;;  %v1818_v17 = vpop.f32.mrb[12].mxu0 }
 0x2e1   : > { %3858 = vst [vmem:[%s5898_s12 + $0xc0] sm:$0xff] %v1818_v17  ;;  %v1820_v19 = vpop.f32.mrb[13].mxu0  ;;  %2135 = vmatmul.mubr.f32.gmra.mrb[118].mxu0 %v993_v15 }
 0x2e2   : > { %v2716_v18 = vpop.f32.mrb[12].mxu1  ;;  %3859 = vst [vmem:[%s5898_s12 + $0xc8] sm:$0xff] %v1820_v19  ;;  %2140 = vmatprep.mubr.f32.mxu0 %v998_v16 }
 0x2e3   : > { %3860 = vst [vmem:[%s5898_s12 + $0xd0] sm:$0xff] %v2716_v18  ;;  %v2718_v20 = vpop.f32.mrb[13].mxu1  ;;  %3033 = vmatmul.mubr.f32.gmra.mrb[118].mxu1 %v993_v15 }
 0x2e4   : > { %3861 = vst [vmem:[%s5898_s12 + $0xd8] sm:$0xff] %v2718_v20  ;;  %3038 = vmatprep.mubr.f32.mxu1 %v998_v16  ;;  %v1824_v23 = vpop.f32.mrb[14].mxu0 }
 0x2e5   : > { %3862 = vst [vmem:[%s5898_s12 + $0xe0] sm:$0xff] %v1824_v23  ;;  %v1826_v25 = vpop.f32.mrb[15].mxu0  ;;  %2141 = vmatmul.mubr.f32.gmra.mrb[120].mxu0 %v997_v21 }
 0x2e6   : > { %v2722_v24 = vpop.f32.mrb[14].mxu1  ;;  %3863 = vst [vmem:[%s5898_s12 + $0xe8] sm:$0xff] %v1826_v25  ;;  %2146 = vmatprep.mubr.f32.mxu0 %v1002_v22 }
 0x2e7   : > { %3864 = vst [vmem:[%s5898_s12 + $0xf0] sm:$0xff] %v2722_v24  ;;  %v2724_v26 = vpop.f32.mrb[15].mxu1  ;;  %3039 = vmatmul.mubr.f32.gmra.mrb[120].mxu1 %v997_v21 }
 0x2e8   : > { %3865 = vst [vmem:[%s5898_s12 + $0xf8] sm:$0xff] %v2724_v26  ;;  %3044 = vmatprep.mubr.f32.mxu1 %v1002_v22  ;;  %v1830_v29 = vpop.f32.mrb[16].mxu0 }
 0x2e9   : > { %3866 = vst [vmem:[%s5898_s12 + $0x100] sm:$0xff] %v1830_v29  ;;  %v1832_v31 = vpop.f32.mrb[17].mxu0  ;;  %2147 = vmatmul.mubr.f32.gmra.mrb[122].mxu0 %v1001_v27 }
 0x2ea   : > { %v2728_v30 = vpop.f32.mrb[16].mxu1  ;;  %3867 = vst [vmem:[%s5898_s12 + $0x108] sm:$0xff] %v1832_v31  ;;  %2152 = vmatprep.mubr.f32.mxu0 %v1006_v28 }
 0x2eb   : > { %3868 = vst [vmem:[%s5898_s12 + $0x110] sm:$0xff] %v2728_v30  ;;  %v2730_v32 = vpop.f32.mrb[17].mxu1  ;;  %3045 = vmatmul.mubr.f32.gmra.mrb[122].mxu1 %v1001_v27 }
 0x2ec   : > { %3869 = vst [vmem:[%s5898_s12 + $0x118] sm:$0xff] %v2730_v32  ;;  %3050 = vmatprep.mubr.f32.mxu1 %v1006_v28  ;;  %v1836_v35 = vpop.f32.mrb[18].mxu0 }
 0x2ed   : > { %3870 = vst [vmem:[%s5898_s12 + $0x120] sm:$0xff] %v1836_v35  ;;  %v1838_v37 = vpop.f32.mrb[19].mxu0  ;;  %2153 = vmatmul.mubr.f32.gmra.mrb[124].mxu0 %v1005_v33 }
 0x2ee   : > { %v2734_v36 = vpop.f32.mrb[18].mxu1  ;;  %3871 = vst [vmem:[%s5898_s12 + $0x128] sm:$0xff] %v1838_v37  ;;  %2158 = vmatprep.mubr.f32.mxu0 %v1010_v34 }
 0x2ef   : > { %3872 = vst [vmem:[%s5898_s12 + $0x130] sm:$0xff] %v2734_v36  ;;  %v2736_v38 = vpop.f32.mrb[19].mxu1  ;;  %3051 = vmatmul.mubr.f32.gmra.mrb[124].mxu1 %v1005_v33 }
 0x2f0   : > { %3873 = vst [vmem:[%s5898_s12 + $0x138] sm:$0xff] %v2736_v38  ;;  %3056 = vmatprep.mubr.f32.mxu1 %v1010_v34  ;;  %v1842_v40 = vpop.f32.mrb[20].mxu0 }
 0x2f1   : > { %3874 = vst [vmem:[%s5898_s12 + $0x140] sm:$0xff] %v1842_v40  ;;  %v1844_v42 = vpop.f32.mrb[21].mxu0  ;;  %2159 = vmatmul.mubr.f32.gmra.mrb[126].mxu0 %v1009_v39 }
 0x2f2   : > { %v2740_v41 = vpop.f32.mrb[20].mxu1  ;;  %3875 = vst [vmem:[%s5898_s12 + $0x148] sm:$0xff] %v1844_v42 }
 0x2f3   : > { %3876 = vst [vmem:[%s5898_s12 + $0x150] sm:$0xff] %v2740_v41  ;;  %v2742_v43 = vpop.f32.mrb[21].mxu1  ;;  %3057 = vmatmul.mubr.f32.gmra.mrb[126].mxu1 %v1009_v39 }
 0x2f4   : > { %3877 = vst [vmem:[%s5898_s12 + $0x158] sm:$0xff] %v2742_v43  ;;  %v1848_v44 = vpop.f32.mrb[22].mxu0 }
 0x2f5   : > { %3878 = vst [vmem:[%s5898_s12 + $0x160] sm:$0xff] %v1848_v44  ;;  %v1850_v46 = vpop.f32.mrb[23].mxu0 }
 0x2f6   : > { %v2746_v45 = vpop.f32.mrb[22].mxu1  ;;  %3879 = vst [vmem:[%s5898_s12 + $0x168] sm:$0xff] %v1850_v46 }
 0x2f7   : > { %3880 = vst [vmem:[%s5898_s12 + $0x170] sm:$0xff] %v2746_v45  ;;  %v2748_v47 = vpop.f32.mrb[23].mxu1 }
 0x2f8   : > { %3881 = vst [vmem:[%s5898_s12 + $0x178] sm:$0xff] %v2748_v47  ;;  %v1854_v48 = vpop.f32.mrb[24].mxu0 }
 0x2f9   : > { %3882 = vst [vmem:[%s5898_s12 + $0x180] sm:$0xff] %v1854_v48  ;;  %v1856_v50 = vpop.f32.mrb[25].mxu0 }
 0x2fa   : > { %v2752_v49 = vpop.f32.mrb[24].mxu1  ;;  %3883 = vst [vmem:[%s5898_s12 + $0x188] sm:$0xff] %v1856_v50 }
 0x2fb   : > { %3884 = vst [vmem:[%s5898_s12 + $0x190] sm:$0xff] %v2752_v49  ;;  %v2754_v51 = vpop.f32.mrb[25].mxu1 }
 0x2fc   : > { %3885 = vst [vmem:[%s5898_s12 + $0x198] sm:$0xff] %v2754_v51  ;;  %v1860_v52 = vpop.f32.mrb[26].mxu0 }
 0x2fd   : > { %3886 = vst [vmem:[%s5898_s12 + $0x1a0] sm:$0xff] %v1860_v52  ;;  %v1862_v54 = vpop.f32.mrb[27].mxu0 }
 0x2fe   : > { %v2758_v53 = vpop.f32.mrb[26].mxu1  ;;  %3887 = vst [vmem:[%s5898_s12 + $0x1a8] sm:$0xff] %v1862_v54 }
 0x2ff   : > { %3888 = vst [vmem:[%s5898_s12 + $0x1b0] sm:$0xff] %v2758_v53  ;;  %v2760_v55 = vpop.f32.mrb[27].mxu1 }
 0x300   : > { %3889 = vst [vmem:[%s5898_s12 + $0x1b8] sm:$0xff] %v2760_v55  ;;  %v1866_v56 = vpop.f32.mrb[28].mxu0 }
 0x301   : > { %3890 = vst [vmem:[%s5898_s12 + $0x1c0] sm:$0xff] %v1866_v56  ;;  %v1868_v58 = vpop.f32.mrb[29].mxu0 }
 0x302   : > { %v2764_v57 = vpop.f32.mrb[28].mxu1  ;;  %3891 = vst [vmem:[%s5898_s12 + $0x1c8] sm:$0xff] %v1868_v58 }
 0x303   : > { %3892 = vst [vmem:[%s5898_s12 + $0x1d0] sm:$0xff] %v2764_v57  ;;  %v2766_v59 = vpop.f32.mrb[29].mxu1 }
 0x304   : > { %3893 = vst [vmem:[%s5898_s12 + $0x1d8] sm:$0xff] %v2766_v59  ;;  %v1872_v60 = vpop.f32.mrb[30].mxu0 }
 0x305   : > { %3894 = vst [vmem:[%s5898_s12 + $0x1e0] sm:$0xff] %v1872_v60  ;;  %v1874_v62 = vpop.f32.mrb[31].mxu0 }
 0x306   : > { %v2770_v61 = vpop.f32.mrb[30].mxu1  ;;  %3895 = vst [vmem:[%s5898_s12 + $0x1e8] sm:$0xff] %v1874_v62 }
 0x307   : > { %3896 = vst [vmem:[%s5898_s12 + $0x1f0] sm:$0xff] %v2770_v61  ;;  %v2772_v63 = vpop.f32.mrb[31].mxu1 }
 0x308   : > { %3897 = vst [vmem:[%s5898_s12 + $0x1f8] sm:$0xff] %v2772_v63  ;;  %v1878_v0 = vpop.f32.mrb[32].mxu0 }
 0x309   : > { %3898 = vst [vmem:[%s5898_s12 + $0x200] sm:$0xff] %v1878_v0  ;;  %v1880_v2 = vpop.f32.mrb[33].mxu0 }
 0x30a   : > { %v2776_v1 = vpop.f32.mrb[32].mxu1  ;;  %3899 = vst [vmem:[%s5898_s12 + $0x208] sm:$0xff] %v1880_v2 }
 0x30b   : > { %3900 = vst [vmem:[%s5898_s12 + $0x210] sm:$0xff] %v2776_v1  ;;  %v2778_v3 = vpop.f32.mrb[33].mxu1 }
 0x30c   : > { %3901 = vst [vmem:[%s5898_s12 + $0x218] sm:$0xff] %v2778_v3  ;;  %v1884_v4 = vpop.f32.mrb[34].mxu0 }
 0x30d   : > { %3902 = vst [vmem:[%s5898_s12 + $0x220] sm:$0xff] %v1884_v4  ;;  %v1886_v6 = vpop.f32.mrb[35].mxu0 }
 0x30e   : > { %v2782_v5 = vpop.f32.mrb[34].mxu1  ;;  %3903 = vst [vmem:[%s5898_s12 + $0x228] sm:$0xff] %v1886_v6 }
 0x30f   : > { %3904 = vst [vmem:[%s5898_s12 + $0x230] sm:$0xff] %v2782_v5  ;;  %v2784_v7 = vpop.f32.mrb[35].mxu1 }
 0x310   : > { %3905 = vst [vmem:[%s5898_s12 + $0x238] sm:$0xff] %v2784_v7  ;;  %v1890_v8 = vpop.f32.mrb[36].mxu0 }
 0x311   : > { %3906 = vst [vmem:[%s5898_s12 + $0x240] sm:$0xff] %v1890_v8  ;;  %v1892_v10 = vpop.f32.mrb[37].mxu0 }
 0x312   : > { %v2788_v9 = vpop.f32.mrb[36].mxu1  ;;  %3907 = vst [vmem:[%s5898_s12 + $0x248] sm:$0xff] %v1892_v10 }
 0x313   : > { %3908 = vst [vmem:[%s5898_s12 + $0x250] sm:$0xff] %v2788_v9  ;;  %v2790_v11 = vpop.f32.mrb[37].mxu1 }
 0x314   : > { %3909 = vst [vmem:[%s5898_s12 + $0x258] sm:$0xff] %v2790_v11  ;;  %v1896_v12 = vpop.f32.mrb[38].mxu0 }
 0x315   : > { %3910 = vst [vmem:[%s5898_s12 + $0x260] sm:$0xff] %v1896_v12  ;;  %v1898_v14 = vpop.f32.mrb[39].mxu0 }
 0x316   : > { %v2794_v13 = vpop.f32.mrb[38].mxu1  ;;  %3911 = vst [vmem:[%s5898_s12 + $0x268] sm:$0xff] %v1898_v14 }
 0x317   : > { %3912 = vst [vmem:[%s5898_s12 + $0x270] sm:$0xff] %v2794_v13  ;;  %v2796_v15 = vpop.f32.mrb[39].mxu1 }
 0x318   : > { %3913 = vst [vmem:[%s5898_s12 + $0x278] sm:$0xff] %v2796_v15  ;;  %v1902_v16 = vpop.f32.mrb[40].mxu0 }
 0x319   : > { %3914 = vst [vmem:[%s5898_s12 + $0x280] sm:$0xff] %v1902_v16  ;;  %v1904_v18 = vpop.f32.mrb[41].mxu0 }
 0x31a   : > { %v2800_v17 = vpop.f32.mrb[40].mxu1  ;;  %3915 = vst [vmem:[%s5898_s12 + $0x288] sm:$0xff] %v1904_v18 }
 0x31b   : > { %3916 = vst [vmem:[%s5898_s12 + $0x290] sm:$0xff] %v2800_v17  ;;  %v2802_v19 = vpop.f32.mrb[41].mxu1 }
 0x31c   : > { %3917 = vst [vmem:[%s5898_s12 + $0x298] sm:$0xff] %v2802_v19  ;;  %v1908_v20 = vpop.f32.mrb[42].mxu0 }
 0x31d   : > { %3918 = vst [vmem:[%s5898_s12 + $0x2a0] sm:$0xff] %v1908_v20  ;;  %v1910_v22 = vpop.f32.mrb[43].mxu0 }
 0x31e   : > { %v2806_v21 = vpop.f32.mrb[42].mxu1  ;;  %3919 = vst [vmem:[%s5898_s12 + $0x2a8] sm:$0xff] %v1910_v22 }
 0x31f   : > { %3920 = vst [vmem:[%s5898_s12 + $0x2b0] sm:$0xff] %v2806_v21  ;;  %v2808_v23 = vpop.f32.mrb[43].mxu1 }
 0x320   : > { %3921 = vst [vmem:[%s5898_s12 + $0x2b8] sm:$0xff] %v2808_v23  ;;  %v1914_v24 = vpop.f32.mrb[44].mxu0 }
 0x321   : > { %3922 = vst [vmem:[%s5898_s12 + $0x2c0] sm:$0xff] %v1914_v24  ;;  %v1916_v26 = vpop.f32.mrb[45].mxu0 }
 0x322   : > { %v2812_v25 = vpop.f32.mrb[44].mxu1  ;;  %3923 = vst [vmem:[%s5898_s12 + $0x2c8] sm:$0xff] %v1916_v26 }
 0x323   : > { %3924 = vst [vmem:[%s5898_s12 + $0x2d0] sm:$0xff] %v2812_v25  ;;  %v2814_v27 = vpop.f32.mrb[45].mxu1 }
 0x324   : > { %3925 = vst [vmem:[%s5898_s12 + $0x2d8] sm:$0xff] %v2814_v27  ;;  %v1920_v28 = vpop.f32.mrb[46].mxu0 }
 0x325   : > { %3926 = vst [vmem:[%s5898_s12 + $0x2e0] sm:$0xff] %v1920_v28  ;;  %v1922_v30 = vpop.f32.mrb[47].mxu0 }
 0x326   : > { %v2818_v29 = vpop.f32.mrb[46].mxu1  ;;  %3927 = vst [vmem:[%s5898_s12 + $0x2e8] sm:$0xff] %v1922_v30 }
 0x327   : > { %3928 = vst [vmem:[%s5898_s12 + $0x2f0] sm:$0xff] %v2818_v29  ;;  %v2820_v31 = vpop.f32.mrb[47].mxu1 }
 0x328   : > { %3929 = vst [vmem:[%s5898_s12 + $0x2f8] sm:$0xff] %v2820_v31  ;;  %v1926_v32 = vpop.f32.mrb[48].mxu0 }
 0x329   : > { %3930 = vst [vmem:[%s5898_s12 + $0x300] sm:$0xff] %v1926_v32  ;;  %v1928_v34 = vpop.f32.mrb[49].mxu0 }
 0x32a   : > { %v2824_v33 = vpop.f32.mrb[48].mxu1  ;;  %3931 = vst [vmem:[%s5898_s12 + $0x308] sm:$0xff] %v1928_v34 }
 0x32b   : > { %3932 = vst [vmem:[%s5898_s12 + $0x310] sm:$0xff] %v2824_v33  ;;  %v2826_v35 = vpop.f32.mrb[49].mxu1 }
 0x32c   : > { %3933 = vst [vmem:[%s5898_s12 + $0x318] sm:$0xff] %v2826_v35  ;;  %v1932_v36 = vpop.f32.mrb[50].mxu0 }
 0x32d   : > { %3934 = vst [vmem:[%s5898_s12 + $0x320] sm:$0xff] %v1932_v36  ;;  %v1934_v38 = vpop.f32.mrb[51].mxu0 }
 0x32e   : > { %v2830_v37 = vpop.f32.mrb[50].mxu1  ;;  %3935 = vst [vmem:[%s5898_s12 + $0x328] sm:$0xff] %v1934_v38 }
 0x32f   : > { %3936 = vst [vmem:[%s5898_s12 + $0x330] sm:$0xff] %v2830_v37  ;;  %v2832_v39 = vpop.f32.mrb[51].mxu1 }
 0x330   : > { %3937 = vst [vmem:[%s5898_s12 + $0x338] sm:$0xff] %v2832_v39  ;;  %v1938_v40 = vpop.f32.mrb[52].mxu0 }
 0x331   : > { %3938 = vst [vmem:[%s5898_s12 + $0x340] sm:$0xff] %v1938_v40  ;;  %v1940_v42 = vpop.f32.mrb[53].mxu0 }
 0x332   : > { %v2836_v41 = vpop.f32.mrb[52].mxu1  ;;  %3939 = vst [vmem:[%s5898_s12 + $0x348] sm:$0xff] %v1940_v42 }
 0x333   : > { %3940 = vst [vmem:[%s5898_s12 + $0x350] sm:$0xff] %v2836_v41  ;;  %v2838_v43 = vpop.f32.mrb[53].mxu1 }
 0x334   : > { %3941 = vst [vmem:[%s5898_s12 + $0x358] sm:$0xff] %v2838_v43  ;;  %v1944_v44 = vpop.f32.mrb[54].mxu0 }
 0x335   : > { %3942 = vst [vmem:[%s5898_s12 + $0x360] sm:$0xff] %v1944_v44  ;;  %v1946_v46 = vpop.f32.mrb[55].mxu0 }
 0x336   : > { %v2842_v45 = vpop.f32.mrb[54].mxu1  ;;  %3943 = vst [vmem:[%s5898_s12 + $0x368] sm:$0xff] %v1946_v46 }
 0x337   : > { %3944 = vst [vmem:[%s5898_s12 + $0x370] sm:$0xff] %v2842_v45  ;;  %v2844_v47 = vpop.f32.mrb[55].mxu1 }
 0x338   : > { %3945 = vst [vmem:[%s5898_s12 + $0x378] sm:$0xff] %v2844_v47  ;;  %v1950_v48 = vpop.f32.mrb[56].mxu0 }
 0x339   : > { %3946 = vst [vmem:[%s5898_s12 + $0x380] sm:$0xff] %v1950_v48  ;;  %v1952_v50 = vpop.f32.mrb[57].mxu0 }
 0x33a   : > { %v2848_v49 = vpop.f32.mrb[56].mxu1  ;;  %3947 = vst [vmem:[%s5898_s12 + $0x388] sm:$0xff] %v1952_v50 }
 0x33b   : > { %3948 = vst [vmem:[%s5898_s12 + $0x390] sm:$0xff] %v2848_v49  ;;  %v2850_v51 = vpop.f32.mrb[57].mxu1 }
 0x33c   : > { %3949 = vst [vmem:[%s5898_s12 + $0x398] sm:$0xff] %v2850_v51  ;;  %v1956_v52 = vpop.f32.mrb[58].mxu0 }
 0x33d   : > { %3950 = vst [vmem:[%s5898_s12 + $0x3a0] sm:$0xff] %v1956_v52  ;;  %v1958_v54 = vpop.f32.mrb[59].mxu0 }
 0x33e   : > { %v2854_v53 = vpop.f32.mrb[58].mxu1  ;;  %3951 = vst [vmem:[%s5898_s12 + $0x3a8] sm:$0xff] %v1958_v54 }
 0x33f   : > { %3952 = vst [vmem:[%s5898_s12 + $0x3b0] sm:$0xff] %v2854_v53  ;;  %v2856_v55 = vpop.f32.mrb[59].mxu1 }
 0x340   : > { %3953 = vst [vmem:[%s5898_s12 + $0x3b8] sm:$0xff] %v2856_v55  ;;  %v1962_v56 = vpop.f32.mrb[60].mxu0 }
 0x341   : > { %3954 = vst [vmem:[%s5898_s12 + $0x3c0] sm:$0xff] %v1962_v56  ;;  %v1964_v58 = vpop.f32.mrb[61].mxu0 }
 0x342   : > { %v2860_v57 = vpop.f32.mrb[60].mxu1  ;;  %3955 = vst [vmem:[%s5898_s12 + $0x3c8] sm:$0xff] %v1964_v58 }
 0x343   : > { %3956 = vst [vmem:[%s5898_s12 + $0x3d0] sm:$0xff] %v2860_v57  ;;  %v2862_v59 = vpop.f32.mrb[61].mxu1 }
 0x344   : > { %3957 = vst [vmem:[%s5898_s12 + $0x3d8] sm:$0xff] %v2862_v59  ;;  %v1968_v60 = vpop.f32.mrb[62].mxu0 }
 0x345   : > { %3958 = vst [vmem:[%s5898_s12 + $0x3e0] sm:$0xff] %v1968_v60  ;;  %v1970_v62 = vpop.f32.mrb[63].mxu0 }
 0x346   : > { %v2866_v61 = vpop.f32.mrb[62].mxu1  ;;  %3959 = vst [vmem:[%s5898_s12 + $0x3e8] sm:$0xff] %v1970_v62 }
 0x347   : > { %3960 = vst [vmem:[%s5898_s12 + $0x3f0] sm:$0xff] %v2866_v61  ;;  %v2868_v63 = vpop.f32.mrb[63].mxu1 }
 0x348   : > { %3961 = vst [vmem:[%s5898_s12 + $0x3f8] sm:$0xff] %v2868_v63  ;;  %v1974_v0 = vpop.f32.mrb[64].mxu0 }
 0x349   : > { %3962 = vst [vmem:[%s5898_s12 + $0x400] sm:$0xff] %v1974_v0  ;;  %v1976_v2 = vpop.f32.mrb[65].mxu0 }
 0x34a   : > { %v2872_v1 = vpop.f32.mrb[64].mxu1  ;;  %3963 = vst [vmem:[%s5898_s12 + $0x408] sm:$0xff] %v1976_v2 }
 0x34b   : > { %3964 = vst [vmem:[%s5898_s12 + $0x410] sm:$0xff] %v2872_v1  ;;  %v2874_v3 = vpop.f32.mrb[65].mxu1 }
 0x34c   : > { %3965 = vst [vmem:[%s5898_s12 + $0x418] sm:$0xff] %v2874_v3  ;;  %v1980_v4 = vpop.f32.mrb[66].mxu0 }
 0x34d   : > { %3966 = vst [vmem:[%s5898_s12 + $0x420] sm:$0xff] %v1980_v4  ;;  %v1982_v6 = vpop.f32.mrb[67].mxu0 }
 0x34e   : > { %v2878_v5 = vpop.f32.mrb[66].mxu1  ;;  %3967 = vst [vmem:[%s5898_s12 + $0x428] sm:$0xff] %v1982_v6 }
 0x34f   : > { %3968 = vst [vmem:[%s5898_s12 + $0x430] sm:$0xff] %v2878_v5  ;;  %v2880_v7 = vpop.f32.mrb[67].mxu1 }
 0x350   : > { %3969 = vst [vmem:[%s5898_s12 + $0x438] sm:$0xff] %v2880_v7  ;;  %v1986_v8 = vpop.f32.mrb[68].mxu0 }
 0x351   : > { %3970 = vst [vmem:[%s5898_s12 + $0x440] sm:$0xff] %v1986_v8  ;;  %v1988_v10 = vpop.f32.mrb[69].mxu0 }
 0x352   : > { %v2884_v9 = vpop.f32.mrb[68].mxu1  ;;  %3971 = vst [vmem:[%s5898_s12 + $0x448] sm:$0xff] %v1988_v10 }
 0x353   : > { %3972 = vst [vmem:[%s5898_s12 + $0x450] sm:$0xff] %v2884_v9  ;;  %v2886_v11 = vpop.f32.mrb[69].mxu1 }
 0x354   : > { %3973 = vst [vmem:[%s5898_s12 + $0x458] sm:$0xff] %v2886_v11  ;;  %v1992_v12 = vpop.f32.mrb[70].mxu0 }
 0x355   : > { %3974 = vst [vmem:[%s5898_s12 + $0x460] sm:$0xff] %v1992_v12  ;;  %v1994_v14 = vpop.f32.mrb[71].mxu0 }
 0x356   : > { %v2890_v13 = vpop.f32.mrb[70].mxu1  ;;  %3975 = vst [vmem:[%s5898_s12 + $0x468] sm:$0xff] %v1994_v14 }
 0x357   : > { %3976 = vst [vmem:[%s5898_s12 + $0x470] sm:$0xff] %v2890_v13  ;;  %v2892_v15 = vpop.f32.mrb[71].mxu1 }
 0x358   : > { %3977 = vst [vmem:[%s5898_s12 + $0x478] sm:$0xff] %v2892_v15  ;;  %v1998_v16 = vpop.f32.mrb[72].mxu0 }
 0x359   : > { %3978 = vst [vmem:[%s5898_s12 + $0x480] sm:$0xff] %v1998_v16  ;;  %v2000_v18 = vpop.f32.mrb[73].mxu0 }
 0x35a   : > { %v2896_v17 = vpop.f32.mrb[72].mxu1  ;;  %3979 = vst [vmem:[%s5898_s12 + $0x488] sm:$0xff] %v2000_v18 }
 0x35b   : > { %3980 = vst [vmem:[%s5898_s12 + $0x490] sm:$0xff] %v2896_v17  ;;  %v2898_v19 = vpop.f32.mrb[73].mxu1 }
 0x35c   : > { %3981 = vst [vmem:[%s5898_s12 + $0x498] sm:$0xff] %v2898_v19  ;;  %v2004_v20 = vpop.f32.mrb[74].mxu0 }
 0x35d   : > { %3982 = vst [vmem:[%s5898_s12 + $0x4a0] sm:$0xff] %v2004_v20  ;;  %v2006_v22 = vpop.f32.mrb[75].mxu0 }
 0x35e   : > { %v2902_v21 = vpop.f32.mrb[74].mxu1  ;;  %3983 = vst [vmem:[%s5898_s12 + $0x4a8] sm:$0xff] %v2006_v22 }
 0x35f   : > { %3984 = vst [vmem:[%s5898_s12 + $0x4b0] sm:$0xff] %v2902_v21  ;;  %v2904_v23 = vpop.f32.mrb[75].mxu1 }
 0x360   : > { %3985 = vst [vmem:[%s5898_s12 + $0x4b8] sm:$0xff] %v2904_v23  ;;  %v2010_v24 = vpop.f32.mrb[76].mxu0 }
 0x361   : > { %3986 = vst [vmem:[%s5898_s12 + $0x4c0] sm:$0xff] %v2010_v24  ;;  %v2012_v26 = vpop.f32.mrb[77].mxu0 }
 0x362   : > { %v2908_v25 = vpop.f32.mrb[76].mxu1  ;;  %3987 = vst [vmem:[%s5898_s12 + $0x4c8] sm:$0xff] %v2012_v26 }
 0x363   : > { %3988 = vst [vmem:[%s5898_s12 + $0x4d0] sm:$0xff] %v2908_v25  ;;  %v2910_v27 = vpop.f32.mrb[77].mxu1 }
 0x364   : > { %3989 = vst [vmem:[%s5898_s12 + $0x4d8] sm:$0xff] %v2910_v27  ;;  %v2016_v28 = vpop.f32.mrb[78].mxu0 }
 0x365   : > { %3990 = vst [vmem:[%s5898_s12 + $0x4e0] sm:$0xff] %v2016_v28  ;;  %v2018_v30 = vpop.f32.mrb[79].mxu0 }
 0x366   : > { %v2914_v29 = vpop.f32.mrb[78].mxu1  ;;  %3991 = vst [vmem:[%s5898_s12 + $0x4e8] sm:$0xff] %v2018_v30 }
 0x367   : > { %3992 = vst [vmem:[%s5898_s12 + $0x4f0] sm:$0xff] %v2914_v29  ;;  %v2916_v31 = vpop.f32.mrb[79].mxu1 }
 0x368   : > { %3993 = vst [vmem:[%s5898_s12 + $0x4f8] sm:$0xff] %v2916_v31  ;;  %v2022_v32 = vpop.f32.mrb[80].mxu0 }
 0x369   : > { %3994 = vst [vmem:[%s5898_s12 + $0x500] sm:$0xff] %v2022_v32  ;;  %v2024_v34 = vpop.f32.mrb[81].mxu0 }
 0x36a   : > { %v2920_v33 = vpop.f32.mrb[80].mxu1  ;;  %3995 = vst [vmem:[%s5898_s12 + $0x508] sm:$0xff] %v2024_v34 }
 0x36b   : > { %3996 = vst [vmem:[%s5898_s12 + $0x510] sm:$0xff] %v2920_v33  ;;  %v2922_v35 = vpop.f32.mrb[81].mxu1 }
 0x36c   : > { %3997 = vst [vmem:[%s5898_s12 + $0x518] sm:$0xff] %v2922_v35  ;;  %v2028_v36 = vpop.f32.mrb[82].mxu0 }
 0x36d   : > { %3998 = vst [vmem:[%s5898_s12 + $0x520] sm:$0xff] %v2028_v36  ;;  %v2030_v38 = vpop.f32.mrb[83].mxu0 }
 0x36e   : > { %v2926_v37 = vpop.f32.mrb[82].mxu1  ;;  %3999 = vst [vmem:[%s5898_s12 + $0x528] sm:$0xff] %v2030_v38 }
 0x36f   : > { %4000 = vst [vmem:[%s5898_s12 + $0x530] sm:$0xff] %v2926_v37  ;;  %v2928_v39 = vpop.f32.mrb[83].mxu1 }
 0x370   : > { %4001 = vst [vmem:[%s5898_s12 + $0x538] sm:$0xff] %v2928_v39  ;;  %v2034_v40 = vpop.f32.mrb[84].mxu0 }
 0x371   : > { %4002 = vst [vmem:[%s5898_s12 + $0x540] sm:$0xff] %v2034_v40  ;;  %v2036_v42 = vpop.f32.mrb[85].mxu0 }
 0x372   : > { %v2932_v41 = vpop.f32.mrb[84].mxu1  ;;  %4003 = vst [vmem:[%s5898_s12 + $0x548] sm:$0xff] %v2036_v42 }
 0x373   : > { %4004 = vst [vmem:[%s5898_s12 + $0x550] sm:$0xff] %v2932_v41  ;;  %v2934_v43 = vpop.f32.mrb[85].mxu1 }
 0x374   : > { %4005 = vst [vmem:[%s5898_s12 + $0x558] sm:$0xff] %v2934_v43  ;;  %v2040_v44 = vpop.f32.mrb[86].mxu0 }
 0x375   : > { %4006 = vst [vmem:[%s5898_s12 + $0x560] sm:$0xff] %v2040_v44  ;;  %v2042_v46 = vpop.f32.mrb[87].mxu0 }
 0x376   : > { %v2938_v45 = vpop.f32.mrb[86].mxu1  ;;  %4007 = vst [vmem:[%s5898_s12 + $0x568] sm:$0xff] %v2042_v46 }
 0x377   : > { %4008 = vst [vmem:[%s5898_s12 + $0x570] sm:$0xff] %v2938_v45  ;;  %v2940_v47 = vpop.f32.mrb[87].mxu1 }
 0x378   : > { %4009 = vst [vmem:[%s5898_s12 + $0x578] sm:$0xff] %v2940_v47  ;;  %v2046_v48 = vpop.f32.mrb[88].mxu0 }
 0x379   : > { %4010 = vst [vmem:[%s5898_s12 + $0x580] sm:$0xff] %v2046_v48  ;;  %v2048_v50 = vpop.f32.mrb[89].mxu0 }
 0x37a   : > { %v2944_v49 = vpop.f32.mrb[88].mxu1  ;;  %4011 = vst [vmem:[%s5898_s12 + $0x588] sm:$0xff] %v2048_v50 }
 0x37b   : > { %4012 = vst [vmem:[%s5898_s12 + $0x590] sm:$0xff] %v2944_v49  ;;  %v2946_v51 = vpop.f32.mrb[89].mxu1 }
 0x37c   : > { %4013 = vst [vmem:[%s5898_s12 + $0x598] sm:$0xff] %v2946_v51  ;;  %v2052_v52 = vpop.f32.mrb[90].mxu0 }
 0x37d   : > { %4014 = vst [vmem:[%s5898_s12 + $0x5a0] sm:$0xff] %v2052_v52  ;;  %v2054_v54 = vpop.f32.mrb[91].mxu0 }
 0x37e   : > { %v2950_v53 = vpop.f32.mrb[90].mxu1  ;;  %4015 = vst [vmem:[%s5898_s12 + $0x5a8] sm:$0xff] %v2054_v54 }
 0x37f   : > { %4016 = vst [vmem:[%s5898_s12 + $0x5b0] sm:$0xff] %v2950_v53  ;;  %v2952_v55 = vpop.f32.mrb[91].mxu1 }
 0x380   : > { %4017 = vst [vmem:[%s5898_s12 + $0x5b8] sm:$0xff] %v2952_v55  ;;  %v2058_v56 = vpop.f32.mrb[92].mxu0 }
 0x381   : > { %4018 = vst [vmem:[%s5898_s12 + $0x5c0] sm:$0xff] %v2058_v56  ;;  %v2060_v58 = vpop.f32.mrb[93].mxu0 }
 0x382   : > { %v2956_v57 = vpop.f32.mrb[92].mxu1  ;;  %4019 = vst [vmem:[%s5898_s12 + $0x5c8] sm:$0xff] %v2060_v58 }
 0x383   : > { %4020 = vst [vmem:[%s5898_s12 + $0x5d0] sm:$0xff] %v2956_v57  ;;  %v2958_v59 = vpop.f32.mrb[93].mxu1 }
 0x384   : > { %4021 = vst [vmem:[%s5898_s12 + $0x5d8] sm:$0xff] %v2958_v59  ;;  %v2064_v60 = vpop.f32.mrb[94].mxu0 }
 0x385   : > { %4022 = vst [vmem:[%s5898_s12 + $0x5e0] sm:$0xff] %v2064_v60  ;;  %v2066_v62 = vpop.f32.mrb[95].mxu0 }
 0x386   : > { %v2962_v61 = vpop.f32.mrb[94].mxu1  ;;  %4023 = vst [vmem:[%s5898_s12 + $0x5e8] sm:$0xff] %v2066_v62 }
 0x387   : > { %4024 = vst [vmem:[%s5898_s12 + $0x5f0] sm:$0xff] %v2962_v61  ;;  %v2964_v63 = vpop.f32.mrb[95].mxu1 }
 0x388   : > { %4025 = vst [vmem:[%s5898_s12 + $0x5f8] sm:$0xff] %v2964_v63  ;;  %v2070_v0 = vpop.f32.mrb[96].mxu0 }
 0x389   : > { %4026 = vst [vmem:[%s5898_s12 + $0x600] sm:$0xff] %v2070_v0  ;;  %v2072_v2 = vpop.f32.mrb[97].mxu0 }
 0x38a   : > { %v2968_v1 = vpop.f32.mrb[96].mxu1  ;;  %4027 = vst [vmem:[%s5898_s12 + $0x608] sm:$0xff] %v2072_v2 }
 0x38b   : > { %4028 = vst [vmem:[%s5898_s12 + $0x610] sm:$0xff] %v2968_v1  ;;  %v2970_v3 = vpop.f32.mrb[97].mxu1 }
 0x38c   : > { %4029 = vst [vmem:[%s5898_s12 + $0x618] sm:$0xff] %v2970_v3  ;;  %v2076_v4 = vpop.f32.mrb[98].mxu0 }
 0x38d   : > { %4030 = vst [vmem:[%s5898_s12 + $0x620] sm:$0xff] %v2076_v4  ;;  %v2078_v6 = vpop.f32.mrb[99].mxu0 }
 0x38e   : > { %v2974_v5 = vpop.f32.mrb[98].mxu1  ;;  %4031 = vst [vmem:[%s5898_s12 + $0x628] sm:$0xff] %v2078_v6 }
 0x38f   : > { %4032 = vst [vmem:[%s5898_s12 + $0x630] sm:$0xff] %v2974_v5  ;;  %v2976_v7 = vpop.f32.mrb[99].mxu1 }
 0x390   : > { %4033 = vst [vmem:[%s5898_s12 + $0x638] sm:$0xff] %v2976_v7  ;;  %v2082_v8 = vpop.f32.mrb[100].mxu0 }
 0x391   : > { %4034 = vst [vmem:[%s5898_s12 + $0x640] sm:$0xff] %v2082_v8  ;;  %v2084_v10 = vpop.f32.mrb[101].mxu0 }
 0x392   : > { %v2980_v9 = vpop.f32.mrb[100].mxu1  ;;  %4035 = vst [vmem:[%s5898_s12 + $0x648] sm:$0xff] %v2084_v10 }
 0x393   : > { %4036 = vst [vmem:[%s5898_s12 + $0x650] sm:$0xff] %v2980_v9  ;;  %v2982_v11 = vpop.f32.mrb[101].mxu1 }
 0x394   : > { %4037 = vst [vmem:[%s5898_s12 + $0x658] sm:$0xff] %v2982_v11  ;;  %v2088_v12 = vpop.f32.mrb[102].mxu0 }
 0x395   : > { %4038 = vst [vmem:[%s5898_s12 + $0x660] sm:$0xff] %v2088_v12  ;;  %v2090_v14 = vpop.f32.mrb[103].mxu0 }
 0x396   : > { %v2986_v13 = vpop.f32.mrb[102].mxu1  ;;  %4039 = vst [vmem:[%s5898_s12 + $0x668] sm:$0xff] %v2090_v14 }
 0x397   : > { %4040 = vst [vmem:[%s5898_s12 + $0x670] sm:$0xff] %v2986_v13  ;;  %v2988_v15 = vpop.f32.mrb[103].mxu1 }
 0x398   : > { %4041 = vst [vmem:[%s5898_s12 + $0x678] sm:$0xff] %v2988_v15  ;;  %v2094_v16 = vpop.f32.mrb[104].mxu0 }
 0x399   : > { %4042 = vst [vmem:[%s5898_s12 + $0x680] sm:$0xff] %v2094_v16  ;;  %v2096_v18 = vpop.f32.mrb[105].mxu0 }
 0x39a   : > { %v2992_v17 = vpop.f32.mrb[104].mxu1  ;;  %4043 = vst [vmem:[%s5898_s12 + $0x688] sm:$0xff] %v2096_v18 }
 0x39b   : > { %4044 = vst [vmem:[%s5898_s12 + $0x690] sm:$0xff] %v2992_v17  ;;  %v2994_v19 = vpop.f32.mrb[105].mxu1 }
 0x39c   : > { %4045 = vst [vmem:[%s5898_s12 + $0x698] sm:$0xff] %v2994_v19  ;;  %v2100_v20 = vpop.f32.mrb[106].mxu0 }
 0x39d   : > { %4046 = vst [vmem:[%s5898_s12 + $0x6a0] sm:$0xff] %v2100_v20  ;;  %v2102_v22 = vpop.f32.mrb[107].mxu0 }
 0x39e   : > { %v2998_v21 = vpop.f32.mrb[106].mxu1  ;;  %4047 = vst [vmem:[%s5898_s12 + $0x6a8] sm:$0xff] %v2102_v22 }
 0x39f   : > { %4048 = vst [vmem:[%s5898_s12 + $0x6b0] sm:$0xff] %v2998_v21  ;;  %v3000_v23 = vpop.f32.mrb[107].mxu1 }
 0x3a0   : > { %4049 = vst [vmem:[%s5898_s12 + $0x6b8] sm:$0xff] %v3000_v23  ;;  %v2106_v24 = vpop.f32.mrb[108].mxu0 }
 0x3a1   : > { %4050 = vst [vmem:[%s5898_s12 + $0x6c0] sm:$0xff] %v2106_v24  ;;  %v2108_v26 = vpop.f32.mrb[109].mxu0 }
 0x3a2   : > { %v3004_v25 = vpop.f32.mrb[108].mxu1  ;;  %4051 = vst [vmem:[%s5898_s12 + $0x6c8] sm:$0xff] %v2108_v26 }
 0x3a3   : > { %4052 = vst [vmem:[%s5898_s12 + $0x6d0] sm:$0xff] %v3004_v25  ;;  %v3006_v27 = vpop.f32.mrb[109].mxu1 }
 0x3a4   : > { %4053 = vst [vmem:[%s5898_s12 + $0x6d8] sm:$0xff] %v3006_v27  ;;  %v2112_v28 = vpop.f32.mrb[110].mxu0 }
 0x3a5   : > { %4054 = vst [vmem:[%s5898_s12 + $0x6e0] sm:$0xff] %v2112_v28  ;;  %v2114_v30 = vpop.f32.mrb[111].mxu0 }
 0x3a6   : > { %v3010_v29 = vpop.f32.mrb[110].mxu1  ;;  %4055 = vst [vmem:[%s5898_s12 + $0x6e8] sm:$0xff] %v2114_v30 }
 0x3a7   : > { %4056 = vst [vmem:[%s5898_s12 + $0x6f0] sm:$0xff] %v3010_v29  ;;  %v3012_v31 = vpop.f32.mrb[111].mxu1 }
 0x3a8   : > { %4057 = vst [vmem:[%s5898_s12 + $0x6f8] sm:$0xff] %v3012_v31  ;;  %v2118_v32 = vpop.f32.mrb[112].mxu0 }
 0x3a9   : > { %4058 = vst [vmem:[%s5898_s12 + $0x700] sm:$0xff] %v2118_v32  ;;  %v2120_v34 = vpop.f32.mrb[113].mxu0 }
 0x3aa   : > { %v3016_v33 = vpop.f32.mrb[112].mxu1  ;;  %4059 = vst [vmem:[%s5898_s12 + $0x708] sm:$0xff] %v2120_v34 }
 0x3ab   : > { %4060 = vst [vmem:[%s5898_s12 + $0x710] sm:$0xff] %v3016_v33  ;;  %v3018_v35 = vpop.f32.mrb[113].mxu1 }
 0x3ac   : > { %4061 = vst [vmem:[%s5898_s12 + $0x718] sm:$0xff] %v3018_v35  ;;  %v2124_v36 = vpop.f32.mrb[114].mxu0 }
 0x3ad   : > { %4062 = vst [vmem:[%s5898_s12 + $0x720] sm:$0xff] %v2124_v36  ;;  %v2126_v38 = vpop.f32.mrb[115].mxu0 }
 0x3ae   : > { %v3022_v37 = vpop.f32.mrb[114].mxu1  ;;  %4063 = vst [vmem:[%s5898_s12 + $0x728] sm:$0xff] %v2126_v38 }
 0x3af   : > { %4064 = vst [vmem:[%s5898_s12 + $0x730] sm:$0xff] %v3022_v37  ;;  %v3024_v39 = vpop.f32.mrb[115].mxu1 }
 0x3b0   : > { %4065 = vst [vmem:[%s5898_s12 + $0x738] sm:$0xff] %v3024_v39  ;;  %v2130_v40 = vpop.f32.mrb[116].mxu0 }
 0x3b1   : > { %4066 = vst [vmem:[%s5898_s12 + $0x740] sm:$0xff] %v2130_v40  ;;  %v2132_v42 = vpop.f32.mrb[117].mxu0 }
 0x3b2   : > { %v3028_v41 = vpop.f32.mrb[116].mxu1  ;;  %4067 = vst [vmem:[%s5898_s12 + $0x748] sm:$0xff] %v2132_v42 }
 0x3b3   : > { %4068 = vst [vmem:[%s5898_s12 + $0x750] sm:$0xff] %v3028_v41  ;;  %v3030_v43 = vpop.f32.mrb[117].mxu1 }
 0x3b4   : > { %4069 = vst [vmem:[%s5898_s12 + $0x758] sm:$0xff] %v3030_v43  ;;  %v2136_v44 = vpop.f32.mrb[118].mxu0 }
 0x3b5   : > { %4070 = vst [vmem:[%s5898_s12 + $0x760] sm:$0xff] %v2136_v44  ;;  %v2138_v46 = vpop.f32.mrb[119].mxu0 }
 0x3b6   : > { %v3034_v45 = vpop.f32.mrb[118].mxu1  ;;  %4071 = vst [vmem:[%s5898_s12 + $0x768] sm:$0xff] %v2138_v46 }
 0x3b7   : > { %4072 = vst [vmem:[%s5898_s12 + $0x770] sm:$0xff] %v3034_v45  ;;  %v3036_v47 = vpop.f32.mrb[119].mxu1 }
 0x3b8   : > { %4073 = vst [vmem:[%s5898_s12 + $0x778] sm:$0xff] %v3036_v47  ;;  %v2142_v48 = vpop.f32.mrb[120].mxu0 }
 0x3b9   : > { %4074 = vst [vmem:[%s5898_s12 + $0x780] sm:$0xff] %v2142_v48  ;;  %v2144_v50 = vpop.f32.mrb[121].mxu0 }
 0x3ba   : > { %v3040_v49 = vpop.f32.mrb[120].mxu1  ;;  %4075 = vst [vmem:[%s5898_s12 + $0x788] sm:$0xff] %v2144_v50 }
 0x3bb   : > { %4076 = vst [vmem:[%s5898_s12 + $0x790] sm:$0xff] %v3040_v49  ;;  %v3042_v51 = vpop.f32.mrb[121].mxu1 }
 0x3bc   : > { %4077 = vst [vmem:[%s5898_s12 + $0x798] sm:$0xff] %v3042_v51  ;;  %v2148_v52 = vpop.f32.mrb[122].mxu0 }
 0x3bd   : > { %4078 = vst [vmem:[%s5898_s12 + $0x7a0] sm:$0xff] %v2148_v52  ;;  %v2150_v54 = vpop.f32.mrb[123].mxu0 }
 0x3be   : > { %v3046_v53 = vpop.f32.mrb[122].mxu1  ;;  %4079 = vst [vmem:[%s5898_s12 + $0x7a8] sm:$0xff] %v2150_v54 }
 0x3bf   : > { %4080 = vst [vmem:[%s5898_s12 + $0x7b0] sm:$0xff] %v3046_v53  ;;  %v3048_v55 = vpop.f32.mrb[123].mxu1 }
 0x3c0   : > { %4081 = vst [vmem:[%s5898_s12 + $0x7b8] sm:$0xff] %v3048_v55  ;;  %v2154_v56 = vpop.f32.mrb[124].mxu0 }
 0x3c1   : > { %4082 = vst [vmem:[%s5898_s12 + $0x7c0] sm:$0xff] %v2154_v56  ;;  %v2156_v58 = vpop.f32.mrb[125].mxu0 }
 0x3c2   : > { %v3052_v57 = vpop.f32.mrb[124].mxu1  ;;  %4083 = vst [vmem:[%s5898_s12 + $0x7c8] sm:$0xff] %v2156_v58 }
 0x3c3   : > { %4084 = vst [vmem:[%s5898_s12 + $0x7d0] sm:$0xff] %v3052_v57  ;;  %v3054_v59 = vpop.f32.mrb[125].mxu1 }
 0x3c4   : > { %4085 = vst [vmem:[%s5898_s12 + $0x7d8] sm:$0xff] %v3054_v59  ;;  %v2160_v60 = vpop.f32.mrb[126].mxu0 }
 0x3c5   : > { %4086 = vst [vmem:[%s5898_s12 + $0x7e0] sm:$0xff] %v2160_v60  ;;  %v2162_v62 = vpop.f32.mrb[127].mxu0 }
 0x3c6   : > { %v3058_v61 = vpop.f32.mrb[126].mxu1  ;;  %4087 = vst [vmem:[%s5898_s12 + $0x7e8] sm:$0xff] %v2162_v62 }
 0x3c7   : > { %4088 = vst [vmem:[%s5898_s12 + $0x7f0] sm:$0xff] %v3058_v61  ;;  %v3060_v63 = vpop.f32.mrb[127].mxu1 }
 0x3c8   : > { %4089 = vst [vmem:[%s5898_s12 + $0x7f8] sm:$0xff] %v3060_v63 }
 0x3c9   : > { %4975 = shalt.err (!%p4972_p8)
}
 0x3ca   : > { %s4976_s27 = scalar_lea.hbm %s6177_s29, 32768  ;;  %s4980_s7 = scalar_lea.hbm %s6265_s2, 262144 }
 0x3cb   : > { %p4977_p0 = scmp.ne.s32.totalorder %s6177_s29, %s4976_s27  ;;  %p4981_p7 = scmp.lt.u32.totalorder %s6177_s29, %s6265_s2 }
 0x3cc   : > { %p4982_p10 = scmp.lt.u32.totalorder %s4980_s7, %s4976_s27  ;;  %p4984_p13 = scmp.lt.u32.totalorder %s4976_s27, %s6177_s29 }
 0x3cd   : > { %p4978_p1 = pnand %p4977_p0, %p6299_p6 }
 0x3ce   : > { %p4983_p9 = por %p4982_p10, %p4981_p7 }
 0x3cf   : > { %p4979_p5 = pneg %p4978_p1 }
 0x3d0   : > { %p4985_p4 = por %p4984_p13, %p4983_p9 }
 0x3d2   : > { %p4986_p12 = pnand %p4985_p4, %p4979_p5 }
 0x3d4   : > { %4989 = shalt.err (!%p4986_p12)
}
 0x3d5   : > { %s5119_s26 = smov 512   ;;  %s5120_s19 = smov 1024  }
 0x3d6   : > { %s5121_s24 = smov 32  }
 0x3d7   : > { %4770 = dma.vmem_to_hbm [thread:$0]  (%p6299_p6), %s6179_s18, 32768, %s6177_s29, %s6187_s6, %s5119_s26, %s5120_s19, %s5121_s24  }
 0x3d8 PF: > { %p4784_p3 = scmp.ge.s32.totalorder %s5112_s22, 2  ;;  %s4122_s8 = sand.u32 1, %s5060_s9  }
 0x3d9   : > { %p6300_p2 = scmp.ne.s32.totalorder %s6292_s5, 0  ;;  %s4123_s20 = scalar_lea.sflag [#allocation5], %s4122_s8 }
 0x3db   : > { %p4780_p11 = pnand %p4784_p3, %p6300_p2 }
 0x3dd   : > { %5055 = dma.done.wait (!%p4780_p11), %s4123_s20, 32768  }
 0x3de   : > { %5057 = vsyncadd (!%p4780_p11), %s4123_s20, 4294934528  ;;  %s21_s22 = sadd.s32 1, %s5112_s22   ;;  %s6302_s18 = sld [smem:[#allocation12_spill]] }
 0x3df   : > { %p6216_p8 = scmp.ge.s32.totalorder %s21_s22, 10   ;;  %s6303_s19 = sld [smem:[#allocation13_spill]] }
 0x3e0   : > { %s6304_s20 = sld [smem:[#allocation14_spill]]  ;;  %s6305_s21 = sld [smem:[#allocation15_spill]] }
 0x3e1   : > { %s6306_s9 = smov %s5064_s10  ;;  %s6307_s10 = smov %s5068_s11 }
 0x3e2   : > { %s6308_s11 = smov %s5329_s0  ;;  %s6309_s12 = smov %s5076_s13 }
 0x3e3   : > { %s6310_s13 = smov %s5080_s14  ;;  %s6311_s14 = smov %s5311_s15 }
 0x3e4   : > { %s6312_s15 = smov %s5088_s16  ;;  %s6313_s16 = smov %s5092_s17 }
 0x3e5   : > { %s6314_s17 = smov %s5326_s4  ;;  %20 = sbr.rel (!%p6216_p8) target bundleno = 14 (0xe), region = 94 }
 0x3ec   :  { %4128 = vsyncpa [#allocation4], 1 }
 0x3ed   :  { %4130 = vsyncpa [#allocation4 + $0x1], 1 }
 0x3ee   :  { %4131 = vsyncpa [#allocation7], 1 }
 0x3ef   :  { %4133 = vsyncpa [#allocation7 + $0x1], 1 }
 0x3f0   :  { %4134 = vsyncpa [#allocation5], 1 }
 0x3f1   :  { %4136 = vsyncpa [#allocation5 + $0x1], 1 }

</bundles_post_ra>
